<compile_context>
chip_gen: v7x
topology: tpu7x:2x2x1
jax: 0.10.0
libtpu: 0.0.40
codegen_flags: <defaults>
</compile_context>

<pallas_src>
import jax
import jax.numpy as jnp
from jax.experimental import pallas as pl
from jax.experimental.pallas import tpu as pltpu


_K = 2048                               # fc1/fc2 input and output feature width
_TN = 512                               # fc1/fc2 output-column block (lane) width
_NB = _K // _TN                         # 4 column blocks per fc layer
_N_STEPS = 2 * _NB + 1                  # 4 fc1 + 4 fc2 + 1 head grid steps
_HEAD_PAD = 128                         # packed head cols: 80 + 20 + 5 = 105 -> 128
_HEAD_SLICES = {80: (0, 80), 20: (80, 100), 5: (100, 105)}
_VMEM_LIMIT_BYTES = 20 * 1024 * 1024


def _fused_classifier_kernel(x_ref, w_ref, b_ref, hw_ref, hb_ref,
                             y1_ref, y2_ref, out_ref, h1_ref, h2_ref):
    """Grid step j: fc1 col-block j (j<4), fc2 col-block j-4 (4<=j<8), head (j==8).

    w_ref streams one (2048, 512) bf16 weight block per step (fc1 blocks 0-3,
    then fc2 blocks 0-3; the head weights arrive via hw_ref, constant index).
    relu activations live in the h1/h2 VMEM scratches, chunked as
    (4, M, 512) so all scratch indexing stays on the leading (untiled) axis.
    """
    j = pl.program_id(0)

    @pl.when(j < _NB)
    def _fc1():
        # Full-K dot for y1 column block j; f32 accumulate on the MXU.
        y = jnp.dot(x_ref[...].astype(jnp.bfloat16), w_ref[...],
                    preferred_element_type=jnp.float32) + b_ref[...]
        y1_ref[...] = y.astype(y1_ref.dtype)
        h1_ref[j] = jnp.maximum(y, 0.0).astype(jnp.bfloat16)

    @pl.when((j >= _NB) & (j < 2 * _NB))
    def _fc2():
        # y2 column block (j - 4): K chunked in 4 so the LHS comes straight
        # out of the per-block h1 scratch (no lane-axis dynamic indexing).
        y = b_ref[...]
        for p in range(_NB):
            y = y + jnp.dot(h1_ref[p], w_ref[p * _TN:(p + 1) * _TN, :],
                            preferred_element_type=jnp.float32)
        y2_ref[...] = y.astype(y2_ref.dtype)
        h2_ref[j - _NB] = jnp.maximum(y, 0.0).astype(jnp.bfloat16)

    @pl.when(j == 2 * _NB)
    def _head():
        # Packed fc31|fc32|fc33 head (105 real cols padded to 128 lanes).
        o = hb_ref[...]
        for p in range(_NB):
            o = o + jnp.dot(h2_ref[p], hw_ref[p * _TN:(p + 1) * _TN, :],
                            preferred_element_type=jnp.float32)
        out_ref[...] = o.astype(out_ref.dtype)


def classifier_fused_pallas(x, w_main, b_main, head_w, head_b):
    """Fused fc1 -> relu -> fc2 -> relu -> packed-head forward.

    x:      [M, 2048] f32 (M a multiple of 8)
    w_main: [8, 2048, 512] bf16   (block-major fc1 blocks 0-3, fc2 blocks 0-3)
    b_main: [8, 1, 512]  f32      (matching bias chunks)
    head_w: [2048, 128]  bf16     (fc31|fc32|fc33 packed, zero padded)
    head_b: [1, 128]     f32
    Returns (y1 [M,2048] f32, y2 [M,2048] f32, head [M,128] f32).
    """
    M, K = x.shape
    assert K == _K
    assert M % 8 == 0, "batch (sublane) dim must be a multiple of 8"
    assert M <= 128, "tile the batch dimension before growing M past 128"
    assert w_main.shape == (2 * _NB, _K, _TN) and w_main.dtype == jnp.bfloat16
    assert b_main.shape == (2 * _NB, 1, _TN)
    assert head_w.shape == (_K, _HEAD_PAD) and head_w.dtype == jnp.bfloat16
    assert head_b.shape == (1, _HEAD_PAD)

    last_w = 2 * _NB - 1
    last_n = _NB - 1

    grid_spec = pltpu.PrefetchScalarGridSpec(
        num_scalar_prefetch=0,
        grid=(_N_STEPS,),
        in_specs=[
            # x: resident for the whole grid (fetched once in the prologue).
            pl.BlockSpec((M, _K), lambda j: (0, 0)),
            # main weight stream: one contiguous 2 MiB bf16 block per step;
            # the index is clamped so the head step re-uses (skips) block 7.
            pl.BlockSpec((None, _K, _TN),
                         lambda j: (jnp.minimum(j, last_w), 0, 0)),
            # matching bias chunk.
            pl.BlockSpec((None, 1, _TN),
                         lambda j: (jnp.minimum(j, last_w), 0, 0)),
            # packed head weight/bias: constant index -> fetched once.
            pl.BlockSpec((_K, _HEAD_PAD), lambda j: (0, 0)),
            pl.BlockSpec((1, _HEAD_PAD), lambda j: (0, 0)),
        ],
        out_specs=[
            # y1 column blocks written at steps 0..3, then held resident.
            pl.BlockSpec((M, _TN), lambda j: (0, jnp.minimum(j, last_n))),
            # y2 column blocks written at steps 4..7.
            pl.BlockSpec(
                (M, _TN),
                lambda j: (0, jnp.minimum(jnp.maximum(j - _NB, 0), last_n))),
            # head output written at the last step only.
            pl.BlockSpec((M, _HEAD_PAD), lambda j: (0, 0)),
        ],
        scratch_shapes=[
            pltpu.VMEM((_NB, M, _TN), jnp.bfloat16),   # h1 = relu(y1) chunks
            pltpu.VMEM((_NB, M, _TN), jnp.bfloat16),   # h2 = relu(y2) chunks
        ],
    )

    return pl.pallas_call(
        _fused_classifier_kernel,
        out_shape=(
            jax.ShapeDtypeStruct((M, _K), jnp.float32),
            jax.ShapeDtypeStruct((M, _K), jnp.float32),
            jax.ShapeDtypeStruct((M, _HEAD_PAD), jnp.float32),
        ),
        grid_spec=grid_spec,
        compiler_params=pltpu.CompilerParams(
            dimension_semantics=("arbitrary",),   # grid carries fc1->fc2->head dep
            vmem_limit_bytes=_VMEM_LIMIT_BYTES,
        ),
    )(x, w_main, b_main, head_w, head_b)


class ClassifierParams:
    """Deterministic synthetic parameters matching Classifier.__init__ shapes.

    Weights are generated in f32 (PyTorch-style uniform init), stored as bf16
    (perf: this is a pure weight-streaming kernel), and pre-packed once at
    construction time:
      * fc1/fc2 -> block-major [8, 2048, 512] bf16 + [8, 1, 512] f32 biases
      * fc31|fc32|fc33 -> lane-aligned [2048, 128] bf16 + [1, 128] f32 bias
    Nothing is reshaped/padded on the hot path.
    """

    def __init__(self, key):
        ks = jax.random.split(key, 10)

        def lin(kw, kb, fan_in, fan_out):
            bound = 1.0 / float(fan_in) ** 0.5
            w = jax.random.uniform(kw, (fan_in, fan_out), jnp.float32, -bound, bound)
            b = jax.random.uniform(kb, (fan_out,), jnp.float32, -bound, bound)
            return w, b

        fc1_w, self.fc1_b = lin(ks[0], ks[1], 2048, 2048)
        fc2_w, self.fc2_b = lin(ks[2], ks[3], 2048, 2048)
        fc31_w, self.fc31_b = lin(ks[4], ks[5], 2048, 80)
        fc32_w, self.fc32_b = lin(ks[6], ks[7], 2048, 20)
        fc33_w, self.fc33_b = lin(ks[8], ks[9], 2048, 5)

        # bf16 weight storage; the reference uses these same bf16 weights so
        # kernel and reference numerics match.
        self.fc1_w = fc1_w.astype(jnp.bfloat16)
        self.fc2_w = fc2_w.astype(jnp.bfloat16)
        self.fc31_w = fc31_w.astype(jnp.bfloat16)
        self.fc32_w = fc32_w.astype(jnp.bfloat16)
        self.fc33_w = fc33_w.astype(jnp.bfloat16)

        # --- kernel-side packing (done once, off the hot path) ---
        def block_major(w):            # [K, N] -> [N // _TN, K, _TN]
            k, n = w.shape
            return w.reshape(k, n // _TN, _TN).transpose(1, 0, 2)

        self.w_main = jnp.concatenate(
            [block_major(self.fc1_w), block_major(self.fc2_w)], axis=0)     # [8,2048,512] bf16
        self.b_main = jnp.concatenate(
            [self.fc1_b.reshape(_NB, 1, _TN), self.fc2_b.reshape(_NB, 1, _TN)],
            axis=0)                                                          # [8,1,512] f32

        w_cat = jnp.concatenate([self.fc31_w, self.fc32_w, self.fc33_w], axis=1)
        b_cat = jnp.concatenate([self.fc31_b, self.fc32_b, self.fc33_b], axis=0)
        pad = _HEAD_PAD - w_cat.shape[1]
        self.head_w = jnp.pad(w_cat, ((0, 0), (0, pad)))                     # [2048,128] bf16
        self.head_b = jnp.pad(b_cat, (0, pad)).reshape(1, _HEAD_PAD)         # [1,128] f32


def classifier_forward(params, x, output_size):
    """Pallas implementation of Classifier.forward (eval mode).

    x: [B, 2048] float32.  Returns (y1, y2, head_out) with
    head_out.shape == (B, output_size).
    """
    B = x.shape[0]
    B_pad = ((B + 7) // 8) * 8
    x_p = jnp.pad(x, ((0, B_pad - B), (0, 0))) if B_pad != B else x

    # dropout (eval mode) -> identity
    y1, y2, head = classifier_fused_pallas(
        x_p, params.w_main, params.b_main, params.head_w, params.head_b)

    # original module: fc32 if output_size==20, fc33 if ==5, else fc31
    lo, hi = _HEAD_SLICES.get(output_size, _HEAD_SLICES[80])
    return y1[:B], y2[:B], head[:B, lo:hi]


def _reference_forward(params, x, output_size):
    """Plain-JAX reference with identical mixed-precision numerics."""
    xb = x.astype(jnp.bfloat16)
    y1 = jnp.dot(xb, params.fc1_w, preferred_element_type=jnp.float32) + params.fc1_b
    h = jnp.maximum(y1, 0.0).astype(jnp.bfloat16)
    y2 = jnp.dot(h, params.fc2_w, preferred_element_type=jnp.float32) + params.fc2_b
    h = jnp.maximum(y2, 0.0).astype(jnp.bfloat16)
    if output_size == 20:
        w, b = params.fc32_w, params.fc32_b
    elif output_size == 5:
        w, b = params.fc33_w, params.fc33_b
    else:
        w, b = params.fc31_w, params.fc31_b
    out = jnp.dot(h, w, preferred_element_type=jnp.float32) + b
    return y1, y2, out


if __name__ == "__main__":
    key = jax.random.PRNGKey(0)
    k_param, k_x = jax.random.split(key)

    params = ClassifierParams(k_param)

    B = 4  # small batch; feature dim 2048 is fixed by the module definition
    x = jax.random.normal(k_x, (B, _K), jnp.float32)

    ok = True
    for output_size in (80, 20, 5):
        y1, y2, out = classifier_forward(params, x, output_size)
        jax.block_until_ready((y1, y2, out))

        r1, r2, rout = _reference_forward(params, x, output_size)
        ok &= bool(jnp.allclose(y1, r1, atol=1e-3, rtol=1e-3))
        ok &= bool(jnp.allclose(y2, r2, atol=1e-3, rtol=1e-3))
        ok &= bool(jnp.allclose(out, rout, atol=1e-3, rtol=1e-3))
        ok &= out.shape == (B, output_size)

    if ok:
        print("KERNEL_OK")
    else:
        print("KERNEL_MISMATCH")
</pallas_src>

<mosaic_0001>
module attributes {stable_mosaic.version = 11 : i64} {
  func.func @_fused_classifier_kernel(%arg0: i32, %arg1: memref<8x2048xf32, #tpu.memory_space<vmem>>, %arg2: memref<1x2048x512xbf16, #tpu.memory_space<vmem>>, %arg3: memref<1x1x512xf32, #tpu.memory_space<vmem>>, %arg4: memref<2048x128xbf16, #tpu.memory_space<vmem>>, %arg5: memref<1x128xf32, #tpu.memory_space<vmem>>, %arg6: memref<8x512xf32, #tpu.memory_space<vmem>>, %arg7: memref<8x512xf32, #tpu.memory_space<vmem>>, %arg8: memref<8x128xf32, #tpu.memory_space<vmem>>, %arg9: memref<4x8x512xbf16, #tpu.memory_space<vmem>>, %arg10: memref<4x8x512xbf16, #tpu.memory_space<vmem>>) attributes {dimension_semantics = [#tpu.dimension_semantics<arbitrary>], iteration_bounds = array<i64: 9>, scalar_prefetch = 0 : i64, scratch_operands = 2 : i64, tpu.core_type = #tpu.core_type<tc>, window_params = [{pipeline_mode = #tpu.pipeline_mode<synchronous>, transform_indices = @transform_0, window_bounds = array<i64: 8, 2048>}, {transform_indices = @transform_1, window_bounds = array<i64: 1, 2048, 512>}, {transform_indices = @transform_2, window_bounds = array<i64: 1, 1, 512>}, {pipeline_mode = #tpu.pipeline_mode<synchronous>, transform_indices = @transform_3, window_bounds = array<i64: 2048, 128>}, {pipeline_mode = #tpu.pipeline_mode<synchronous>, transform_indices = @transform_4, window_bounds = array<i64: 1, 128>}, {transform_indices = @transform_5, window_bounds = array<i64: 8, 512>}, {transform_indices = @transform_6, window_bounds = array<i64: 8, 512>}, {pipeline_mode = #tpu.pipeline_mode<synchronous>, transform_indices = @transform_7, window_bounds = array<i64: 8, 128>}]} {
    %c4_i32 = arith.constant 4 : i32
    %0 = arith.cmpi slt, %arg0, %c4_i32 : i32
    %1 = arith.extui %0 : i1 to i32
    %c0_i32 = arith.constant 0 : i32
    %2 = arith.cmpi ne, %1, %c0_i32 : i32
    scf.if %2 {
      %c0 = arith.constant 0 : index
      %c0_4 = arith.constant 0 : index
      %11 = vector.load %arg1[%c0, %c0_4] : memref<8x2048xf32, #tpu.memory_space<vmem>>, vector<8x2048xf32>
      %12 = arith.truncf %11 : vector<8x2048xf32> to vector<8x2048xbf16>
      %c0_5 = arith.constant 0 : index
      %c0_6 = arith.constant 0 : index
      %c0_7 = arith.constant 0 : index
      %13 = vector.load %arg2[%c0_5, %c0_6, %c0_7] : memref<1x2048x512xbf16, #tpu.memory_space<vmem>>, vector<1x2048x512xbf16>
      %14 = vector.shape_cast %13 : vector<1x2048x512xbf16> to vector<2048x512xbf16>
      %cst = arith.constant dense<0.000000e+00> : vector<8x512xf32>
      %15 = tpu.matmul %12, %14, %cst {dimension_numbers = #tpu.dot_dimension_numbers<[1], [0], [0], [1], [0, 0, 1, 1], [], []>} : vector<8x2048xbf16>, vector<2048x512xbf16>, vector<8x512xf32> -> vector<8x512xf32>
      %c0_8 = arith.constant 0 : index
      %c0_9 = arith.constant 0 : index
      %c0_10 = arith.constant 0 : index
      %16 = vector.load %arg3[%c0_8, %c0_9, %c0_10] : memref<1x1x512xf32, #tpu.memory_space<vmem>>, vector<1x1x512xf32>
      %17 = vector.shape_cast %16 : vector<1x1x512xf32> to vector<1x512xf32>
      %18 = vector.broadcast %17 : vector<1x512xf32> to vector<8x512xf32>
      %19 = arith.addf %15, %18 : vector<8x512xf32>
      %c0_11 = arith.constant 0 : index
      %c0_12 = arith.constant 0 : index
      %20 = vector.load %arg6[%c0_11, %c0_12] : memref<8x512xf32, #tpu.memory_space<vmem>>, vector<8x512xf32>
      tpu.vector_store %arg6[%c0_11, %c0_12], %19 {strides = array<i32>} : memref<8x512xf32, #tpu.memory_space<vmem>>, vector<8x512xf32>,
      %cst_13 = arith.constant 0.000000e+00 : f32
      %21 = vector.broadcast %cst_13 : f32 to vector<8x512xf32>
      %22 = arith.maximumf %19, %21 : vector<8x512xf32>
      %23 = arith.truncf %22 : vector<8x512xf32> to vector<8x512xbf16>
      %24 = arith.index_cast %arg0 : i32 to index
      %c0_14 = arith.constant 0 : index
      %c0_15 = arith.constant 0 : index
      %25 = vector.load %arg9[%24, %c0_14, %c0_15] : memref<4x8x512xbf16, #tpu.memory_space<vmem>>, vector<1x8x512xbf16>
      %26 = vector.shape_cast %25 : vector<1x8x512xbf16> to vector<8x512xbf16>
      %27 = vector.shape_cast %23 : vector<8x512xbf16> to vector<1x8x512xbf16>
      tpu.vector_store %arg9[%24, %c0_14, %c0_15], %27 {strides = array<i32>} : memref<4x8x512xbf16, #tpu.memory_space<vmem>>, vector<1x8x512xbf16>,
    } else {
    }
    %c4_i32_0 = arith.constant 4 : i32
    %3 = arith.cmpi sge, %arg0, %c4_i32_0 : i32
    %c8_i32 = arith.constant 8 : i32
    %4 = arith.cmpi slt, %arg0, %c8_i32 : i32
    %5 = arith.andi %3, %4 : i1
    %6 = arith.extui %5 : i1 to i32
    %c0_i32_1 = arith.constant 0 : i32
    %7 = arith.cmpi ne, %6, %c0_i32_1 : i32
    scf.if %7 {
      %c0 = arith.constant 0 : index
      %c0_4 = arith.constant 0 : index
      %c0_5 = arith.constant 0 : index
      %11 = vector.load %arg3[%c0, %c0_4, %c0_5] : memref<1x1x512xf32, #tpu.memory_space<vmem>>, vector<1x1x512xf32>
      %12 = vector.shape_cast %11 : vector<1x1x512xf32> to vector<1x512xf32>
      %c0_6 = arith.constant 0 : index
      %c0_7 = arith.constant 0 : index
      %c0_8 = arith.constant 0 : index
      %13 = vector.load %arg9[%c0_6, %c0_7, %c0_8] : memref<4x8x512xbf16, #tpu.memory_space<vmem>>, vector<1x8x512xbf16>
      %14 = vector.shape_cast %13 : vector<1x8x512xbf16> to vector<8x512xbf16>
      %c0_9 = arith.constant 0 : index
      %c0_10 = arith.constant 0 : index
      %c0_11 = arith.constant 0 : index
      %15 = vector.load %arg2[%c0_9, %c0_10, %c0_11] : memref<1x2048x512xbf16, #tpu.memory_space<vmem>>, vector<1x512x512xbf16>
      %16 = vector.shape_cast %15 : vector<1x512x512xbf16> to vector<512x512xbf16>
      %cst = arith.constant dense<0.000000e+00> : vector<8x512xf32>
      %17 = tpu.matmul %14, %16, %cst {dimension_numbers = #tpu.dot_dimension_numbers<[1], [0], [0], [1], [0, 0, 1, 1], [], []>} : vector<8x512xbf16>, vector<512x512xbf16>, vector<8x512xf32> -> vector<8x512xf32>
      %18 = vector.broadcast %12 : vector<1x512xf32> to vector<8x512xf32>
      %19 = arith.addf %18, %17 : vector<8x512xf32>
      %c1 = arith.constant 1 : index
      %c0_12 = arith.constant 0 : index
      %c0_13 = arith.constant 0 : index
      %20 = vector.load %arg9[%c1, %c0_12, %c0_13] : memref<4x8x512xbf16, #tpu.memory_space<vmem>>, vector<1x8x512xbf16>
      %21 = vector.shape_cast %20 : vector<1x8x512xbf16> to vector<8x512xbf16>
      %c0_14 = arith.constant 0 : index
      %c512 = arith.constant 512 : index
      %c0_15 = arith.constant 0 : index
      %22 = vector.load %arg2[%c0_14, %c512, %c0_15] : memref<1x2048x512xbf16, #tpu.memory_space<vmem>>, vector<1x512x512xbf16>
      %23 = vector.shape_cast %22 : vector<1x512x512xbf16> to vector<512x512xbf16>
      %cst_16 = arith.constant dense<0.000000e+00> : vector<8x512xf32>
      %24 = tpu.matmul %21, %23, %cst_16 {dimension_numbers = #tpu.dot_dimension_numbers<[1], [0], [0], [1], [0, 0, 1, 1], [], []>} : vector<8x512xbf16>, vector<512x512xbf16>, vector<8x512xf32> -> vector<8x512xf32>
      %25 = arith.addf %19, %24 : vector<8x512xf32>
      %c2 = arith.constant 2 : index
      %c0_17 = arith.constant 0 : index
      %c0_18 = arith.constant 0 : index
      %26 = vector.load %arg9[%c2, %c0_17, %c0_18] : memref<4x8x512xbf16, #tpu.memory_space<vmem>>, vector<1x8x512xbf16>
      %27 = vector.shape_cast %26 : vector<1x8x512xbf16> to vector<8x512xbf16>
      %c0_19 = arith.constant 0 : index
      %c1024 = arith.constant 1024 : index
      %c0_20 = arith.constant 0 : index
      %28 = vector.load %arg2[%c0_19, %c1024, %c0_20] : memref<1x2048x512xbf16, #tpu.memory_space<vmem>>, vector<1x512x512xbf16>
      %29 = vector.shape_cast %28 : vector<1x512x512xbf16> to vector<512x512xbf16>
      %cst_21 = arith.constant dense<0.000000e+00> : vector<8x512xf32>
      %30 = tpu.matmul %27, %29, %cst_21 {dimension_numbers = #tpu.dot_dimension_numbers<[1], [0], [0], [1], [0, 0, 1, 1], [], []>} : vector<8x512xbf16>, vector<512x512xbf16>, vector<8x512xf32> -> vector<8x512xf32>
      %31 = arith.addf %25, %30 : vector<8x512xf32>
      %c3 = arith.constant 3 : index
      %c0_22 = arith.constant 0 : index
      %c0_23 = arith.constant 0 : index
      %32 = vector.load %arg9[%c3, %c0_22, %c0_23] : memref<4x8x512xbf16, #tpu.memory_space<vmem>>, vector<1x8x512xbf16>
      %33 = vector.shape_cast %32 : vector<1x8x512xbf16> to vector<8x512xbf16>
      %c0_24 = arith.constant 0 : index
      %c1536 = arith.constant 1536 : index
      %c0_25 = arith.constant 0 : index
      %34 = vector.load %arg2[%c0_24, %c1536, %c0_25] : memref<1x2048x512xbf16, #tpu.memory_space<vmem>>, vector<1x512x512xbf16>
      %35 = vector.shape_cast %34 : vector<1x512x512xbf16> to vector<512x512xbf16>
      %cst_26 = arith.constant dense<0.000000e+00> : vector<8x512xf32>
      %36 = tpu.matmul %33, %35, %cst_26 {dimension_numbers = #tpu.dot_dimension_numbers<[1], [0], [0], [1], [0, 0, 1, 1], [], []>} : vector<8x512xbf16>, vector<512x512xbf16>, vector<8x512xf32> -> vector<8x512xf32>
      %37 = arith.addf %31, %36 : vector<8x512xf32>
      %c0_27 = arith.constant 0 : index
      %c0_28 = arith.constant 0 : index
      %38 = vector.load %arg7[%c0_27, %c0_28] : memref<8x512xf32, #tpu.memory_space<vmem>>, vector<8x512xf32>
      tpu.vector_store %arg7[%c0_27, %c0_28], %37 {strides = array<i32>} : memref<8x512xf32, #tpu.memory_space<vmem>>, vector<8x512xf32>,
      %cst_29 = arith.constant 0.000000e+00 : f32
      %39 = vector.broadcast %cst_29 : f32 to vector<8x512xf32>
      %40 = arith.maximumf %37, %39 : vector<8x512xf32>
      %41 = arith.truncf %40 : vector<8x512xf32> to vector<8x512xbf16>
      %c4_i32_30 = arith.constant 4 : i32
      %42 = arith.subi %arg0, %c4_i32_30 : i32
      %43 = arith.index_cast %42 : i32 to index
      %c0_31 = arith.constant 0 : index
      %c0_32 = arith.constant 0 : index
      %44 = vector.load %arg10[%43, %c0_31, %c0_32] : memref<4x8x512xbf16, #tpu.memory_space<vmem>>, vector<1x8x512xbf16>
      %45 = vector.shape_cast %44 : vector<1x8x512xbf16> to vector<8x512xbf16>
      %46 = vector.shape_cast %41 : vector<8x512xbf16> to vector<1x8x512xbf16>
      tpu.vector_store %arg10[%43, %c0_31, %c0_32], %46 {strides = array<i32>} : memref<4x8x512xbf16, #tpu.memory_space<vmem>>, vector<1x8x512xbf16>,
    } else {
    }
    %c8_i32_2 = arith.constant 8 : i32
    %8 = arith.cmpi eq, %arg0, %c8_i32_2 : i32
    %9 = arith.extui %8 : i1 to i32
    %c0_i32_3 = arith.constant 0 : i32
    %10 = arith.cmpi ne, %9, %c0_i32_3 : i32
    scf.if %10 {
      %c0 = arith.constant 0 : index
      %c0_4 = arith.constant 0 : index
      %11 = vector.load %arg5[%c0, %c0_4] : memref<1x128xf32, #tpu.memory_space<vmem>>, vector<1x128xf32>
      %c0_5 = arith.constant 0 : index
      %c0_6 = arith.constant 0 : index
      %c0_7 = arith.constant 0 : index
      %12 = vector.load %arg10[%c0_5, %c0_6, %c0_7] : memref<4x8x512xbf16, #tpu.memory_space<vmem>>, vector<1x8x512xbf16>
      %13 = vector.shape_cast %12 : vector<1x8x512xbf16> to vector<8x512xbf16>
      %c0_8 = arith.constant 0 : index
      %c0_9 = arith.constant 0 : index
      %14 = vector.load %arg4[%c0_8, %c0_9] : memref<2048x128xbf16, #tpu.memory_space<vmem>>, vector<512x128xbf16>
      %cst = arith.constant dense<0.000000e+00> : vector<8x128xf32>
      %15 = tpu.matmul %13, %14, %cst {dimension_numbers = #tpu.dot_dimension_numbers<[1], [0], [0], [1], [0, 0, 1, 1], [], []>} : vector<8x512xbf16>, vector<512x128xbf16>, vector<8x128xf32> -> vector<8x128xf32>
      %16 = vector.broadcast %11 : vector<1x128xf32> to vector<8x128xf32>
      %17 = arith.addf %16, %15 : vector<8x128xf32>
      %c1 = arith.constant 1 : index
      %c0_10 = arith.constant 0 : index
      %c0_11 = arith.constant 0 : index
      %18 = vector.load %arg10[%c1, %c0_10, %c0_11] : memref<4x8x512xbf16, #tpu.memory_space<vmem>>, vector<1x8x512xbf16>
      %19 = vector.shape_cast %18 : vector<1x8x512xbf16> to vector<8x512xbf16>
      %c512 = arith.constant 512 : index
      %c0_12 = arith.constant 0 : index
      %20 = vector.load %arg4[%c512, %c0_12] : memref<2048x128xbf16, #tpu.memory_space<vmem>>, vector<512x128xbf16>
      %cst_13 = arith.constant dense<0.000000e+00> : vector<8x128xf32>
      %21 = tpu.matmul %19, %20, %cst_13 {dimension_numbers = #tpu.dot_dimension_numbers<[1], [0], [0], [1], [0, 0, 1, 1], [], []>} : vector<8x512xbf16>, vector<512x128xbf16>, vector<8x128xf32> -> vector<8x128xf32>
      %22 = arith.addf %17, %21 : vector<8x128xf32>
      %c2 = arith.constant 2 : index
      %c0_14 = arith.constant 0 : index
      %c0_15 = arith.constant 0 : index
      %23 = vector.load %arg10[%c2, %c0_14, %c0_15] : memref<4x8x512xbf16, #tpu.memory_space<vmem>>, vector<1x8x512xbf16>
      %24 = vector.shape_cast %23 : vector<1x8x512xbf16> to vector<8x512xbf16>
      %c1024 = arith.constant 1024 : index
      %c0_16 = arith.constant 0 : index
      %25 = vector.load %arg4[%c1024, %c0_16] : memref<2048x128xbf16, #tpu.memory_space<vmem>>, vector<512x128xbf16>
      %cst_17 = arith.constant dense<0.000000e+00> : vector<8x128xf32>
      %26 = tpu.matmul %24, %25, %cst_17 {dimension_numbers = #tpu.dot_dimension_numbers<[1], [0], [0], [1], [0, 0, 1, 1], [], []>} : vector<8x512xbf16>, vector<512x128xbf16>, vector<8x128xf32> -> vector<8x128xf32>
      %27 = arith.addf %22, %26 : vector<8x128xf32>
      %c3 = arith.constant 3 : index
      %c0_18 = arith.constant 0 : index
      %c0_19 = arith.constant 0 : index
      %28 = vector.load %arg10[%c3, %c0_18, %c0_19] : memref<4x8x512xbf16, #tpu.memory_space<vmem>>, vector<1x8x512xbf16>
      %29 = vector.shape_cast %28 : vector<1x8x512xbf16> to vector<8x512xbf16>
      %c1536 = arith.constant 1536 : index
      %c0_20 = arith.constant 0 : index
      %30 = vector.load %arg4[%c1536, %c0_20] : memref<2048x128xbf16, #tpu.memory_space<vmem>>, vector<512x128xbf16>
      %cst_21 = arith.constant dense<0.000000e+00> : vector<8x128xf32>
      %31 = tpu.matmul %29, %30, %cst_21 {dimension_numbers = #tpu.dot_dimension_numbers<[1], [0], [0], [1], [0, 0, 1, 1], [], []>} : vector<8x512xbf16>, vector<512x128xbf16>, vector<8x128xf32> -> vector<8x128xf32>
      %32 = arith.addf %27, %31 : vector<8x128xf32>
      %c0_22 = arith.constant 0 : index
      %c0_23 = arith.constant 0 : index
      %33 = vector.load %arg8[%c0_22, %c0_23] : memref<8x128xf32, #tpu.memory_space<vmem>>, vector<8x128xf32>
      tpu.vector_store %arg8[%c0_22, %c0_23], %32 {strides = array<i32>} : memref<8x128xf32, #tpu.memory_space<vmem>>, vector<8x128xf32>,
    } else {
    }
    return
  }
  func.func @transform_0(%arg0: i32) -> (i32, i32) {
    %c0_i32 = arith.constant 0 : i32
    %c0_i32_0 = arith.constant 0 : i32
    %c0_i32_1 = arith.constant 0 : i32
    return %c0_i32, %c0_i32_0 : i32, i32
  }
  func.func @transform_1(%arg0: i32) -> (i32, i32, i32) {
    %c7_i32 = arith.constant 7 : i32
    %0 = arith.minsi %arg0, %c7_i32 : i32
    %c0_i32 = arith.constant 0 : i32
    %c0_i32_0 = arith.constant 0 : i32
    %c0_i32_1 = arith.constant 0 : i32
    return %0, %c0_i32, %c0_i32_0 : i32, i32, i32
  }
  func.func @transform_2(%arg0: i32) -> (i32, i32, i32) {
    %c7_i32 = arith.constant 7 : i32
    %0 = arith.minsi %arg0, %c7_i32 : i32
    %c0_i32 = arith.constant 0 : i32
    %c0_i32_0 = arith.constant 0 : i32
    %c0_i32_1 = arith.constant 0 : i32
    return %0, %c0_i32, %c0_i32_0 : i32, i32, i32
  }
  func.func @transform_3(%arg0: i32) -> (i32, i32) {
    %c0_i32 = arith.constant 0 : i32
    %c0_i32_0 = arith.constant 0 : i32
    %c0_i32_1 = arith.constant 0 : i32
    return %c0_i32, %c0_i32_0 : i32, i32
  }
  func.func @transform_4(%arg0: i32) -> (i32, i32) {
    %c0_i32 = arith.constant 0 : i32
    %c0_i32_0 = arith.constant 0 : i32
    %c0_i32_1 = arith.constant 0 : i32
    return %c0_i32, %c0_i32_0 : i32, i32
  }
  func.func @transform_5(%arg0: i32) -> (i32, i32) {
    %c3_i32 = arith.constant 3 : i32
    %0 = arith.minsi %arg0, %c3_i32 : i32
    %c0_i32 = arith.constant 0 : i32
    %c0_i32_0 = arith.constant 0 : i32
    return %c0_i32, %0 : i32, i32
  }
  func.func @transform_6(%arg0: i32) -> (i32, i32) {
    %c4_i32 = arith.constant 4 : i32
    %0 = arith.subi %arg0, %c4_i32 : i32
    %c0_i32 = arith.constant 0 : i32
    %1 = arith.maxsi %0, %c0_i32 : i32
    %c3_i32 = arith.constant 3 : i32
    %2 = arith.minsi %1, %c3_i32 : i32
    %c0_i32_0 = arith.constant 0 : i32
    %c0_i32_1 = arith.constant 0 : i32
    return %c0_i32_0, %2 : i32, i32
  }
  func.func @transform_7(%arg0: i32) -> (i32, i32) {
    %c0_i32 = arith.constant 0 : i32
    %c0_i32_0 = arith.constant 0 : i32
    %c0_i32_1 = arith.constant 0 : i32
    return %c0_i32, %c0_i32_0 : i32, i32
  }
}

</mosaic_0001>

<bundles_post_ra>
// kernel: tpu_custom_call.1
= control target key start
LH: loop header
LB: loop body
LE: loop exit
PB: predicated region body
PF: predicated region fallthrough
CT: control target
= control target key end

     0   :  { %s15058_s0 = inlined_call_operand.hbm [shape: f32[8,2048], index: 0, kind: input, shape index: {}]   ;;  %s15059_s1 = inlined_call_operand.hbm [shape: bf16[8,2048,512], index: 1, kind: input, shape index: {}]   ;;  %s15060_s2 = inlined_call_operand.hbm [shape: f32[8,1,512], index: 2, kind: input, shape index: {}]   ;;  %s15061_s3 = inlined_call_operand.hbm [shape: bf16[2048,128], index: 3, kind: input, shape index: {}]   ;;  %s15062_s4 = inlined_call_operand.hbm [shape: f32[1,128], index: 4, kind: input, shape index: {}]   ;;  %s15063_s5 = inlined_call_operand.hbm [shape: f32[8,2048], index: 5, kind: output, shape index: {0}]   ;;  %s15064_s6 = inlined_call_operand.hbm [shape: f32[8,2048], index: 6, kind: output, shape index: {1}]   ;;  %s15065_s7 = inlined_call_operand.hbm [shape: f32[8,128], index: 7, kind: output, shape index: {2}]  }
   0x1   :  { %15093 = sst [smem:[#allocation34_spill]] %s15059_s1 }
   0x2   :  { %15094 = sst [smem:[#allocation35_spill]] %s15061_s3 }
   0x3   :  { %15095 = sst [smem:[#allocation36_spill]] %s15063_s5 }
   0x4   :  { %15096 = sst [smem:[#allocation37_spill]] %s15064_s6 }
   0x5   :  { %15097 = sst [smem:[#allocation38_spill]] %s15065_s7 }
   0x6   :  { %13 = vsyncpa [#allocation5], 0 }
   0x7   :  { %14 = vsyncpa [#allocation8], 0 }
   0x8   :  { %16 = vsyncpa [#allocation8 + $0x1], 0 }
   0x9   :  { %17 = vsyncpa [#allocation11], 0 }
   0xa   :  { %18 = vsyncpa [#allocation6], 0 }
   0xb   :  { %20 = vsyncpa [#allocation6 + $0x1], 0 }
   0xc   :  { %21 = vsyncpa [#allocation15], 0 }
   0xd   :  { %23 = vsyncpa [#allocation15 + $0x1], 0  ;;  %s13530_s24 = smov 0   ;;  %s13532_s25 = smov 0  }
   0xe   :  { %s13534_s26 = smov 0   ;;  %s13536_s27 = smov 0  }
   0xf   :  { %s13538_s28 = smov 0   ;;  %s13540_s29 = smov 0  }
  0x10   :  { %s13542_s30 = smov 0   ;;  %s13544_s8 = smov 0  }
  0x11   :  { %s13546_s9 = smov 0   ;;  %s13548_s10 = smov 0  }
  0x12 LB: > { %15098 = sst [smem:[#allocation23_spill]] %s13448_s26  ;;  %s13579_s11 = sadd.s32 4294967295, %s13476_s10   ;;  %s13476_s10 = sphi %s13548_s10, %s15155_s10   ;;  %s13472_s9 = sphi %s13546_s9, %s15168_s9   ;;  %s13468_s8 = sphi %s13544_s8, %s15167_s8   ;;  %s13464_s30 = sphi %s13542_s30, %s15166_s30   ;;  %s13460_s29 = sphi %s13540_s29, %s15165_s29   ;;  %s13456_s28 = sphi %s13538_s28, %s15164_s28   ;;  %s13452_s27 = sphi %s13536_s27, %s15163_s27   ;;  %s13448_s26 = sphi %s13534_s26, %s15157_s26   ;;  %s13444_s25 = sphi %s13532_s25, %s15162_s25   ;;  %s13440_s24 = sphi %s13530_s24, %s15161_s24  }
  0x13   : > { %15099 = sst [smem:[#allocation24_spill]] %s13452_s27  ;;  %s15066_s12 = sadd.s32 4294967294, %s13476_s10  }
  0x14   : > { %15100 = sst [smem:[#allocation25_spill]] %s13460_s29  ;;  %s13583_s13 = sadd.s32 1, %s13476_s10  }
  0x15   : > { %15101 = sst [smem:[#allocation26_spill]] %s13476_s10  ;;  %p74_p0 = scmp.ne.s32.totalorder %s13468_s8, %s13464_s30 }
  0x16   : > { %15102 = sst [smem:[#allocation27_spill]] %s13583_s13  ;;  %p15067_p1 = scmp.eq.s32.totalorder %s13579_s11, 0 }
  0x17   : > { %p156_p2 = scmp.lt.s32.totalorder %s13476_s10, 3  ;;  %p158_p3 = scmp.lt.s32.totalorder %s13583_s13, 3 }
  0x18   : > { %s163_s14 = sadd.s32 1, %s13460_s29  ;;  %p13592_p4 = por %p15067_p1, %p74_p0 }
  0x19   : > { %p173_p5 = scmp.ne.s32.totalorder %s13460_s29, %s13456_s28  ;;  %p15069_p6 = scmp.eq.s32.totalorder %s13579_s11, 8 }
  0x1a   : > { %s15103_s15 = scalar_select %p13592_p4, 1, 0 }
  0x1b   : > { %s157_s16 = scalar_select %p156_p2, %s13476_s10, 3 }
  0x1c   : > { %s159_s17 = scalar_select %p158_p3, %s13583_s13, 3 }
  0x1d   : > { %p179_p7 = scmp.ne.s32.totalorder %s13456_s28, %s13452_s27  ;;  %p13605_p8 = scmp.eq.s32.totalorder %s15066_s12, 8 }
  0x1e   : > { %s160_s18 = ssub.s32 %s157_s16, %s159_s17  ;;  %p13611_p10 = por %p15069_p6, %p173_p5 }
  0x1f   : > { %p161_p9 = scmp.eq.s32.totalorder %s160_s18, 0  ;;  %p13617_p11 = por %p13605_p8, %p179_p7 }
  0x20   : > { %s15105_s20 = scalar_select %p13611_p10, 1, 0 }
  0x21   : > { %s15107_s21 = scalar_select %p13617_p11, 1, 0 }
  0x22   : > { %15106 = sst [smem:[#allocation28_spill]] %s15105_s20  ;;  %s9751_s22 = sadd.s32 4294967292, %s13476_s10 }
  0x23   : > { %15108 = sst [smem:[#allocation29_spill]] %s15107_s21  ;;  %p187_p12 = scmp.gt.s32.totalorder %s9751_s22, 0 }
  0x24   : > { %s13623_s23 = scalar_select %p161_p9, %s13460_s29, %s163_s14  }
  0x25   : > { %p9752_p13 = scmp.lt.s32.totalorder %s9751_s22, 3  ;;  %s9757_s30 = sadd.s32 4294967292, %s13583_s13 }
  0x26   : > { %15109 = sst [smem:[#allocation30_spill]] %s13623_s23  ;;  %s199_s16 = sadd.s32 1, %s13448_s26 }
  0x27   : > { %s15170_s22 = smov (!%p187_p12, %s9751_s22), 0  ;;  %p192_p0 = scmp.gt.s32.totalorder %s9757_s30, 0 }
  0x28   : > { %p9758_p2 = scmp.lt.s32.totalorder %s9757_s30, 3  ;;  %s15172_s22 = smov (!%p9752_p13, %s15170_s22), 3 }
  0x29   : > { %s15174_s30 = smov (!%p192_p0, %s9757_s30), 0  ;;  %p209_p3 = scmp.ne.s32.totalorder %s13448_s26, %s13444_s25 }
  0x2a   : > { %p215_p5 = scmp.ne.s32.totalorder %s13444_s25, %s13440_s24  ;;  %s15176_s30 = smov (!%p9758_p2, %s15174_s30), 3 }
  0x2b   : > { %p13633_p7 = por %p209_p3, %p15069_p6  ;;  %s196_s18 = ssub.s32 %s15172_s22, %s15176_s30 }
  0x2c   : > { %p13639_p9 = por %p215_p5, %p13605_p8  ;;  %p9763_p12 = scmp.ge.s32.totalorder %s13476_s10, 1 }
  0x2d   : > { %s15110_s14 = scalar_select %p13633_p7, 1, 0 }
  0x2e   : > { %s15111_s17 = scalar_select %p13639_p9, 1, 0 }
  0x2f   : > { %p197_p13 = scmp.eq.s32.totalorder %s196_s18, 0  ;;  %p244_p0 = scmp.lt.s32.totalorder %s13476_s10, 10 }
  0x30   : > { %15112 = sst [smem:[#allocation31_spill]] %s15111_s17  ;;  %s13478_s23 = smov [#allocation10]  }
  0x31   : > { %s13646_s12 = scalar_select %p197_p13, %s13448_s26, %s199_s16  }
  0x32   : > { %p13648_p1 = pnand %p9763_p12, %p244_p0  ;;  %s267_s29 = sshll.u32 %s13478_s23, 4  ;;  %s268_s29 = int_to_ptr.vmem [resolvable:$true] %s267_s29 }
  0x33   : > { %15113 = sst [smem:[#allocation32_spill]] %s13646_s12  ;;  %p15115_p8 = scmp.eq.s32.totalorder %s13579_s11, 0 }
  0x34   : > { %s15114_s24 = scalar_select %p13648_p1, 1, 0 }
  0x35   : > { %p11330_p2 = pneg %p13648_p1  ;;  %s15117_s3 = sld [smem:[#allocation35_spill]] }
  0x37   : > { %p13656_p3 = pnand %p11330_p2, %p15115_p8 }
  0x39   : > { %s15116_s19 = scalar_select %p13656_p3, 1, 0 }
  0x3a   : > { %p13671_p13 = pneg %p13656_p3 }
  0x3b   : > { %s13148_s18 = scalar_lea.hbm %s15117_s3, 16384 }
  0x3c   : > { %p13149_p12 = scmp.ne.s32.totalorder %s15117_s3, %s13148_s18  ;;  %p13155_p8 = scmp.lt.u32.totalorder %s13148_s18, %s15117_s3 }
  0x3e   : > { %p13151_p0 = pnand %p13671_p13, %p13149_p12 }
  0x40   : > { %p13152_p2 = pneg %p13151_p0 }
  0x42   : > { %p13157_p6 = pnand %p13155_p8, %p13152_p2 }
  0x44   : > { %13160 = shalt.err (!%p13157_p6)
}
  0x45   : > { %s13161_s30 = scalar_lea.vmem %s268_s29, 16384  ;;  %p13169_p10 = scmp.lt.s32.totalorder %s268_s29, %s268_s29 }
  0x46   : > { %p13162_p5 = scmp.ne.s32.totalorder %s268_s29, %s13161_s30  ;;  %p13170_p7 = scmp.lt.s32.totalorder %s13161_s30, %s13161_s30 }
  0x48   : > { %p13164_p9 = pnand %p13162_p5, %p13671_p13  ;;  %p13171_p4 = por %p13170_p7, %p13169_p10 }
  0x4a   : > { %p13165_p11 = pneg %p13164_p9 }
  0x4c   : > { %p13172_p1 = pnand %p13171_p4, %p13165_p11 }
  0x4e   : > { %13175 = shalt.err (!%p13172_p1)
}
  0x4f   : > { %s13479_s26 = smov 64   ;;  %s13480_s12 = smov 4  }
  0x50   : > { %11336 = dma.hbm_to_vmem [thread:$0]  (!%p13656_p3), %s15117_s3, 16384, %s268_s29, [#allocation11], %s13479_s26, %s13479_s26, %s13480_s12  }
  0x51   : > { %p15119_p1 = scmp.lt.s32.totalorder %s13476_s10, 7  ;;  %p15120_p4 = scmp.lt.s32.totalorder %s13583_s13, 7 }
  0x52   : > { %p68_p6 = scmp.ne.s32.totalorder %s13472_s9, %s13468_s8  ;;  %p69_p10 = scmp.eq.s32.totalorder %s13476_s10, 0 }
  0x53   : > { %s13690_s16 = scalar_select %p15119_p1, %s13476_s10, 7 }
  0x54   : > { %s57_s18 = scalar_select %p15120_p4, %s13583_s13, 7 }
  0x55   : > { %p11357_p11 = scmp.lt.s32.totalorder %s13476_s10, 9  ;;  %p70_p9 = por %p69_p10, %p68_p6 }
  0x56   : > { %s58_s30 = ssub.s32 %s13690_s16, %s57_s18  ;;  %s292_s22 = sand.u32 1, %s13476_s10  }
  0x57   : > { %p59_p7 = scmp.eq.s32.totalorder %s58_s30, 0  ;;  %s15080_s27 = sand.u32 1, %s13472_s9  }
  0x58   : > { %s15121_s7 = sadd.s32 1, %s13472_s9  ;;  %s9768_s29 = sshll.u32 %s15080_s27, 12 }
  0x59   : > { %s13705_s5 = scalar_select %p59_p7, %s13472_s9, %s15121_s7  }
  0x5a   : > { %s10998_s26 = sshll.u32 %s13690_s16, 16  ;;  %s15123_s1 = sld [smem:[#allocation34_spill]] }
  0x5b   : > { %15122 = sst [smem:[#allocation33_spill]] %s13705_s5  ;;  %s296_s18 = scalar_lea.vmem [#allocation7], %s9768_s29 }
  0x5c   : > { %s305_s30 = sshll.u32 %s296_s18, 4  ;;  %p13717_p5 = pnand %p11357_p11, %p70_p9  ;;  %s13715_s30 = int_to_ptr.vmem [resolvable:$true] %s305_s30 }
  0x5d   : > { %s13721_s7 = scalar_lea.sflag [#allocation8], %s292_s22 }
  0x5e   : > { %s15124_s3 = scalar_select %p13717_p5, 1, 0 }
  0x5f   : > { %p15090_p0 = pneg %p13717_p5 }
  0x60   : > { %s13713_s17 = scalar_lea.hbm %s15123_s1, %s10998_s26  ;;  %s13181_s12 = scalar_lea.hbm %s15123_s1, 524288 }
  0x61   : > { %s13176_s27 = scalar_lea.hbm %s13713_s17, 65536  ;;  %p13182_p1 = scmp.lt.u32.totalorder %s13713_s17, %s15123_s1 }
  0x62   : > { %p13177_p12 = scmp.ne.s32.totalorder %s13713_s17, %s13176_s27  ;;  %p13183_p4 = scmp.lt.u32.totalorder %s13181_s12, %s13176_s27 }
  0x63   : > { %p13185_p10 = scmp.lt.u32.totalorder %s13176_s27, %s13713_s17 }
  0x64   : > { %p13179_p2 = pnand %p15090_p0, %p13177_p12  ;;  %p13184_p6 = por %p13183_p4, %p13182_p1 }
  0x66   : > { %p13180_p8 = pneg %p13179_p2  ;;  %p13186_p11 = por %p13185_p10, %p13184_p6 }
  0x68   : > { %p13187_p7 = pnand %p13186_p11, %p13180_p8 }
  0x6a   : > { %13190 = shalt.err (!%p13187_p7)
}
  0x6b   : > { %s13191_s22 = scalar_lea.vmem %s13715_s30, 65536  ;;  %s13481_s29 = smov [#allocation7]  }
  0x6c   : > { %p13192_p9 = scmp.ne.s32.totalorder %s13715_s30, %s13191_s22  ;;  %s13196_s26 = sshll.u32 %s13481_s29, 4  ;;  %s13197_s26 = int_to_ptr.vmem [resolvable:$false] %s13196_s26 }
  0x6d   : > { %s13198_s21 = scalar_lea.vmem %s13197_s26, 131072  ;;  %p13199_p3 = scmp.lt.s32.totalorder %s13715_s30, %s13197_s26 }
  0x6e   : > { %p13194_p12 = pnand %p13192_p9, %p15090_p0  ;;  %p13200_p1 = scmp.lt.s32.totalorder %s13198_s21, %s13191_s22 }
  0x70   : > { %p13195_p2 = pneg %p13194_p12  ;;  %p13201_p4 = por %p13200_p1, %p13199_p3 }
  0x72   : > { %p13202_p6 = pnand %p13201_p4, %p13195_p2 }
  0x74   : > { %13205 = shalt.err (!%p13202_p6)
}
  0x75   : > { %s13482_s27 = smov 256   ;;  %s13483_s12 = smov 16  }
  0x76   : > { %11343 = dma.hbm_to_vmem [thread:$0]  (!%p13717_p5), %s13713_s17, 65536, %s13715_s30, %s13721_s7, %s13482_s27, %s13482_s27, %s13483_s12  }
  0x77   : > { %s13484_s18 = smov [#allocation4]   ;;  %s13485_s29 = smov [#allocation12]  }
  0x78   : > { %s257_s1 = sshll.u32 %s13484_s18, 4  ;;  %s281_s5 = sshll.u32 %s13485_s29, 4  ;;  %s258_s1 = int_to_ptr.vmem [resolvable:$true] %s257_s1  ;;  %s282_s5 = int_to_ptr.vmem [resolvable:$true] %s281_s5 }
  0x79   : > { %s13206_s22 = scalar_lea.hbm %s15058_s0, 2048 }
  0x7a   : > { %p13207_p3 = scmp.ne.s32.totalorder %s15058_s0, %s13206_s22  ;;  %p13213_p11 = scmp.lt.u32.totalorder %s13206_s22, %s15058_s0 }
  0x7c   : > { %p13209_p8 = pnand %p13207_p3, %p13671_p13 }
  0x7e   : > { %p13210_p10 = pneg %p13209_p8 }
  0x80   : > { %p13215_p7 = pnand %p13213_p11, %p13210_p10 }
  0x82   : > { %13218 = shalt.err (!%p13215_p7)
}
  0x83   : > { %s13219_s17 = scalar_lea.vmem %s258_s1, 2048  ;;  %p13227_p1 = scmp.lt.s32.totalorder %s258_s1, %s258_s1 }
  0x84   : > { %p13220_p9 = scmp.ne.s32.totalorder %s258_s1, %s13219_s17  ;;  %p13228_p4 = scmp.lt.s32.totalorder %s13219_s17, %s13219_s17 }
  0x86   : > { %p13222_p12 = pnand %p13220_p9, %p13671_p13  ;;  %p13229_p6 = por %p13228_p4, %p13227_p1 }
  0x88   : > { %p13223_p2 = pneg %p13222_p12 }
  0x8a   : > { %p13230_p0 = pnand %p13229_p6, %p13223_p2 }
  0x8c   : > { %13233 = shalt.err (!%p13230_p0)
}
  0x8d   : > { %p15125_p3 = scmp.ne.s32.totalorder %s15116_s19, 0  ;;  %s15126_s6 = sand.u32 1, %s13472_s9  }
  0x8e   : > { %s9771_s20 = sshll.u32 %s15126_s6, 2  ;;  %s13234_s12 = scalar_lea.hbm %s15062_s4, 16 }
  0x8f   : > { %11333 = dma.hbm_to_vmem [thread:$0]  (!%p15125_p3), %s15058_s0, 2048, %s258_s1, [#allocation5]  }
  0x90   : > { %p13235_p8 = scmp.ne.s32.totalorder %s15062_s4, %s13234_s12  ;;  %p13241_p11 = scmp.lt.u32.totalorder %s13234_s12, %s15062_s4 }
  0x92   : > { %p13237_p0 = pnand %p13235_p8, %p13671_p13 }
  0x94   : > { %p13238_p10 = pneg %p13237_p0 }
  0x96   : > { %p13243_p7 = pnand %p13241_p11, %p13238_p10 }
  0x98   : > { %13246 = shalt.err (!%p13243_p7)
}
  0x99   : > { %s13247_s1 = scalar_lea.vmem %s282_s5, 16  ;;  %s13254_s21 = scalar_lea.vmem %s282_s5, 32 }
  0x9a   : > { %p13248_p9 = scmp.ne.s32.totalorder %s282_s5, %s13247_s1  ;;  %p13255_p1 = scmp.lt.s32.totalorder %s282_s5, %s282_s5 }
  0x9b   : > { %p13256_p4 = scmp.lt.s32.totalorder %s13254_s21, %s13247_s1 }
  0x9c   : > { %p13250_p12 = pnand %p13248_p9, %p13671_p13 }
  0x9d   : > { %p13257_p6 = por %p13256_p4, %p13255_p1 }
  0x9e   : > { %p13251_p2 = pneg %p13250_p12 }
  0xa0   : > { %p13258_p5 = pnand %p13257_p6, %p13251_p2 }
  0xa2   : > { %13261 = shalt.err (!%p13258_p5)
}
  0xa3   : > { %11339 = dma.hbm_to_vmem [thread:$0]  (!%p15125_p3), %s15062_s4, 16, %s282_s5, [#allocation11]  }
  0xa4   : > { %s10999_s13 = sshll.u32 %s13690_s16, 6  ;;  %s319_s27 = scalar_lea.vmem [#allocation9], %s9771_s20 }
  0xa5   : > { %s13791_s23 = scalar_lea.hbm %s15060_s2, %s10999_s13  ;;  %s329_s12 = sshll.u32 %s319_s27, 4  ;;  %s330_s12 = int_to_ptr.vmem [resolvable:$true] %s329_s12 }
  0xa6   : > { %s13262_s19 = scalar_lea.hbm %s13791_s23, 64  ;;  %p15127_p5 = scmp.ne.s32.totalorder %s15124_s3, 0 }
  0xa7   : > { %p13263_p13 = scmp.ne.s32.totalorder %s13791_s23, %s13262_s19  ;;  %s13267_s18 = scalar_lea.hbm %s15060_s2, 512 }
  0xa8   : > { %p15128_p8 = pneg %p15127_p5  ;;  %p13268_p3 = scmp.lt.u32.totalorder %s13791_s23, %s15060_s2 }
  0xa9   : > { %p13269_p11 = scmp.lt.u32.totalorder %s13267_s18, %s13262_s19  ;;  %p13271_p9 = scmp.lt.u32.totalorder %s13262_s19, %s13791_s23 }
  0xaa   : > { %p13265_p0 = pnand %p13263_p13, %p15128_p8 }
  0xab   : > { %p13270_p7 = por %p13269_p11, %p13268_p3 }
  0xac   : > { %p13266_p10 = pneg %p13265_p0 }
  0xad   : > { %p13272_p12 = por %p13271_p9, %p13270_p7 }
  0xaf   : > { %p13273_p2 = pnand %p13272_p12, %p13266_p10 }
  0xb1   : > { %13276 = shalt.err (!%p13273_p2)
}
  0xb2   : > { %s13277_s20 = scalar_lea.vmem %s330_s12, 64  ;;  %p15129_p4 = pmov %p15128_p8 }
  0xb3   : > { %p13278_p1 = scmp.ne.s32.totalorder %s330_s12, %s13277_s20  ;;  %s13486_s22 = smov [#allocation9]  }
  0xb4   : > { %s13282_s1 = sshll.u32 %s13486_s22, 4  ;;  %s13283_s1 = int_to_ptr.vmem [resolvable:$false] %s13282_s1 }
  0xb5   : > { %p13280_p6 = pnand %p13278_p1, %p15129_p4  ;;  %s13284_s21 = scalar_lea.vmem %s13283_s1, 128 }
  0xb6   : > { %p13285_p8 = scmp.lt.s32.totalorder %s330_s12, %s13283_s1  ;;  %p13286_p0 = scmp.lt.s32.totalorder %s13284_s21, %s13277_s20 }
  0xb7   : > { %p13281_p13 = pneg %p13280_p6 }
  0xb8   : > { %p13287_p3 = por %p13286_p0, %p13285_p8 }
  0xba   : > { %p13288_p11 = pnand %p13287_p3, %p13281_p13 }
  0xbc   : > { %13291 = shalt.err (!%p13288_p11)
}
  0xbd   : > { %11346 = dma.hbm_to_vmem [thread:$0]  (!%p15127_p5), %s13791_s23, 64, %s330_s12, %s13721_s7  }
  0xbe   : > { %p15130_p10 = scmp.ne.s32.totalorder %s15114_s24, 0 }
  0xbf   : > { %p15131_p7 = scmp.eq.s32.totalorder (!%p15130_p10), %s13579_s11, 0 }
  0xc0   : > { %338 = sbr.rel (%p15130_p10) target bundleno = 2124 (0x84c), region = 40 }
  0xc7   : > { %13415 = dma.done.wait (%p15131_p7), [#allocation5], 2048   ;;  %p15132_p9 = pmov %p15131_p7 }
  0xc8   : > { %s344_s17 = sand.u32 1, %s13579_s11   ;;  %s346_s10 = sand.u32 1, %s13468_s8  }
  0xc9   : > { %13417 = vsyncadd (%p15132_p9), [#allocation5], 4294965248  ;;  %s9776_s13 = sshll.u32 %s346_s10, 12  ;;  %s345_s3 = scalar_lea.sflag [#allocation8], %s344_s17 }
  0xca   : > { %s13823_s6 = scalar_lea.vmem [#allocation7], %s9776_s13  ;;  %p15133_p5 = scmp.ne.s32.totalorder %s15103_s15, 0 }
  0xcc   : > { %13419 = dma.done.wait (%p15133_p5), %s345_s3, 65600  }
  0xcd   : > { %13421 = vsyncadd (%p15133_p5), %s345_s3, 4294901696  ;;  %s13829_s24 = sshll.u32 %s346_s10, 2  ;;  %p15134_p12 = pmov %p15131_p7 }
  0xce   : > { %s357_s7 = scalar_lea.vmem [#allocation9], %s13829_s24 }
  0xcf   : > { %13423 = dma.done.wait (%p15134_p12), [#allocation11], 16400   ;;  %p15135_p2 = pmov %p15131_p7 }
  0xd0   : > { %s394_s30 = sand.u32 1, %s13456_s28   ;;  %s401_s23 = sand.u32 1, %s13444_s25  }
  0xd1   : > { %13425 = vsyncadd (%p15135_p2), [#allocation11], 4294950896  ;;  %s9780_s27 = sshll.u32 %s394_s30, 5  ;;  %s9781_s12 = sshll.u32 %s401_s23, 5 }
  0xd2   : > { %s13840_s15 = scalar_lea.vmem [#allocation13], %s9780_s27  ;;  %s13842_s19 = scalar_lea.vmem [#allocation14], %s9781_s12 }
  0xd3   : > { %p9782_p1 = scmp.ge.s32.totalorder %s13579_s11, 4 }
  0xd4   : > { %v11452_v0 = vld [vmem:[%s13823_s6 + $0x4] ss:$16 sps:$4 sm:$0xff] (!%p9782_p1)   ;;  %v11454_v1 = vld [vmem:[%s13823_s6 + $0xc] ss:$16 sps:$4 sm:$0xff] (!%p9782_p1)   ;;  %v11456_v2 = vld [vmem:[%s13823_s6] ss:$16 sps:$4 sm:$0xff] (!%p9782_p1)  }
  0xd5   : > { %423 = sbr.rel (%p9782_p1) target bundleno = 945 (0x3b1), region = 64  ;;  %3550 = vmatprep.subr.bf16.mxu0 (!%p9782_p1), %v11452_v0  ;;  %v11457_v3 = vld [vmem:[%s13823_s6 + $0x8] ss:$16 sps:$4 sm:$0xff] (!%p9782_p1)   ;;  %3878 = vmatprep.subr.bf16.mxu1 (!%p9782_p1), %v11454_v1  ;;  %v11458_v4 = vld [vmem:[%s13823_s6 + $0x24] ss:$16 sps:$4 sm:$0xff] (!%p9782_p1)   ;;  %s11002_s5 = sshll.u32 (!%p9782_p1), %s13579_s11, 4 }
  0xd6   : > { %3551 = vmatpush1.bf16.msra.mxu0 (!%p9782_p1), %v11456_v2  ;;  %3879 = vmatpush1.bf16.msra.mxu1 (!%p9782_p1), %v11457_v3  ;;  %v11460_v5 = vld [vmem:[%s13823_s6 + $0x2c] ss:$16 sps:$4 sm:$0xff] (!%p9782_p1)   ;;  %v11462_v6 = vld [vmem:[%s13823_s6 + $0x20] ss:$16 sps:$4 sm:$0xff] (!%p9782_p1)   ;;  %v11463_v7 = vld [vmem:[%s13823_s6 + $0x28] ss:$16 sps:$4 sm:$0xff] (!%p9782_p1)  }
  0xd7   : > { %3552 = vmatprep.subr.bf16.mxu0 (!%p9782_p1), %v11458_v4  ;;  %3880 = vmatprep.subr.bf16.mxu1 (!%p9782_p1), %v11460_v5  ;;  %v11464_v8 = vld [vmem:[%s13823_s6 + $0x44] ss:$16 sps:$4 sm:$0xff] (!%p9782_p1)   ;;  %v11466_v9 = vld [vmem:[%s13823_s6 + $0x4c] ss:$16 sps:$4 sm:$0xff] (!%p9782_p1)   ;;  %v11468_v10 = vld [vmem:[%s13823_s6 + $0x40] ss:$16 sps:$4 sm:$0xff] (!%p9782_p1)  }
  0xd8   : > { %v11469_v11 = vld [vmem:[%s13823_s6 + $0x48] ss:$16 sps:$4 sm:$0xff] (!%p9782_p1)   ;;  %v11470_v12 = vld [vmem:[%s13823_s6 + $0x64] ss:$16 sps:$4 sm:$0xff] (!%p9782_p1)   ;;  %v11472_v13 = vld [vmem:[%s13823_s6 + $0x6c] ss:$16 sps:$4 sm:$0xff] (!%p9782_p1)  }
  0xd9   : > { %v11474_v14 = vld [vmem:[%s13823_s6 + $0x60] ss:$16 sps:$4 sm:$0xff] (!%p9782_p1)   ;;  %v11475_v15 = vld [vmem:[%s13823_s6 + $0x68] ss:$16 sps:$4 sm:$0xff] (!%p9782_p1)   ;;  %v11476_v16 = vld [vmem:[%s13823_s6 + $0x84] ss:$16 sps:$4 sm:$0xff] (!%p9782_p1)  }
  0xda   : > { %3553 = vmatpush1.bf16.msra.mxu0 (!%p9782_p1), %v11462_v6  ;;  %3881 = vmatpush1.bf16.msra.mxu1 (!%p9782_p1), %v11463_v7  ;;  %v11478_v17 = vld [vmem:[%s13823_s6 + $0x8c] ss:$16 sps:$4 sm:$0xff] (!%p9782_p1)   ;;  %v11480_v18 = vld [vmem:[%s13823_s6 + $0x80] ss:$16 sps:$4 sm:$0xff] (!%p9782_p1)   ;;  %v11481_v19 = vld [vmem:[%s13823_s6 + $0x88] ss:$16 sps:$4 sm:$0xff] (!%p9782_p1)  }
  0xdb   : > { %3554 = vmatprep.subr.bf16.mxu0 (!%p9782_p1), %v11464_v8  ;;  %3882 = vmatprep.subr.bf16.mxu1 (!%p9782_p1), %v11466_v9  ;;  %v11482_v20 = vld [vmem:[%s13823_s6 + $0xa4] ss:$16 sps:$4 sm:$0xff] (!%p9782_p1)   ;;  %v11484_v21 = vld [vmem:[%s13823_s6 + $0xac] ss:$16 sps:$4 sm:$0xff] (!%p9782_p1)   ;;  %v11486_v22 = vld [vmem:[%s13823_s6 + $0xa0] ss:$16 sps:$4 sm:$0xff] (!%p9782_p1)  }
  0xdc   : > { %v11487_v23 = vld [vmem:[%s13823_s6 + $0xa8] ss:$16 sps:$4 sm:$0xff]   ;;  %v11488_v24 = vld [vmem:[%s13823_s6 + $0xc4] ss:$16 sps:$4 sm:$0xff]   ;;  %v11490_v25 = vld [vmem:[%s13823_s6 + $0xcc] ss:$16 sps:$4 sm:$0xff]  }
  0xdd   : > { %v11492_v26 = vld [vmem:[%s13823_s6 + $0xc0] ss:$16 sps:$4 sm:$0xff]   ;;  %v11493_v27 = vld [vmem:[%s13823_s6 + $0xc8] ss:$16 sps:$4 sm:$0xff]   ;;  %v11494_v28 = vld [vmem:[%s13823_s6 + $0xe4] ss:$16 sps:$4 sm:$0xff]  }
  0xde   : > { %3555 = vmatpush1.bf16.msra.mxu0 %v11468_v10  ;;  %3883 = vmatpush1.bf16.msra.mxu1 %v11469_v11  ;;  %v11496_v29 = vld [vmem:[%s13823_s6 + $0xec] ss:$16 sps:$4 sm:$0xff]   ;;  %v11498_v30 = vld [vmem:[%s13823_s6 + $0xe0] ss:$16 sps:$4 sm:$0xff]   ;;  %v11499_v31 = vld [vmem:[%s13823_s6 + $0xe8] ss:$16 sps:$4 sm:$0xff]  }
  0xdf   : > { %3556 = vmatprep.subr.bf16.mxu0 %v11470_v12  ;;  %3884 = vmatprep.subr.bf16.mxu1 %v11472_v13  ;;  %v11500_v32 = vld [vmem:[%s13823_s6 + $0x104] ss:$16 sps:$4 sm:$0xff]   ;;  %v11502_v33 = vld [vmem:[%s13823_s6 + $0x10c] ss:$16 sps:$4 sm:$0xff]   ;;  %v11504_v34 = vld [vmem:[%s13823_s6 + $0x100] ss:$16 sps:$4 sm:$0xff]  }
  0xe0   : > { %v11505_v35 = vld [vmem:[%s13823_s6 + $0x108] ss:$16 sps:$4 sm:$0xff]   ;;  %v11506_v36 = vld [vmem:[%s13823_s6 + $0x124] ss:$16 sps:$4 sm:$0xff]   ;;  %v11508_v37 = vld [vmem:[%s13823_s6 + $0x12c] ss:$16 sps:$4 sm:$0xff]  }
  0xe1   : > { %v11510_v38 = vld [vmem:[%s13823_s6 + $0x120] ss:$16 sps:$4 sm:$0xff]   ;;  %v11511_v39 = vld [vmem:[%s13823_s6 + $0x128] ss:$16 sps:$4 sm:$0xff]   ;;  %v11512_v40 = vld [vmem:[%s13823_s6 + $0x144] ss:$16 sps:$4 sm:$0xff]  }
  0xe2   : > { %3557 = vmatpush1.bf16.msra.mxu0 %v11474_v14  ;;  %3885 = vmatpush1.bf16.msra.mxu1 %v11475_v15  ;;  %v11514_v41 = vld [vmem:[%s13823_s6 + $0x14c] ss:$16 sps:$4 sm:$0xff]   ;;  %v11516_v42 = vld [vmem:[%s13823_s6 + $0x140] ss:$16 sps:$4 sm:$0xff]   ;;  %v11517_v43 = vld [vmem:[%s13823_s6 + $0x148] ss:$16 sps:$4 sm:$0xff]  }
  0xe3   : > { %3558 = vmatprep.subr.bf16.mxu0 %v11476_v16  ;;  %3886 = vmatprep.subr.bf16.mxu1 %v11478_v17  ;;  %v11518_v44 = vld [vmem:[%s13823_s6 + $0x164] ss:$16 sps:$4 sm:$0xff]   ;;  %v11520_v45 = vld [vmem:[%s13823_s6 + $0x16c] ss:$16 sps:$4 sm:$0xff]   ;;  %v11522_v47 = vld [vmem:[%s13823_s6 + $0x160] ss:$16 sps:$4 sm:$0xff]  }
  0xe4   : > { %v425_v46 = vld [vmem:[#allocation4 + $0x8] sm:$0xff]  ;;  %v11524_v50 = vld [vmem:[%s13823_s6 + $0x184] ss:$16 sps:$4 sm:$0xff]   ;;  %v11528_v52 = vld [vmem:[%s13823_s6 + $0x180] ss:$16 sps:$4 sm:$0xff]   ;;  %s4232_s16 = scalar_lea.vmem [#allocation2], %s11002_s5 }
  0xe5   : > { %v441_v48 = vpack.c.bf16 %v425_v46, %v425_v46  ;;  %v11523_v49 = vld [vmem:[%s13823_s6 + $0x168] ss:$16 sps:$4 sm:$0xff]   ;;  %v11526_v51 = vld [vmem:[%s13823_s6 + $0x18c] ss:$16 sps:$4 sm:$0xff]   ;;  %v11530_v54 = vld [vmem:[%s13823_s6 + $0x1a4] ss:$16 sps:$4 sm:$0xff]  }
  0xe6   : > { %3559 = vmatpush1.bf16.msra.mxu0 %v11480_v18  ;;  %3887 = vmatpush1.bf16.msra.mxu1 %v11481_v19  ;;  %v11529_v53 = vld [vmem:[%s13823_s6 + $0x188] ss:$16 sps:$4 sm:$0xff]   ;;  %v11532_v55 = vld [vmem:[%s13823_s6 + $0x1ac] ss:$16 sps:$4 sm:$0xff]   ;;  %v11534_v56 = vld [vmem:[%s13823_s6 + $0x1a0] ss:$16 sps:$4 sm:$0xff]  }
  0xe7   : > { %3560 = vmatprep.subr.bf16.mxu0 %v11482_v20  ;;  %3888 = vmatprep.subr.bf16.mxu1 %v11484_v21  ;;  %v11535_v57 = vld [vmem:[%s13823_s6 + $0x1a8] ss:$16 sps:$4 sm:$0xff]   ;;  %v11536_v58 = vld [vmem:[%s13823_s6 + $0x1c4] ss:$16 sps:$4 sm:$0xff]   ;;  %v11538_v59 = vld [vmem:[%s13823_s6 + $0x1cc] ss:$16 sps:$4 sm:$0xff]  }
  0xe8   : > { %3582 = vmatprep.mubr.bf16.mxu0 %v441_v48  ;;  %3910 = vmatprep.mubr.bf16.mxu1 %v441_v48  ;;  %v11540_v60 = vld [vmem:[%s13823_s6 + $0x1c0] ss:$16 sps:$4 sm:$0xff]   ;;  %v11541_v61 = vld [vmem:[%s13823_s6 + $0x1c8] ss:$16 sps:$4 sm:$0xff]   ;;  %v11542_v62 = vld [vmem:[%s13823_s6 + $0x1e4] ss:$16 sps:$4 sm:$0xff]  }
  0xe9   : > { %v11544_v63 = vld [vmem:[%s13823_s6 + $0x1ec] ss:$16 sps:$4 sm:$0xff]   ;;  %v11546_v0 = vld [vmem:[%s13823_s6 + $0x1e0] ss:$16 sps:$4 sm:$0xff]   ;;  %v11547_v1 = vld [vmem:[%s13823_s6 + $0x1e8] ss:$16 sps:$4 sm:$0xff]  }
  0xea   : > { %3561 = vmatpush1.bf16.msra.mxu0 %v11486_v22  ;;  %3889 = vmatpush1.bf16.msra.mxu1 %v11487_v23  ;;  %v424_v2 = vld [vmem:[#allocation4] sm:$0xff]  ;;  %v11553_v4 = vld [vmem:[%s13823_s6 + $0x20c] ss:$16 sps:$4 sm:$0xff]   ;;  %v11551_v7 = vld [vmem:[%s13823_s6 + $0x208] ss:$16 sps:$4 sm:$0xff]  }
  0xeb   : > { %3562 = vmatprep.subr.bf16.mxu0 %v11488_v24  ;;  %3890 = vmatprep.subr.bf16.mxu1 %v11490_v25  ;;  %v11550_v3 = vld [vmem:[%s13823_s6 + $0x204] ss:$16 sps:$4 sm:$0xff]   ;;  %v440_v5 = vpack.c.bf16 %v424_v2, %v424_v2  ;;  %v11548_v6 = vld [vmem:[%s13823_s6 + $0x200] ss:$16 sps:$4 sm:$0xff]   ;;  %v11559_v9 = vld [vmem:[%s13823_s6 + $0x22c] ss:$16 sps:$4 sm:$0xff]  }
  0xec   : > { %v11556_v8 = vld [vmem:[%s13823_s6 + $0x224] ss:$16 sps:$4 sm:$0xff]   ;;  %v11554_v10 = vld [vmem:[%s13823_s6 + $0x220] ss:$16 sps:$4 sm:$0xff]   ;;  %v11557_v11 = vld [vmem:[%s13823_s6 + $0x228] ss:$16 sps:$4 sm:$0xff]  }
  0xed   : > { %v11562_v12 = vld [vmem:[%s13823_s6 + $0x244] ss:$16 sps:$4 sm:$0xff]   ;;  %v11565_v13 = vld [vmem:[%s13823_s6 + $0x24c] ss:$16 sps:$4 sm:$0xff]   ;;  %v11560_v14 = vld [vmem:[%s13823_s6 + $0x240] ss:$16 sps:$4 sm:$0xff]  }
  0xee   : > { %3563 = vmatpush1.bf16.msra.mxu0 %v11492_v26  ;;  %3891 = vmatpush1.bf16.msra.mxu1 %v11493_v27  ;;  %v11563_v15 = vld [vmem:[%s13823_s6 + $0x248] ss:$16 sps:$4 sm:$0xff]   ;;  %v11568_v16 = vld [vmem:[%s13823_s6 + $0x264] ss:$16 sps:$4 sm:$0xff]   ;;  %v11571_v17 = vld [vmem:[%s13823_s6 + $0x26c] ss:$16 sps:$4 sm:$0xff]  }
  0xef   : > { %3564 = vmatprep.subr.bf16.mxu0 %v11494_v28  ;;  %3892 = vmatprep.subr.bf16.mxu1 %v11496_v29  ;;  %v11566_v18 = vld [vmem:[%s13823_s6 + $0x260] ss:$16 sps:$4 sm:$0xff]   ;;  %v11569_v19 = vld [vmem:[%s13823_s6 + $0x268] ss:$16 sps:$4 sm:$0xff]   ;;  %v11574_v20 = vld [vmem:[%s13823_s6 + $0x284] ss:$16 sps:$4 sm:$0xff]  }
  0xf0   : > { %v11577_v21 = vld [vmem:[%s13823_s6 + $0x28c] ss:$16 sps:$4 sm:$0xff]   ;;  %v11572_v22 = vld [vmem:[%s13823_s6 + $0x280] ss:$16 sps:$4 sm:$0xff]   ;;  %v11575_v23 = vld [vmem:[%s13823_s6 + $0x288] ss:$16 sps:$4 sm:$0xff]  }
  0xf1   : > { %v11580_v24 = vld [vmem:[%s13823_s6 + $0x2a4] ss:$16 sps:$4 sm:$0xff]   ;;  %v11583_v25 = vld [vmem:[%s13823_s6 + $0x2ac] ss:$16 sps:$4 sm:$0xff]   ;;  %v11578_v26 = vld [vmem:[%s13823_s6 + $0x2a0] ss:$16 sps:$4 sm:$0xff]  }
  0xf2   : > { %3565 = vmatpush1.bf16.msra.mxu0 %v11498_v30  ;;  %3893 = vmatpush1.bf16.msra.mxu1 %v11499_v31  ;;  %v11581_v27 = vld [vmem:[%s13823_s6 + $0x2a8] ss:$16 sps:$4 sm:$0xff]   ;;  %v11586_v28 = vld [vmem:[%s13823_s6 + $0x2c4] ss:$16 sps:$4 sm:$0xff]   ;;  %v11589_v29 = vld [vmem:[%s13823_s6 + $0x2cc] ss:$16 sps:$4 sm:$0xff]  }
  0xf3   : > { %3566 = vmatprep.subr.bf16.mxu0 %v11500_v32  ;;  %3894 = vmatprep.subr.bf16.mxu1 %v11502_v33  ;;  %v427_v30 = vld [vmem:[#allocation4 + $0x18] sm:$0xff]  ;;  %v11584_v31 = vld [vmem:[%s13823_s6 + $0x2c0] ss:$16 sps:$4 sm:$0xff]   ;;  %v11610_v46 = vld [vmem:[%s13823_s6 + $0x344] ss:$16 sps:$4 sm:$0xff]  }
  0xf4   : > { %v443_v32 = vpack.c.bf16 %v427_v30, %v427_v30  ;;  %v11587_v33 = vld [vmem:[%s13823_s6 + $0x2c8] ss:$16 sps:$4 sm:$0xff]   ;;  %v11608_v48 = vld [vmem:[%s13823_s6 + $0x340] ss:$16 sps:$4 sm:$0xff]   ;;  %v11640_v2 = vld [vmem:[%s13823_s6 + $0x3e4] ss:$16 sps:$4 sm:$0xff]  }
  0xf5   : > { %v11676_v30 = vld [vmem:[%s13823_s6 + $0x4a4] ss:$16 sps:$4 sm:$0xff]  }
  0xf6   : > { %3567 = vmatpush1.bf16.msra.mxu0 %v11504_v34  ;;  %3895 = vmatpush1.bf16.msra.mxu1 %v11505_v35  ;;  %v11592_v34 = vld [vmem:[%s13823_s6 + $0x2e4] ss:$16 sps:$4 sm:$0xff]   ;;  %v11595_v35 = vld [vmem:[%s13823_s6 + $0x2ec] ss:$16 sps:$4 sm:$0xff]  }
  0xf7   : > { %3568 = vmatprep.subr.bf16.mxu0 %v11506_v36  ;;  %3896 = vmatprep.subr.bf16.mxu1 %v11508_v37  ;;  %v11590_v36 = vld [vmem:[%s13823_s6 + $0x2e0] ss:$16 sps:$4 sm:$0xff]   ;;  %v11593_v37 = vld [vmem:[%s13823_s6 + $0x2e8] ss:$16 sps:$4 sm:$0xff]  }
  0xfa   : > { %3569 = vmatpush1.bf16.msra.mxu0 %v11510_v38  ;;  %3897 = vmatpush1.bf16.msra.mxu1 %v11511_v39  ;;  %v11598_v38 = vld [vmem:[%s13823_s6 + $0x304] ss:$16 sps:$4 sm:$0xff]   ;;  %v11601_v39 = vld [vmem:[%s13823_s6 + $0x30c] ss:$16 sps:$4 sm:$0xff]  }
  0xfb   : > { %3570 = vmatprep.subr.bf16.mxu0 %v11512_v40  ;;  %3898 = vmatprep.subr.bf16.mxu1 %v11514_v41  ;;  %v11596_v40 = vld [vmem:[%s13823_s6 + $0x300] ss:$16 sps:$4 sm:$0xff]   ;;  %v11599_v41 = vld [vmem:[%s13823_s6 + $0x308] ss:$16 sps:$4 sm:$0xff]  }
  0xfe   : > { %3571 = vmatpush1.bf16.msra.mxu0 %v11516_v42  ;;  %3899 = vmatpush1.bf16.msra.mxu1 %v11517_v43  ;;  %v11604_v42 = vld [vmem:[%s13823_s6 + $0x324] ss:$16 sps:$4 sm:$0xff]   ;;  %v11607_v43 = vld [vmem:[%s13823_s6 + $0x32c] ss:$16 sps:$4 sm:$0xff]  }
  0xff   : > { %3572 = vmatprep.subr.bf16.mxu0 %v11518_v44  ;;  %3900 = vmatprep.subr.bf16.mxu1 %v11520_v45  ;;  %v11602_v44 = vld [vmem:[%s13823_s6 + $0x320] ss:$16 sps:$4 sm:$0xff]   ;;  %v11605_v45 = vld [vmem:[%s13823_s6 + $0x328] ss:$16 sps:$4 sm:$0xff]  }
 0x102   : > { %3573 = vmatpush1.bf16.msra.mxu0 %v11522_v47  ;;  %3901 = vmatpush1.bf16.msra.mxu1 %v11523_v49  ;;  %v11613_v47 = vld [vmem:[%s13823_s6 + $0x34c] ss:$16 sps:$4 sm:$0xff]   ;;  %v11611_v49 = vld [vmem:[%s13823_s6 + $0x348] ss:$16 sps:$4 sm:$0xff]  }
 0x103   : > { %3574 = vmatprep.subr.bf16.mxu0 %v11524_v50  ;;  %3902 = vmatprep.subr.bf16.mxu1 %v11526_v51  ;;  %v11616_v50 = vld [vmem:[%s13823_s6 + $0x364] ss:$16 sps:$4 sm:$0xff]   ;;  %v11619_v51 = vld [vmem:[%s13823_s6 + $0x36c] ss:$16 sps:$4 sm:$0xff]  }
 0x106   : > { %3575 = vmatpush1.bf16.msra.mxu0 %v11528_v52  ;;  %3903 = vmatpush1.bf16.msra.mxu1 %v11529_v53  ;;  %v11614_v52 = vld [vmem:[%s13823_s6 + $0x360] ss:$16 sps:$4 sm:$0xff]   ;;  %v11617_v53 = vld [vmem:[%s13823_s6 + $0x368] ss:$16 sps:$4 sm:$0xff]  }
 0x107   : > { %3576 = vmatprep.subr.bf16.mxu0 %v11530_v54  ;;  %3904 = vmatprep.subr.bf16.mxu1 %v11532_v55  ;;  %v11622_v54 = vld [vmem:[%s13823_s6 + $0x384] ss:$16 sps:$4 sm:$0xff]   ;;  %v11625_v55 = vld [vmem:[%s13823_s6 + $0x38c] ss:$16 sps:$4 sm:$0xff]  }
 0x10a   : > { %3577 = vmatpush1.bf16.msra.mxu0 %v11534_v56  ;;  %3905 = vmatpush1.bf16.msra.mxu1 %v11535_v57  ;;  %v11620_v56 = vld [vmem:[%s13823_s6 + $0x380] ss:$16 sps:$4 sm:$0xff]   ;;  %v11623_v57 = vld [vmem:[%s13823_s6 + $0x388] ss:$16 sps:$4 sm:$0xff]  }
 0x10b   : > { %3578 = vmatprep.subr.bf16.mxu0 %v11536_v58  ;;  %3906 = vmatprep.subr.bf16.mxu1 %v11538_v59  ;;  %v11628_v58 = vld [vmem:[%s13823_s6 + $0x3a4] ss:$16 sps:$4 sm:$0xff]   ;;  %v11631_v59 = vld [vmem:[%s13823_s6 + $0x3ac] ss:$16 sps:$4 sm:$0xff]  }
 0x10e   : > { %3579 = vmatpush1.bf16.msra.mxu0 %v11540_v60  ;;  %3907 = vmatpush1.bf16.msra.mxu1 %v11541_v61  ;;  %v11626_v60 = vld [vmem:[%s13823_s6 + $0x3a0] ss:$16 sps:$4 sm:$0xff]   ;;  %v11629_v61 = vld [vmem:[%s13823_s6 + $0x3a8] ss:$16 sps:$4 sm:$0xff]  }
 0x10f   : > { %3580 = vmatprep.subr.bf16.mxu0 %v11542_v62  ;;  %3908 = vmatprep.subr.bf16.mxu1 %v11544_v63  ;;  %v11634_v62 = vld [vmem:[%s13823_s6 + $0x3c4] ss:$16 sps:$4 sm:$0xff]   ;;  %v11637_v63 = vld [vmem:[%s13823_s6 + $0x3cc] ss:$16 sps:$4 sm:$0xff]  }
 0x112   : > { %3581 = vmatpush1.bf16.msra.mxu0 %v11546_v0  ;;  %3909 = vmatpush1.bf16.msra.mxu1 %v11547_v1  ;;  %v11632_v0 = vld [vmem:[%s13823_s6 + $0x3c0] ss:$16 sps:$4 sm:$0xff]   ;;  %v11635_v1 = vld [vmem:[%s13823_s6 + $0x3c8] ss:$16 sps:$4 sm:$0xff]  }
 0x113   : > { %3591 = vmatprep.subr.bf16.mxu0 %v11550_v3  ;;  %3919 = vmatprep.subr.bf16.mxu1 %v11553_v4  ;;  %v11643_v3 = vld [vmem:[%s13823_s6 + $0x3ec] ss:$16 sps:$4 sm:$0xff]   ;;  %v11638_v4 = vld [vmem:[%s13823_s6 + $0x3e0] ss:$16 sps:$4 sm:$0xff]  }
 0x115   : > { %3583 = vmatmul.mubr.bf16.vlgmr.msra.gmra.mrb[0].mxu0 %v440_v5  ;;  %3911 = vmatmul.mubr.bf16.vlgmr.msra.gmra.mrb[0].mxu1 %v440_v5  ;;  %v11641_v5 = vld [vmem:[%s13823_s6 + $0x3e8] ss:$16 sps:$4 sm:$0xff]  }
 0x116   : > { %3592 = vmatpush1.bf16.msra.mxu0 %v11548_v6  ;;  %3920 = vmatpush1.bf16.msra.mxu1 %v11551_v7  ;;  %v11646_v6 = vld [vmem:[%s13823_s6 + $0x404] ss:$16 sps:$4 sm:$0xff]  }
 0x117   : > { %3593 = vmatprep.subr.bf16.mxu0 %v11556_v8  ;;  %3921 = vmatprep.subr.bf16.mxu1 %v11559_v9  ;;  %v426_v7 = vld [vmem:[#allocation4 + $0x10] sm:$0xff]  ;;  %v11649_v8 = vld [vmem:[%s13823_s6 + $0x40c] ss:$16 sps:$4 sm:$0xff]  }
 0x118   : > { %3623 = vmatprep.mubr.bf16.mxu0 %v443_v32  ;;  %3951 = vmatprep.mubr.bf16.mxu1 %v443_v32  ;;  %v11644_v9 = vld [vmem:[%s13823_s6 + $0x400] ss:$16 sps:$4 sm:$0xff]  }
 0x119   : > { %v11674_v32 = vld [vmem:[%s13823_s6 + $0x4a0] ss:$16 sps:$4 sm:$0xff]  }
 0x11a   : > { %3594 = vmatpush1.bf16.msra.mxu0 %v11554_v10  ;;  %3922 = vmatpush1.bf16.msra.mxu1 %v11557_v11  ;;  %v11647_v10 = vld [vmem:[%s13823_s6 + $0x408] ss:$16 sps:$4 sm:$0xff]   ;;  %v442_v11 = vpack.c.bf16 %v426_v7, %v426_v7  ;;  %v11739_v7 = vld [vmem:[%s13823_s6 + $0x5ec] ss:$16 sps:$4 sm:$0xff]  }
 0x11b   : > { %3595 = vmatprep.subr.bf16.mxu0 %v11562_v12  ;;  %3923 = vmatprep.subr.bf16.mxu1 %v11565_v13  ;;  %v11652_v12 = vld [vmem:[%s13823_s6 + $0x424] ss:$16 sps:$4 sm:$0xff]   ;;  %v11655_v13 = vld [vmem:[%s13823_s6 + $0x42c] ss:$16 sps:$4 sm:$0xff]  }
 0x11e   : > { %3596 = vmatpush1.bf16.msra.mxu0 %v11560_v14  ;;  %3924 = vmatpush1.bf16.msra.mxu1 %v11563_v15  ;;  %v429_v14 = vld [vmem:[#allocation4 + $0x28] sm:$0xff] }
 0x11f   : > { %3597 = vmatprep.subr.bf16.mxu0 %v11568_v16  ;;  %3925 = vmatprep.subr.bf16.mxu1 %v11571_v17  ;;  %v445_v15 = vpack.c.bf16 %v429_v14, %v429_v14  ;;  %v11650_v16 = vld [vmem:[%s13823_s6 + $0x420] ss:$16 sps:$4 sm:$0xff]   ;;  %v11653_v17 = vld [vmem:[%s13823_s6 + $0x428] ss:$16 sps:$4 sm:$0xff]  }
 0x120   : > { %v11743_v14 = vld [vmem:[%s13823_s6 + $0x608] ss:$16 sps:$4 sm:$0xff]  }
 0x122   : > { %3598 = vmatpush1.bf16.msra.mxu0 %v11566_v18  ;;  %3926 = vmatpush1.bf16.msra.mxu1 %v11569_v19  ;;  %v11658_v18 = vld [vmem:[%s13823_s6 + $0x444] ss:$16 sps:$4 sm:$0xff]   ;;  %v11661_v19 = vld [vmem:[%s13823_s6 + $0x44c] ss:$16 sps:$4 sm:$0xff]  }
 0x123   : > { %3599 = vmatprep.subr.bf16.mxu0 %v11574_v20  ;;  %3927 = vmatprep.subr.bf16.mxu1 %v11577_v21  ;;  %v11656_v20 = vld [vmem:[%s13823_s6 + $0x440] ss:$16 sps:$4 sm:$0xff]   ;;  %v11659_v21 = vld [vmem:[%s13823_s6 + $0x448] ss:$16 sps:$4 sm:$0xff]  }
 0x126   : > { %3600 = vmatpush1.bf16.msra.mxu0 %v11572_v22  ;;  %3928 = vmatpush1.bf16.msra.mxu1 %v11575_v23  ;;  %v11664_v22 = vld [vmem:[%s13823_s6 + $0x464] ss:$16 sps:$4 sm:$0xff]   ;;  %v11667_v23 = vld [vmem:[%s13823_s6 + $0x46c] ss:$16 sps:$4 sm:$0xff]  }
 0x127   : > { %3601 = vmatprep.subr.bf16.mxu0 %v11580_v24  ;;  %3929 = vmatprep.subr.bf16.mxu1 %v11583_v25  ;;  %v11662_v24 = vld [vmem:[%s13823_s6 + $0x460] ss:$16 sps:$4 sm:$0xff]   ;;  %v11665_v25 = vld [vmem:[%s13823_s6 + $0x468] ss:$16 sps:$4 sm:$0xff]  }
 0x12a   : > { %3602 = vmatpush1.bf16.msra.mxu0 %v11578_v26  ;;  %3930 = vmatpush1.bf16.msra.mxu1 %v11581_v27  ;;  %v11670_v26 = vld [vmem:[%s13823_s6 + $0x484] ss:$16 sps:$4 sm:$0xff]   ;;  %v11673_v27 = vld [vmem:[%s13823_s6 + $0x48c] ss:$16 sps:$4 sm:$0xff]  }
 0x12b   : > { %3603 = vmatprep.subr.bf16.mxu0 %v11586_v28  ;;  %3931 = vmatprep.subr.bf16.mxu1 %v11589_v29  ;;  %v11668_v28 = vld [vmem:[%s13823_s6 + $0x480] ss:$16 sps:$4 sm:$0xff]   ;;  %v11671_v29 = vld [vmem:[%s13823_s6 + $0x488] ss:$16 sps:$4 sm:$0xff]  }
 0x12e   : > { %3604 = vmatpush1.bf16.msra.mxu0 %v11584_v31  ;;  %3932 = vmatpush1.bf16.msra.mxu1 %v11587_v33  ;;  %v11679_v31 = vld [vmem:[%s13823_s6 + $0x4ac] ss:$16 sps:$4 sm:$0xff]   ;;  %v11677_v33 = vld [vmem:[%s13823_s6 + $0x4a8] ss:$16 sps:$4 sm:$0xff]  }
 0x12f   : > { %3605 = vmatprep.subr.bf16.mxu0 %v11592_v34  ;;  %3933 = vmatprep.subr.bf16.mxu1 %v11595_v35  ;;  %v11682_v34 = vld [vmem:[%s13823_s6 + $0x4c4] ss:$16 sps:$4 sm:$0xff]   ;;  %v11685_v35 = vld [vmem:[%s13823_s6 + $0x4cc] ss:$16 sps:$4 sm:$0xff]  }
 0x132   : > { %3606 = vmatpush1.bf16.msra.mxu0 %v11590_v36  ;;  %3934 = vmatpush1.bf16.msra.mxu1 %v11593_v37  ;;  %v11680_v36 = vld [vmem:[%s13823_s6 + $0x4c0] ss:$16 sps:$4 sm:$0xff]   ;;  %v11683_v37 = vld [vmem:[%s13823_s6 + $0x4c8] ss:$16 sps:$4 sm:$0xff]  }
 0x133   : > { %3607 = vmatprep.subr.bf16.mxu0 %v11598_v38  ;;  %3935 = vmatprep.subr.bf16.mxu1 %v11601_v39  ;;  %v11688_v38 = vld [vmem:[%s13823_s6 + $0x4e4] ss:$16 sps:$4 sm:$0xff]   ;;  %v11691_v39 = vld [vmem:[%s13823_s6 + $0x4ec] ss:$16 sps:$4 sm:$0xff]  }
 0x136   : > { %3608 = vmatpush1.bf16.msra.mxu0 %v11596_v40  ;;  %3936 = vmatpush1.bf16.msra.mxu1 %v11599_v41  ;;  %v11686_v40 = vld [vmem:[%s13823_s6 + $0x4e0] ss:$16 sps:$4 sm:$0xff]   ;;  %v11689_v41 = vld [vmem:[%s13823_s6 + $0x4e8] ss:$16 sps:$4 sm:$0xff]  }
 0x137   : > { %3609 = vmatprep.subr.bf16.mxu0 %v11604_v42  ;;  %3937 = vmatprep.subr.bf16.mxu1 %v11607_v43  ;;  %v11694_v42 = vld [vmem:[%s13823_s6 + $0x504] ss:$16 sps:$4 sm:$0xff]   ;;  %v11697_v43 = vld [vmem:[%s13823_s6 + $0x50c] ss:$16 sps:$4 sm:$0xff]  }
 0x13a   : > { %3610 = vmatpush1.bf16.msra.mxu0 %v11602_v44  ;;  %3938 = vmatpush1.bf16.msra.mxu1 %v11605_v45  ;;  %v11692_v44 = vld [vmem:[%s13823_s6 + $0x500] ss:$16 sps:$4 sm:$0xff]   ;;  %v11695_v45 = vld [vmem:[%s13823_s6 + $0x508] ss:$16 sps:$4 sm:$0xff]  }
 0x13b   : > { %3611 = vmatprep.subr.bf16.mxu0 %v11610_v46  ;;  %3939 = vmatprep.subr.bf16.mxu1 %v11613_v47  ;;  %v11700_v46 = vld [vmem:[%s13823_s6 + $0x524] ss:$16 sps:$4 sm:$0xff]   ;;  %v11703_v47 = vld [vmem:[%s13823_s6 + $0x52c] ss:$16 sps:$4 sm:$0xff]  }
 0x13e   : > { %3612 = vmatpush1.bf16.msra.mxu0 %v11608_v48  ;;  %3940 = vmatpush1.bf16.msra.mxu1 %v11611_v49  ;;  %v11698_v48 = vld [vmem:[%s13823_s6 + $0x520] ss:$16 sps:$4 sm:$0xff]   ;;  %v11701_v49 = vld [vmem:[%s13823_s6 + $0x528] ss:$16 sps:$4 sm:$0xff]  }
 0x13f   : > { %3613 = vmatprep.subr.bf16.mxu0 %v11616_v50  ;;  %3941 = vmatprep.subr.bf16.mxu1 %v11619_v51  ;;  %v11706_v50 = vld [vmem:[%s13823_s6 + $0x544] ss:$16 sps:$4 sm:$0xff]   ;;  %v11709_v51 = vld [vmem:[%s13823_s6 + $0x54c] ss:$16 sps:$4 sm:$0xff]  }
 0x142   : > { %3614 = vmatpush1.bf16.msra.mxu0 %v11614_v52  ;;  %3942 = vmatpush1.bf16.msra.mxu1 %v11617_v53  ;;  %v11704_v52 = vld [vmem:[%s13823_s6 + $0x540] ss:$16 sps:$4 sm:$0xff]   ;;  %v11707_v53 = vld [vmem:[%s13823_s6 + $0x548] ss:$16 sps:$4 sm:$0xff]  }
 0x143   : > { %3615 = vmatprep.subr.bf16.mxu0 %v11622_v54  ;;  %3943 = vmatprep.subr.bf16.mxu1 %v11625_v55  ;;  %v11712_v54 = vld [vmem:[%s13823_s6 + $0x564] ss:$16 sps:$4 sm:$0xff]   ;;  %v11715_v55 = vld [vmem:[%s13823_s6 + $0x56c] ss:$16 sps:$4 sm:$0xff]  }
 0x146   : > { %3616 = vmatpush1.bf16.msra.mxu0 %v11620_v56  ;;  %3944 = vmatpush1.bf16.msra.mxu1 %v11623_v57  ;;  %v11710_v56 = vld [vmem:[%s13823_s6 + $0x560] ss:$16 sps:$4 sm:$0xff]   ;;  %v11713_v57 = vld [vmem:[%s13823_s6 + $0x568] ss:$16 sps:$4 sm:$0xff]  }
 0x147   : > { %3617 = vmatprep.subr.bf16.mxu0 %v11628_v58  ;;  %3945 = vmatprep.subr.bf16.mxu1 %v11631_v59  ;;  %v11718_v58 = vld [vmem:[%s13823_s6 + $0x584] ss:$16 sps:$4 sm:$0xff]   ;;  %v11721_v59 = vld [vmem:[%s13823_s6 + $0x58c] ss:$16 sps:$4 sm:$0xff]  }
 0x14a   : > { %3618 = vmatpush1.bf16.msra.mxu0 %v11626_v60  ;;  %3946 = vmatpush1.bf16.msra.mxu1 %v11629_v61  ;;  %v11716_v60 = vld [vmem:[%s13823_s6 + $0x580] ss:$16 sps:$4 sm:$0xff]   ;;  %v11719_v61 = vld [vmem:[%s13823_s6 + $0x588] ss:$16 sps:$4 sm:$0xff]  }
 0x14b   : > { %3619 = vmatprep.subr.bf16.mxu0 %v11634_v62  ;;  %3947 = vmatprep.subr.bf16.mxu1 %v11637_v63  ;;  %v11724_v62 = vld [vmem:[%s13823_s6 + $0x5a4] ss:$16 sps:$4 sm:$0xff]   ;;  %v11727_v63 = vld [vmem:[%s13823_s6 + $0x5ac] ss:$16 sps:$4 sm:$0xff]  }
 0x14e   : > { %3620 = vmatpush1.bf16.msra.mxu0 %v11632_v0  ;;  %3948 = vmatpush1.bf16.msra.mxu1 %v11635_v1  ;;  %v11722_v0 = vld [vmem:[%s13823_s6 + $0x5a0] ss:$16 sps:$4 sm:$0xff]   ;;  %v11725_v1 = vld [vmem:[%s13823_s6 + $0x5a8] ss:$16 sps:$4 sm:$0xff]  }
 0x14f   : > { %3621 = vmatprep.subr.bf16.mxu0 %v11640_v2  ;;  %3949 = vmatprep.subr.bf16.mxu1 %v11643_v3  ;;  %v11730_v2 = vld [vmem:[%s13823_s6 + $0x5c4] ss:$16 sps:$4 sm:$0xff]   ;;  %v11733_v3 = vld [vmem:[%s13823_s6 + $0x5cc] ss:$16 sps:$4 sm:$0xff]  }
 0x152   : > { %3622 = vmatpush1.bf16.msra.mxu0 %v11638_v4  ;;  %3950 = vmatpush1.bf16.msra.mxu1 %v11641_v5  ;;  %v11728_v4 = vld [vmem:[%s13823_s6 + $0x5c0] ss:$16 sps:$4 sm:$0xff]   ;;  %v11731_v5 = vld [vmem:[%s13823_s6 + $0x5c8] ss:$16 sps:$4 sm:$0xff]  }
 0x153   : > { %3632 = vmatprep.subr.bf16.mxu0 %v11646_v6  ;;  %3960 = vmatprep.subr.bf16.mxu1 %v11649_v8  ;;  %v11736_v6 = vld [vmem:[%s13823_s6 + $0x5e4] ss:$16 sps:$4 sm:$0xff]   ;;  %v11734_v8 = vld [vmem:[%s13823_s6 + $0x5e0] ss:$16 sps:$4 sm:$0xff]  }
 0x155   : > { %3624 = vmatmul.mubr.bf16.vlgmr.msra.gmra.mrb[0].mxu0 %v442_v11  ;;  %3952 = vmatmul.mubr.bf16.vlgmr.msra.gmra.mrb[0].mxu1 %v442_v11  ;;  %v428_v11 = vld [vmem:[#allocation4 + $0x20] sm:$0xff] }
 0x156   : > { %3633 = vmatpush1.bf16.msra.mxu0 %v11644_v9  ;;  %3961 = vmatpush1.bf16.msra.mxu1 %v11647_v10  ;;  %v11737_v9 = vld [vmem:[%s13823_s6 + $0x5e8] ss:$16 sps:$4 sm:$0xff]   ;;  %v11742_v10 = vld [vmem:[%s13823_s6 + $0x604] ss:$16 sps:$4 sm:$0xff]  }
 0x157   : > { %3634 = vmatprep.subr.bf16.mxu0 %v11652_v12  ;;  %3962 = vmatprep.subr.bf16.mxu1 %v11655_v13  ;;  %v11745_v12 = vld [vmem:[%s13823_s6 + $0x60c] ss:$16 sps:$4 sm:$0xff]   ;;  %v11740_v13 = vld [vmem:[%s13823_s6 + $0x600] ss:$16 sps:$4 sm:$0xff]  }
 0x158   : > { %3664 = vmatprep.mubr.bf16.mxu0 %v445_v15  ;;  %3992 = vmatprep.mubr.bf16.mxu1 %v445_v15  ;;  %v444_v15 = vpack.c.bf16 %v428_v11, %v428_v11  ;;  %v11835_v11 = vld [vmem:[%s13823_s6 + $0x7ec] ss:$16 sps:$4 sm:$0xff]  }
 0x15a   : > { %3635 = vmatpush1.bf16.msra.mxu0 %v11650_v16  ;;  %3963 = vmatpush1.bf16.msra.mxu1 %v11653_v17  ;;  %v431_v16 = vld [vmem:[#allocation4 + $0x38] sm:$0xff]  ;;  %v11748_v17 = vld [vmem:[%s13823_s6 + $0x624] ss:$16 sps:$4 sm:$0xff]  }
 0x15b   : > { %3636 = vmatprep.subr.bf16.mxu0 %v11658_v18  ;;  %3964 = vmatprep.subr.bf16.mxu1 %v11661_v19  ;;  %v11751_v18 = vld [vmem:[%s13823_s6 + $0x62c] ss:$16 sps:$4 sm:$0xff]   ;;  %v447_v19 = vpack.c.bf16 %v431_v16, %v431_v16 }
 0x15c   : > { %v11841_v16 = vld [vmem:[%s13823_s6 + $0x80c] ss:$16 sps:$4 sm:$0xff]  }
 0x15e   : > { %3637 = vmatpush1.bf16.msra.mxu0 %v11656_v20  ;;  %3965 = vmatpush1.bf16.msra.mxu1 %v11659_v21  ;;  %v11746_v20 = vld [vmem:[%s13823_s6 + $0x620] ss:$16 sps:$4 sm:$0xff]   ;;  %v11749_v21 = vld [vmem:[%s13823_s6 + $0x628] ss:$16 sps:$4 sm:$0xff]  }
 0x15f   : > { %3638 = vmatprep.subr.bf16.mxu0 %v11664_v22  ;;  %3966 = vmatprep.subr.bf16.mxu1 %v11667_v23  ;;  %v11754_v22 = vld [vmem:[%s13823_s6 + $0x644] ss:$16 sps:$4 sm:$0xff]   ;;  %v11757_v23 = vld [vmem:[%s13823_s6 + $0x64c] ss:$16 sps:$4 sm:$0xff]  }
 0x162   : > { %3639 = vmatpush1.bf16.msra.mxu0 %v11662_v24  ;;  %3967 = vmatpush1.bf16.msra.mxu1 %v11665_v25  ;;  %v11752_v24 = vld [vmem:[%s13823_s6 + $0x640] ss:$16 sps:$4 sm:$0xff]   ;;  %v11755_v25 = vld [vmem:[%s13823_s6 + $0x648] ss:$16 sps:$4 sm:$0xff]  }
 0x163   : > { %3640 = vmatprep.subr.bf16.mxu0 %v11670_v26  ;;  %3968 = vmatprep.subr.bf16.mxu1 %v11673_v27  ;;  %v11760_v26 = vld [vmem:[%s13823_s6 + $0x664] ss:$16 sps:$4 sm:$0xff]   ;;  %v11763_v27 = vld [vmem:[%s13823_s6 + $0x66c] ss:$16 sps:$4 sm:$0xff]  }
 0x166   : > { %3641 = vmatpush1.bf16.msra.mxu0 %v11668_v28  ;;  %3969 = vmatpush1.bf16.msra.mxu1 %v11671_v29  ;;  %v11758_v28 = vld [vmem:[%s13823_s6 + $0x660] ss:$16 sps:$4 sm:$0xff]   ;;  %v11761_v29 = vld [vmem:[%s13823_s6 + $0x668] ss:$16 sps:$4 sm:$0xff]  }
 0x167   : > { %3642 = vmatprep.subr.bf16.mxu0 %v11676_v30  ;;  %3970 = vmatprep.subr.bf16.mxu1 %v11679_v31  ;;  %v11766_v30 = vld [vmem:[%s13823_s6 + $0x684] ss:$16 sps:$4 sm:$0xff]   ;;  %v11769_v31 = vld [vmem:[%s13823_s6 + $0x68c] ss:$16 sps:$4 sm:$0xff]  }
 0x16a   : > { %3643 = vmatpush1.bf16.msra.mxu0 %v11674_v32  ;;  %3971 = vmatpush1.bf16.msra.mxu1 %v11677_v33  ;;  %v11764_v32 = vld [vmem:[%s13823_s6 + $0x680] ss:$16 sps:$4 sm:$0xff]   ;;  %v11767_v33 = vld [vmem:[%s13823_s6 + $0x688] ss:$16 sps:$4 sm:$0xff]  }
 0x16b   : > { %3644 = vmatprep.subr.bf16.mxu0 %v11682_v34  ;;  %3972 = vmatprep.subr.bf16.mxu1 %v11685_v35  ;;  %v11772_v34 = vld [vmem:[%s13823_s6 + $0x6a4] ss:$16 sps:$4 sm:$0xff]   ;;  %v11775_v35 = vld [vmem:[%s13823_s6 + $0x6ac] ss:$16 sps:$4 sm:$0xff]  }
 0x16e   : > { %3645 = vmatpush1.bf16.msra.mxu0 %v11680_v36  ;;  %3973 = vmatpush1.bf16.msra.mxu1 %v11683_v37  ;;  %v11770_v36 = vld [vmem:[%s13823_s6 + $0x6a0] ss:$16 sps:$4 sm:$0xff]   ;;  %v11773_v37 = vld [vmem:[%s13823_s6 + $0x6a8] ss:$16 sps:$4 sm:$0xff]  }
 0x16f   : > { %3646 = vmatprep.subr.bf16.mxu0 %v11688_v38  ;;  %3974 = vmatprep.subr.bf16.mxu1 %v11691_v39  ;;  %v11778_v38 = vld [vmem:[%s13823_s6 + $0x6c4] ss:$16 sps:$4 sm:$0xff]   ;;  %v11781_v39 = vld [vmem:[%s13823_s6 + $0x6cc] ss:$16 sps:$4 sm:$0xff]  }
 0x172   : > { %3647 = vmatpush1.bf16.msra.mxu0 %v11686_v40  ;;  %3975 = vmatpush1.bf16.msra.mxu1 %v11689_v41  ;;  %v11776_v40 = vld [vmem:[%s13823_s6 + $0x6c0] ss:$16 sps:$4 sm:$0xff]   ;;  %v11779_v41 = vld [vmem:[%s13823_s6 + $0x6c8] ss:$16 sps:$4 sm:$0xff]  }
 0x173   : > { %3648 = vmatprep.subr.bf16.mxu0 %v11694_v42  ;;  %3976 = vmatprep.subr.bf16.mxu1 %v11697_v43  ;;  %v11784_v42 = vld [vmem:[%s13823_s6 + $0x6e4] ss:$16 sps:$4 sm:$0xff]   ;;  %v11787_v43 = vld [vmem:[%s13823_s6 + $0x6ec] ss:$16 sps:$4 sm:$0xff]  }
 0x176   : > { %3649 = vmatpush1.bf16.msra.mxu0 %v11692_v44  ;;  %3977 = vmatpush1.bf16.msra.mxu1 %v11695_v45  ;;  %v11782_v44 = vld [vmem:[%s13823_s6 + $0x6e0] ss:$16 sps:$4 sm:$0xff]   ;;  %v11785_v45 = vld [vmem:[%s13823_s6 + $0x6e8] ss:$16 sps:$4 sm:$0xff]  }
 0x177   : > { %3650 = vmatprep.subr.bf16.mxu0 %v11700_v46  ;;  %3978 = vmatprep.subr.bf16.mxu1 %v11703_v47  ;;  %v11790_v46 = vld [vmem:[%s13823_s6 + $0x704] ss:$16 sps:$4 sm:$0xff]   ;;  %v11793_v47 = vld [vmem:[%s13823_s6 + $0x70c] ss:$16 sps:$4 sm:$0xff]  }
 0x17a   : > { %3651 = vmatpush1.bf16.msra.mxu0 %v11698_v48  ;;  %3979 = vmatpush1.bf16.msra.mxu1 %v11701_v49  ;;  %v11788_v48 = vld [vmem:[%s13823_s6 + $0x700] ss:$16 sps:$4 sm:$0xff]   ;;  %v11791_v49 = vld [vmem:[%s13823_s6 + $0x708] ss:$16 sps:$4 sm:$0xff]  }
 0x17b   : > { %3652 = vmatprep.subr.bf16.mxu0 %v11706_v50  ;;  %3980 = vmatprep.subr.bf16.mxu1 %v11709_v51  ;;  %v11796_v50 = vld [vmem:[%s13823_s6 + $0x724] ss:$16 sps:$4 sm:$0xff]   ;;  %v11799_v51 = vld [vmem:[%s13823_s6 + $0x72c] ss:$16 sps:$4 sm:$0xff]  }
 0x17e   : > { %3653 = vmatpush1.bf16.msra.mxu0 %v11704_v52  ;;  %3981 = vmatpush1.bf16.msra.mxu1 %v11707_v53  ;;  %v11794_v52 = vld [vmem:[%s13823_s6 + $0x720] ss:$16 sps:$4 sm:$0xff]   ;;  %v11797_v53 = vld [vmem:[%s13823_s6 + $0x728] ss:$16 sps:$4 sm:$0xff]  }
 0x17f   : > { %3654 = vmatprep.subr.bf16.mxu0 %v11712_v54  ;;  %3982 = vmatprep.subr.bf16.mxu1 %v11715_v55  ;;  %v11802_v54 = vld [vmem:[%s13823_s6 + $0x744] ss:$16 sps:$4 sm:$0xff]   ;;  %v11805_v55 = vld [vmem:[%s13823_s6 + $0x74c] ss:$16 sps:$4 sm:$0xff]  }
 0x182   : > { %3655 = vmatpush1.bf16.msra.mxu0 %v11710_v56  ;;  %3983 = vmatpush1.bf16.msra.mxu1 %v11713_v57  ;;  %v11800_v56 = vld [vmem:[%s13823_s6 + $0x740] ss:$16 sps:$4 sm:$0xff]   ;;  %v11803_v57 = vld [vmem:[%s13823_s6 + $0x748] ss:$16 sps:$4 sm:$0xff]  }
 0x183   : > { %3656 = vmatprep.subr.bf16.mxu0 %v11718_v58  ;;  %3984 = vmatprep.subr.bf16.mxu1 %v11721_v59  ;;  %v11808_v58 = vld [vmem:[%s13823_s6 + $0x764] ss:$16 sps:$4 sm:$0xff]   ;;  %v11811_v59 = vld [vmem:[%s13823_s6 + $0x76c] ss:$16 sps:$4 sm:$0xff]  }
 0x186   : > { %3657 = vmatpush1.bf16.msra.mxu0 %v11716_v60  ;;  %3985 = vmatpush1.bf16.msra.mxu1 %v11719_v61  ;;  %v11806_v60 = vld [vmem:[%s13823_s6 + $0x760] ss:$16 sps:$4 sm:$0xff]   ;;  %v11809_v61 = vld [vmem:[%s13823_s6 + $0x768] ss:$16 sps:$4 sm:$0xff]  }
 0x187   : > { %3658 = vmatprep.subr.bf16.mxu0 %v11724_v62  ;;  %3986 = vmatprep.subr.bf16.mxu1 %v11727_v63  ;;  %v11814_v62 = vld [vmem:[%s13823_s6 + $0x784] ss:$16 sps:$4 sm:$0xff]   ;;  %v11817_v63 = vld [vmem:[%s13823_s6 + $0x78c] ss:$16 sps:$4 sm:$0xff]  }
 0x18a   : > { %3659 = vmatpush1.bf16.msra.mxu0 %v11722_v0  ;;  %3987 = vmatpush1.bf16.msra.mxu1 %v11725_v1  ;;  %v11812_v0 = vld [vmem:[%s13823_s6 + $0x780] ss:$16 sps:$4 sm:$0xff]   ;;  %v11815_v1 = vld [vmem:[%s13823_s6 + $0x788] ss:$16 sps:$4 sm:$0xff]  }
 0x18b   : > { %3660 = vmatprep.subr.bf16.mxu0 %v11730_v2  ;;  %3988 = vmatprep.subr.bf16.mxu1 %v11733_v3  ;;  %v11820_v2 = vld [vmem:[%s13823_s6 + $0x7a4] ss:$16 sps:$4 sm:$0xff]   ;;  %v11823_v3 = vld [vmem:[%s13823_s6 + $0x7ac] ss:$16 sps:$4 sm:$0xff]  }
 0x18e   : > { %3661 = vmatpush1.bf16.msra.mxu0 %v11728_v4  ;;  %3989 = vmatpush1.bf16.msra.mxu1 %v11731_v5  ;;  %v11818_v4 = vld [vmem:[%s13823_s6 + $0x7a0] ss:$16 sps:$4 sm:$0xff]   ;;  %v11821_v5 = vld [vmem:[%s13823_s6 + $0x7a8] ss:$16 sps:$4 sm:$0xff]  }
 0x18f   : > { %3662 = vmatprep.subr.bf16.mxu0 %v11736_v6  ;;  %3990 = vmatprep.subr.bf16.mxu1 %v11739_v7  ;;  %v11826_v6 = vld [vmem:[%s13823_s6 + $0x7c4] ss:$16 sps:$4 sm:$0xff]   ;;  %v11829_v7 = vld [vmem:[%s13823_s6 + $0x7cc] ss:$16 sps:$4 sm:$0xff]  }
 0x192   : > { %3663 = vmatpush1.bf16.msra.mxu0 %v11734_v8  ;;  %3991 = vmatpush1.bf16.msra.mxu1 %v11737_v9  ;;  %v11824_v8 = vld [vmem:[%s13823_s6 + $0x7c0] ss:$16 sps:$4 sm:$0xff]   ;;  %v11827_v9 = vld [vmem:[%s13823_s6 + $0x7c8] ss:$16 sps:$4 sm:$0xff]  }
 0x193   : > { %3673 = vmatprep.subr.bf16.mxu0 %v11742_v10  ;;  %4001 = vmatprep.subr.bf16.mxu1 %v11745_v12  ;;  %v11832_v10 = vld [vmem:[%s13823_s6 + $0x7e4] ss:$16 sps:$4 sm:$0xff]   ;;  %v11830_v12 = vld [vmem:[%s13823_s6 + $0x7e0] ss:$16 sps:$4 sm:$0xff]  }
 0x195   : > { %3665 = vmatmul.mubr.bf16.vlgmr.msra.gmra.mrb[0].mxu0 %v444_v15  ;;  %3993 = vmatmul.mubr.bf16.vlgmr.msra.gmra.mrb[0].mxu1 %v444_v15  ;;  %v11838_v15 = vld [vmem:[%s13823_s6 + $0x804] ss:$16 sps:$4 sm:$0xff]  }
 0x196   : > { %3674 = vmatpush1.bf16.msra.mxu0 %v11740_v13  ;;  %4002 = vmatpush1.bf16.msra.mxu1 %v11743_v14  ;;  %v11833_v13 = vld [vmem:[%s13823_s6 + $0x7e8] ss:$16 sps:$4 sm:$0xff]   ;;  %v430_v14 = vld [vmem:[#allocation4 + $0x30] sm:$0xff] }
 0x197   : > { %3675 = vmatprep.subr.bf16.mxu0 %v11748_v17  ;;  %4003 = vmatprep.subr.bf16.mxu1 %v11751_v18  ;;  %v446_v17 = vpack.c.bf16 %v430_v14, %v430_v14  ;;  %v433_v18 = vld [vmem:[#allocation4 + $0x48] sm:$0xff]  ;;  %v11928_v14 = vld [vmem:[%s13823_s6 + $0x9e4] ss:$16 sps:$4 sm:$0xff]  }
 0x198   : > { %3705 = vmatprep.mubr.bf16.mxu0 %v447_v19  ;;  %4033 = vmatprep.mubr.bf16.mxu1 %v447_v19  ;;  %v11836_v19 = vld [vmem:[%s13823_s6 + $0x800] ss:$16 sps:$4 sm:$0xff]  }
 0x19a   : > { %3676 = vmatpush1.bf16.msra.mxu0 %v11746_v20  ;;  %4004 = vmatpush1.bf16.msra.mxu1 %v11749_v21  ;;  %v11839_v20 = vld [vmem:[%s13823_s6 + $0x808] ss:$16 sps:$4 sm:$0xff]   ;;  %v11844_v21 = vld [vmem:[%s13823_s6 + $0x824] ss:$16 sps:$4 sm:$0xff]  }
 0x19b   : > { %3677 = vmatprep.subr.bf16.mxu0 %v11754_v22  ;;  %4005 = vmatprep.subr.bf16.mxu1 %v11757_v23  ;;  %v11847_v22 = vld [vmem:[%s13823_s6 + $0x82c] ss:$16 sps:$4 sm:$0xff]   ;;  %v449_v23 = vpack.c.bf16 %v433_v18, %v433_v18  ;;  %v11934_v18 = vld [vmem:[%s13823_s6 + $0xa04] ss:$16 sps:$4 sm:$0xff]  }
 0x19e   : > { %3678 = vmatpush1.bf16.msra.mxu0 %v11752_v24  ;;  %4006 = vmatpush1.bf16.msra.mxu1 %v11755_v25  ;;  %v11842_v24 = vld [vmem:[%s13823_s6 + $0x820] ss:$16 sps:$4 sm:$0xff]   ;;  %v11845_v25 = vld [vmem:[%s13823_s6 + $0x828] ss:$16 sps:$4 sm:$0xff]  }
 0x19f   : > { %3679 = vmatprep.subr.bf16.mxu0 %v11760_v26  ;;  %4007 = vmatprep.subr.bf16.mxu1 %v11763_v27  ;;  %v11850_v26 = vld [vmem:[%s13823_s6 + $0x844] ss:$16 sps:$4 sm:$0xff]   ;;  %v11853_v27 = vld [vmem:[%s13823_s6 + $0x84c] ss:$16 sps:$4 sm:$0xff]  }
 0x1a2   : > { %3680 = vmatpush1.bf16.msra.mxu0 %v11758_v28  ;;  %4008 = vmatpush1.bf16.msra.mxu1 %v11761_v29  ;;  %v11848_v28 = vld [vmem:[%s13823_s6 + $0x840] ss:$16 sps:$4 sm:$0xff]   ;;  %v11851_v29 = vld [vmem:[%s13823_s6 + $0x848] ss:$16 sps:$4 sm:$0xff]  }
 0x1a3   : > { %3681 = vmatprep.subr.bf16.mxu0 %v11766_v30  ;;  %4009 = vmatprep.subr.bf16.mxu1 %v11769_v31  ;;  %v11856_v30 = vld [vmem:[%s13823_s6 + $0x864] ss:$16 sps:$4 sm:$0xff]   ;;  %v11859_v31 = vld [vmem:[%s13823_s6 + $0x86c] ss:$16 sps:$4 sm:$0xff]  }
 0x1a6   : > { %3682 = vmatpush1.bf16.msra.mxu0 %v11764_v32  ;;  %4010 = vmatpush1.bf16.msra.mxu1 %v11767_v33  ;;  %v11854_v32 = vld [vmem:[%s13823_s6 + $0x860] ss:$16 sps:$4 sm:$0xff]   ;;  %v11857_v33 = vld [vmem:[%s13823_s6 + $0x868] ss:$16 sps:$4 sm:$0xff]  }
 0x1a7   : > { %3683 = vmatprep.subr.bf16.mxu0 %v11772_v34  ;;  %4011 = vmatprep.subr.bf16.mxu1 %v11775_v35  ;;  %v11862_v34 = vld [vmem:[%s13823_s6 + $0x884] ss:$16 sps:$4 sm:$0xff]   ;;  %v11865_v35 = vld [vmem:[%s13823_s6 + $0x88c] ss:$16 sps:$4 sm:$0xff]  }
 0x1aa   : > { %3684 = vmatpush1.bf16.msra.mxu0 %v11770_v36  ;;  %4012 = vmatpush1.bf16.msra.mxu1 %v11773_v37  ;;  %v11860_v36 = vld [vmem:[%s13823_s6 + $0x880] ss:$16 sps:$4 sm:$0xff]   ;;  %v11863_v37 = vld [vmem:[%s13823_s6 + $0x888] ss:$16 sps:$4 sm:$0xff]  }
 0x1ab   : > { %3685 = vmatprep.subr.bf16.mxu0 %v11778_v38  ;;  %4013 = vmatprep.subr.bf16.mxu1 %v11781_v39  ;;  %v11868_v38 = vld [vmem:[%s13823_s6 + $0x8a4] ss:$16 sps:$4 sm:$0xff]   ;;  %v11871_v39 = vld [vmem:[%s13823_s6 + $0x8ac] ss:$16 sps:$4 sm:$0xff]  }
 0x1ae   : > { %3686 = vmatpush1.bf16.msra.mxu0 %v11776_v40  ;;  %4014 = vmatpush1.bf16.msra.mxu1 %v11779_v41  ;;  %v11866_v40 = vld [vmem:[%s13823_s6 + $0x8a0] ss:$16 sps:$4 sm:$0xff]   ;;  %v11869_v41 = vld [vmem:[%s13823_s6 + $0x8a8] ss:$16 sps:$4 sm:$0xff]  }
 0x1af   : > { %3687 = vmatprep.subr.bf16.mxu0 %v11784_v42  ;;  %4015 = vmatprep.subr.bf16.mxu1 %v11787_v43  ;;  %v11874_v42 = vld [vmem:[%s13823_s6 + $0x8c4] ss:$16 sps:$4 sm:$0xff]   ;;  %v11877_v43 = vld [vmem:[%s13823_s6 + $0x8cc] ss:$16 sps:$4 sm:$0xff]  }
 0x1b2   : > { %3688 = vmatpush1.bf16.msra.mxu0 %v11782_v44  ;;  %4016 = vmatpush1.bf16.msra.mxu1 %v11785_v45  ;;  %v11872_v44 = vld [vmem:[%s13823_s6 + $0x8c0] ss:$16 sps:$4 sm:$0xff]   ;;  %v11875_v45 = vld [vmem:[%s13823_s6 + $0x8c8] ss:$16 sps:$4 sm:$0xff]  }
 0x1b3   : > { %3689 = vmatprep.subr.bf16.mxu0 %v11790_v46  ;;  %4017 = vmatprep.subr.bf16.mxu1 %v11793_v47  ;;  %v11880_v46 = vld [vmem:[%s13823_s6 + $0x8e4] ss:$16 sps:$4 sm:$0xff]   ;;  %v11883_v47 = vld [vmem:[%s13823_s6 + $0x8ec] ss:$16 sps:$4 sm:$0xff]  }
 0x1b6   : > { %3690 = vmatpush1.bf16.msra.mxu0 %v11788_v48  ;;  %4018 = vmatpush1.bf16.msra.mxu1 %v11791_v49  ;;  %v11878_v48 = vld [vmem:[%s13823_s6 + $0x8e0] ss:$16 sps:$4 sm:$0xff]   ;;  %v11881_v49 = vld [vmem:[%s13823_s6 + $0x8e8] ss:$16 sps:$4 sm:$0xff]  }
 0x1b7   : > { %3691 = vmatprep.subr.bf16.mxu0 %v11796_v50  ;;  %4019 = vmatprep.subr.bf16.mxu1 %v11799_v51  ;;  %v11886_v50 = vld [vmem:[%s13823_s6 + $0x904] ss:$16 sps:$4 sm:$0xff]   ;;  %v11889_v51 = vld [vmem:[%s13823_s6 + $0x90c] ss:$16 sps:$4 sm:$0xff]  }
 0x1ba   : > { %3692 = vmatpush1.bf16.msra.mxu0 %v11794_v52  ;;  %4020 = vmatpush1.bf16.msra.mxu1 %v11797_v53  ;;  %v11884_v52 = vld [vmem:[%s13823_s6 + $0x900] ss:$16 sps:$4 sm:$0xff]   ;;  %v11887_v53 = vld [vmem:[%s13823_s6 + $0x908] ss:$16 sps:$4 sm:$0xff]  }
 0x1bb   : > { %3693 = vmatprep.subr.bf16.mxu0 %v11802_v54  ;;  %4021 = vmatprep.subr.bf16.mxu1 %v11805_v55  ;;  %v11892_v54 = vld [vmem:[%s13823_s6 + $0x924] ss:$16 sps:$4 sm:$0xff]   ;;  %v11895_v55 = vld [vmem:[%s13823_s6 + $0x92c] ss:$16 sps:$4 sm:$0xff]  }
 0x1be   : > { %3694 = vmatpush1.bf16.msra.mxu0 %v11800_v56  ;;  %4022 = vmatpush1.bf16.msra.mxu1 %v11803_v57  ;;  %v11890_v56 = vld [vmem:[%s13823_s6 + $0x920] ss:$16 sps:$4 sm:$0xff]   ;;  %v11893_v57 = vld [vmem:[%s13823_s6 + $0x928] ss:$16 sps:$4 sm:$0xff]  }
 0x1bf   : > { %3695 = vmatprep.subr.bf16.mxu0 %v11808_v58  ;;  %4023 = vmatprep.subr.bf16.mxu1 %v11811_v59  ;;  %v11898_v58 = vld [vmem:[%s13823_s6 + $0x944] ss:$16 sps:$4 sm:$0xff]   ;;  %v11901_v59 = vld [vmem:[%s13823_s6 + $0x94c] ss:$16 sps:$4 sm:$0xff]  }
 0x1c2   : > { %3696 = vmatpush1.bf16.msra.mxu0 %v11806_v60  ;;  %4024 = vmatpush1.bf16.msra.mxu1 %v11809_v61  ;;  %v11896_v60 = vld [vmem:[%s13823_s6 + $0x940] ss:$16 sps:$4 sm:$0xff]   ;;  %v11899_v61 = vld [vmem:[%s13823_s6 + $0x948] ss:$16 sps:$4 sm:$0xff]  }
 0x1c3   : > { %3697 = vmatprep.subr.bf16.mxu0 %v11814_v62  ;;  %4025 = vmatprep.subr.bf16.mxu1 %v11817_v63  ;;  %v11904_v62 = vld [vmem:[%s13823_s6 + $0x964] ss:$16 sps:$4 sm:$0xff]   ;;  %v11907_v63 = vld [vmem:[%s13823_s6 + $0x96c] ss:$16 sps:$4 sm:$0xff]  }
 0x1c6   : > { %3698 = vmatpush1.bf16.msra.mxu0 %v11812_v0  ;;  %4026 = vmatpush1.bf16.msra.mxu1 %v11815_v1  ;;  %v11902_v0 = vld [vmem:[%s13823_s6 + $0x960] ss:$16 sps:$4 sm:$0xff]   ;;  %v11905_v1 = vld [vmem:[%s13823_s6 + $0x968] ss:$16 sps:$4 sm:$0xff]  }
 0x1c7   : > { %3699 = vmatprep.subr.bf16.mxu0 %v11820_v2  ;;  %4027 = vmatprep.subr.bf16.mxu1 %v11823_v3  ;;  %v11910_v2 = vld [vmem:[%s13823_s6 + $0x984] ss:$16 sps:$4 sm:$0xff]   ;;  %v11913_v3 = vld [vmem:[%s13823_s6 + $0x98c] ss:$16 sps:$4 sm:$0xff]  }
 0x1ca   : > { %3700 = vmatpush1.bf16.msra.mxu0 %v11818_v4  ;;  %4028 = vmatpush1.bf16.msra.mxu1 %v11821_v5  ;;  %v11908_v4 = vld [vmem:[%s13823_s6 + $0x980] ss:$16 sps:$4 sm:$0xff]   ;;  %v11911_v5 = vld [vmem:[%s13823_s6 + $0x988] ss:$16 sps:$4 sm:$0xff]  }
 0x1cb   : > { %3701 = vmatprep.subr.bf16.mxu0 %v11826_v6  ;;  %4029 = vmatprep.subr.bf16.mxu1 %v11829_v7  ;;  %v11916_v6 = vld [vmem:[%s13823_s6 + $0x9a4] ss:$16 sps:$4 sm:$0xff]   ;;  %v11919_v7 = vld [vmem:[%s13823_s6 + $0x9ac] ss:$16 sps:$4 sm:$0xff]  }
 0x1ce   : > { %3702 = vmatpush1.bf16.msra.mxu0 %v11824_v8  ;;  %4030 = vmatpush1.bf16.msra.mxu1 %v11827_v9  ;;  %v11914_v8 = vld [vmem:[%s13823_s6 + $0x9a0] ss:$16 sps:$4 sm:$0xff]   ;;  %v11917_v9 = vld [vmem:[%s13823_s6 + $0x9a8] ss:$16 sps:$4 sm:$0xff]  }
 0x1cf   : > { %3703 = vmatprep.subr.bf16.mxu0 %v11832_v10  ;;  %4031 = vmatprep.subr.bf16.mxu1 %v11835_v11  ;;  %v11922_v10 = vld [vmem:[%s13823_s6 + $0x9c4] ss:$16 sps:$4 sm:$0xff]   ;;  %v11925_v11 = vld [vmem:[%s13823_s6 + $0x9cc] ss:$16 sps:$4 sm:$0xff]  }
 0x1d2   : > { %3704 = vmatpush1.bf16.msra.mxu0 %v11830_v12  ;;  %4032 = vmatpush1.bf16.msra.mxu1 %v11833_v13  ;;  %v11920_v12 = vld [vmem:[%s13823_s6 + $0x9c0] ss:$16 sps:$4 sm:$0xff]   ;;  %v11923_v13 = vld [vmem:[%s13823_s6 + $0x9c8] ss:$16 sps:$4 sm:$0xff]  }
 0x1d3   : > { %3714 = vmatprep.subr.bf16.mxu0 %v11838_v15  ;;  %4042 = vmatprep.subr.bf16.mxu1 %v11841_v16  ;;  %v11931_v15 = vld [vmem:[%s13823_s6 + $0x9ec] ss:$16 sps:$4 sm:$0xff]   ;;  %v11926_v16 = vld [vmem:[%s13823_s6 + $0x9e0] ss:$16 sps:$4 sm:$0xff]  }
 0x1d5   : > { %3706 = vmatmul.mubr.bf16.vlgmr.msra.gmra.mrb[0].mxu0 %v446_v17  ;;  %4034 = vmatmul.mubr.bf16.vlgmr.msra.gmra.mrb[0].mxu1 %v446_v17  ;;  %v11929_v17 = vld [vmem:[%s13823_s6 + $0x9e8] ss:$16 sps:$4 sm:$0xff]  }
 0x1d6   : > { %3715 = vmatpush1.bf16.msra.mxu0 %v11836_v19  ;;  %4043 = vmatpush1.bf16.msra.mxu1 %v11839_v20  ;;  %v432_v19 = vld [vmem:[#allocation4 + $0x40] sm:$0xff]  ;;  %v11937_v20 = vld [vmem:[%s13823_s6 + $0xa0c] ss:$16 sps:$4 sm:$0xff]  }
 0x1d7   : > { %3716 = vmatprep.subr.bf16.mxu0 %v11844_v21  ;;  %4044 = vmatprep.subr.bf16.mxu1 %v11847_v22  ;;  %v435_v21 = vld [vmem:[#allocation4 + $0x58] sm:$0xff]  ;;  %v448_v22 = vpack.c.bf16 %v432_v19, %v432_v19 }
 0x1d8   : > { %3746 = vmatprep.mubr.bf16.mxu0 %v449_v23  ;;  %4074 = vmatprep.mubr.bf16.mxu1 %v449_v23  ;;  %v11932_v23 = vld [vmem:[%s13823_s6 + $0xa00] ss:$16 sps:$4 sm:$0xff]   ;;  %v12027_v19 = vld [vmem:[%s13823_s6 + $0xbec] ss:$16 sps:$4 sm:$0xff]  }
 0x1da   : > { %3717 = vmatpush1.bf16.msra.mxu0 %v11842_v24  ;;  %4045 = vmatpush1.bf16.msra.mxu1 %v11845_v25  ;;  %v11935_v24 = vld [vmem:[%s13823_s6 + $0xa08] ss:$16 sps:$4 sm:$0xff]   ;;  %v11940_v25 = vld [vmem:[%s13823_s6 + $0xa24] ss:$16 sps:$4 sm:$0xff]  }
 0x1db   : > { %3718 = vmatprep.subr.bf16.mxu0 %v11850_v26  ;;  %4046 = vmatprep.subr.bf16.mxu1 %v11853_v27  ;;  %v11943_v26 = vld [vmem:[%s13823_s6 + $0xa2c] ss:$16 sps:$4 sm:$0xff]   ;;  %v451_v27 = vpack.c.bf16 %v435_v21, %v435_v21  ;;  %v12025_v21 = vld [vmem:[%s13823_s6 + $0xbe8] ss:$16 sps:$4 sm:$0xff]  }
 0x1de   : > { %3719 = vmatpush1.bf16.msra.mxu0 %v11848_v28  ;;  %4047 = vmatpush1.bf16.msra.mxu1 %v11851_v29  ;;  %v11938_v28 = vld [vmem:[%s13823_s6 + $0xa20] ss:$16 sps:$4 sm:$0xff]   ;;  %v11941_v29 = vld [vmem:[%s13823_s6 + $0xa28] ss:$16 sps:$4 sm:$0xff]  }
 0x1df   : > { %3720 = vmatprep.subr.bf16.mxu0 %v11856_v30  ;;  %4048 = vmatprep.subr.bf16.mxu1 %v11859_v31  ;;  %v11946_v30 = vld [vmem:[%s13823_s6 + $0xa44] ss:$16 sps:$4 sm:$0xff]   ;;  %v11949_v31 = vld [vmem:[%s13823_s6 + $0xa4c] ss:$16 sps:$4 sm:$0xff]  }
 0x1e2   : > { %3721 = vmatpush1.bf16.msra.mxu0 %v11854_v32  ;;  %4049 = vmatpush1.bf16.msra.mxu1 %v11857_v33  ;;  %v11944_v32 = vld [vmem:[%s13823_s6 + $0xa40] ss:$16 sps:$4 sm:$0xff]   ;;  %v11947_v33 = vld [vmem:[%s13823_s6 + $0xa48] ss:$16 sps:$4 sm:$0xff]  }
 0x1e3   : > { %3722 = vmatprep.subr.bf16.mxu0 %v11862_v34  ;;  %4050 = vmatprep.subr.bf16.mxu1 %v11865_v35  ;;  %v11952_v34 = vld [vmem:[%s13823_s6 + $0xa64] ss:$16 sps:$4 sm:$0xff]   ;;  %v11955_v35 = vld [vmem:[%s13823_s6 + $0xa6c] ss:$16 sps:$4 sm:$0xff]  }
 0x1e6   : > { %3723 = vmatpush1.bf16.msra.mxu0 %v11860_v36  ;;  %4051 = vmatpush1.bf16.msra.mxu1 %v11863_v37  ;;  %v11950_v36 = vld [vmem:[%s13823_s6 + $0xa60] ss:$16 sps:$4 sm:$0xff]   ;;  %v11953_v37 = vld [vmem:[%s13823_s6 + $0xa68] ss:$16 sps:$4 sm:$0xff]  }
 0x1e7   : > { %3724 = vmatprep.subr.bf16.mxu0 %v11868_v38  ;;  %4052 = vmatprep.subr.bf16.mxu1 %v11871_v39  ;;  %v11958_v38 = vld [vmem:[%s13823_s6 + $0xa84] ss:$16 sps:$4 sm:$0xff]   ;;  %v11961_v39 = vld [vmem:[%s13823_s6 + $0xa8c] ss:$16 sps:$4 sm:$0xff]  }
 0x1ea   : > { %3725 = vmatpush1.bf16.msra.mxu0 %v11866_v40  ;;  %4053 = vmatpush1.bf16.msra.mxu1 %v11869_v41  ;;  %v11956_v40 = vld [vmem:[%s13823_s6 + $0xa80] ss:$16 sps:$4 sm:$0xff]   ;;  %v11959_v41 = vld [vmem:[%s13823_s6 + $0xa88] ss:$16 sps:$4 sm:$0xff]  }
 0x1eb   : > { %3726 = vmatprep.subr.bf16.mxu0 %v11874_v42  ;;  %4054 = vmatprep.subr.bf16.mxu1 %v11877_v43  ;;  %v11964_v42 = vld [vmem:[%s13823_s6 + $0xaa4] ss:$16 sps:$4 sm:$0xff]   ;;  %v11967_v43 = vld [vmem:[%s13823_s6 + $0xaac] ss:$16 sps:$4 sm:$0xff]  }
 0x1ee   : > { %3727 = vmatpush1.bf16.msra.mxu0 %v11872_v44  ;;  %4055 = vmatpush1.bf16.msra.mxu1 %v11875_v45  ;;  %v11962_v44 = vld [vmem:[%s13823_s6 + $0xaa0] ss:$16 sps:$4 sm:$0xff]   ;;  %v11965_v45 = vld [vmem:[%s13823_s6 + $0xaa8] ss:$16 sps:$4 sm:$0xff]  }
 0x1ef   : > { %3728 = vmatprep.subr.bf16.mxu0 %v11880_v46  ;;  %4056 = vmatprep.subr.bf16.mxu1 %v11883_v47  ;;  %v11970_v46 = vld [vmem:[%s13823_s6 + $0xac4] ss:$16 sps:$4 sm:$0xff]   ;;  %v11973_v47 = vld [vmem:[%s13823_s6 + $0xacc] ss:$16 sps:$4 sm:$0xff]  }
 0x1f2   : > { %3729 = vmatpush1.bf16.msra.mxu0 %v11878_v48  ;;  %4057 = vmatpush1.bf16.msra.mxu1 %v11881_v49  ;;  %v11968_v48 = vld [vmem:[%s13823_s6 + $0xac0] ss:$16 sps:$4 sm:$0xff]   ;;  %v11971_v49 = vld [vmem:[%s13823_s6 + $0xac8] ss:$16 sps:$4 sm:$0xff]  }
 0x1f3   : > { %3730 = vmatprep.subr.bf16.mxu0 %v11886_v50  ;;  %4058 = vmatprep.subr.bf16.mxu1 %v11889_v51  ;;  %v11976_v50 = vld [vmem:[%s13823_s6 + $0xae4] ss:$16 sps:$4 sm:$0xff]   ;;  %v11979_v51 = vld [vmem:[%s13823_s6 + $0xaec] ss:$16 sps:$4 sm:$0xff]  }
 0x1f6   : > { %3731 = vmatpush1.bf16.msra.mxu0 %v11884_v52  ;;  %4059 = vmatpush1.bf16.msra.mxu1 %v11887_v53  ;;  %v11974_v52 = vld [vmem:[%s13823_s6 + $0xae0] ss:$16 sps:$4 sm:$0xff]   ;;  %v11977_v53 = vld [vmem:[%s13823_s6 + $0xae8] ss:$16 sps:$4 sm:$0xff]  }
 0x1f7   : > { %3732 = vmatprep.subr.bf16.mxu0 %v11892_v54  ;;  %4060 = vmatprep.subr.bf16.mxu1 %v11895_v55  ;;  %v11982_v54 = vld [vmem:[%s13823_s6 + $0xb04] ss:$16 sps:$4 sm:$0xff]   ;;  %v11985_v55 = vld [vmem:[%s13823_s6 + $0xb0c] ss:$16 sps:$4 sm:$0xff]  }
 0x1fa   : > { %3733 = vmatpush1.bf16.msra.mxu0 %v11890_v56  ;;  %4061 = vmatpush1.bf16.msra.mxu1 %v11893_v57  ;;  %v11980_v56 = vld [vmem:[%s13823_s6 + $0xb00] ss:$16 sps:$4 sm:$0xff]   ;;  %v11983_v57 = vld [vmem:[%s13823_s6 + $0xb08] ss:$16 sps:$4 sm:$0xff]  }
 0x1fb   : > { %3734 = vmatprep.subr.bf16.mxu0 %v11898_v58  ;;  %4062 = vmatprep.subr.bf16.mxu1 %v11901_v59  ;;  %v11988_v58 = vld [vmem:[%s13823_s6 + $0xb24] ss:$16 sps:$4 sm:$0xff]   ;;  %v11991_v59 = vld [vmem:[%s13823_s6 + $0xb2c] ss:$16 sps:$4 sm:$0xff]  }
 0x1fe   : > { %3735 = vmatpush1.bf16.msra.mxu0 %v11896_v60  ;;  %4063 = vmatpush1.bf16.msra.mxu1 %v11899_v61  ;;  %v11986_v60 = vld [vmem:[%s13823_s6 + $0xb20] ss:$16 sps:$4 sm:$0xff]   ;;  %v11989_v61 = vld [vmem:[%s13823_s6 + $0xb28] ss:$16 sps:$4 sm:$0xff]  }
 0x1ff   : > { %3736 = vmatprep.subr.bf16.mxu0 %v11904_v62  ;;  %4064 = vmatprep.subr.bf16.mxu1 %v11907_v63  ;;  %v11994_v62 = vld [vmem:[%s13823_s6 + $0xb44] ss:$16 sps:$4 sm:$0xff]   ;;  %v11997_v63 = vld [vmem:[%s13823_s6 + $0xb4c] ss:$16 sps:$4 sm:$0xff]  }
 0x202   : > { %3737 = vmatpush1.bf16.msra.mxu0 %v11902_v0  ;;  %4065 = vmatpush1.bf16.msra.mxu1 %v11905_v1  ;;  %v11992_v0 = vld [vmem:[%s13823_s6 + $0xb40] ss:$16 sps:$4 sm:$0xff]   ;;  %v11995_v1 = vld [vmem:[%s13823_s6 + $0xb48] ss:$16 sps:$4 sm:$0xff]  }
 0x203   : > { %3738 = vmatprep.subr.bf16.mxu0 %v11910_v2  ;;  %4066 = vmatprep.subr.bf16.mxu1 %v11913_v3  ;;  %v12000_v2 = vld [vmem:[%s13823_s6 + $0xb64] ss:$16 sps:$4 sm:$0xff]   ;;  %v12003_v3 = vld [vmem:[%s13823_s6 + $0xb6c] ss:$16 sps:$4 sm:$0xff]  }
 0x206   : > { %3739 = vmatpush1.bf16.msra.mxu0 %v11908_v4  ;;  %4067 = vmatpush1.bf16.msra.mxu1 %v11911_v5  ;;  %v11998_v4 = vld [vmem:[%s13823_s6 + $0xb60] ss:$16 sps:$4 sm:$0xff]   ;;  %v12001_v5 = vld [vmem:[%s13823_s6 + $0xb68] ss:$16 sps:$4 sm:$0xff]  }
 0x207   : > { %3740 = vmatprep.subr.bf16.mxu0 %v11916_v6  ;;  %4068 = vmatprep.subr.bf16.mxu1 %v11919_v7  ;;  %v12006_v6 = vld [vmem:[%s13823_s6 + $0xb84] ss:$16 sps:$4 sm:$0xff]   ;;  %v12009_v7 = vld [vmem:[%s13823_s6 + $0xb8c] ss:$16 sps:$4 sm:$0xff]  }
 0x20a   : > { %3741 = vmatpush1.bf16.msra.mxu0 %v11914_v8  ;;  %4069 = vmatpush1.bf16.msra.mxu1 %v11917_v9  ;;  %v12004_v8 = vld [vmem:[%s13823_s6 + $0xb80] ss:$16 sps:$4 sm:$0xff]   ;;  %v12007_v9 = vld [vmem:[%s13823_s6 + $0xb88] ss:$16 sps:$4 sm:$0xff]  }
 0x20b   : > { %3742 = vmatprep.subr.bf16.mxu0 %v11922_v10  ;;  %4070 = vmatprep.subr.bf16.mxu1 %v11925_v11  ;;  %v12012_v10 = vld [vmem:[%s13823_s6 + $0xba4] ss:$16 sps:$4 sm:$0xff]   ;;  %v12015_v11 = vld [vmem:[%s13823_s6 + $0xbac] ss:$16 sps:$4 sm:$0xff]  }
 0x20e   : > { %3743 = vmatpush1.bf16.msra.mxu0 %v11920_v12  ;;  %4071 = vmatpush1.bf16.msra.mxu1 %v11923_v13  ;;  %v12010_v12 = vld [vmem:[%s13823_s6 + $0xba0] ss:$16 sps:$4 sm:$0xff]   ;;  %v12013_v13 = vld [vmem:[%s13823_s6 + $0xba8] ss:$16 sps:$4 sm:$0xff]  }
 0x20f   : > { %3744 = vmatprep.subr.bf16.mxu0 %v11928_v14  ;;  %4072 = vmatprep.subr.bf16.mxu1 %v11931_v15  ;;  %v12018_v14 = vld [vmem:[%s13823_s6 + $0xbc4] ss:$16 sps:$4 sm:$0xff]   ;;  %v12021_v15 = vld [vmem:[%s13823_s6 + $0xbcc] ss:$16 sps:$4 sm:$0xff]  }
 0x212   : > { %3745 = vmatpush1.bf16.msra.mxu0 %v11926_v16  ;;  %4073 = vmatpush1.bf16.msra.mxu1 %v11929_v17  ;;  %v12016_v16 = vld [vmem:[%s13823_s6 + $0xbc0] ss:$16 sps:$4 sm:$0xff]   ;;  %v12019_v17 = vld [vmem:[%s13823_s6 + $0xbc8] ss:$16 sps:$4 sm:$0xff]  }
 0x213   : > { %3755 = vmatprep.subr.bf16.mxu0 %v11934_v18  ;;  %4083 = vmatprep.subr.bf16.mxu1 %v11937_v20  ;;  %v12024_v18 = vld [vmem:[%s13823_s6 + $0xbe4] ss:$16 sps:$4 sm:$0xff]   ;;  %v12022_v20 = vld [vmem:[%s13823_s6 + $0xbe0] ss:$16 sps:$4 sm:$0xff]  }
 0x215   : > { %3747 = vmatmul.mubr.bf16.vlgmr.msra.gmra.mrb[0].mxu0 %v448_v22  ;;  %4075 = vmatmul.mubr.bf16.vlgmr.msra.gmra.mrb[0].mxu1 %v448_v22  ;;  %v434_v22 = vld [vmem:[#allocation4 + $0x50] sm:$0xff] }
 0x216   : > { %3756 = vmatpush1.bf16.msra.mxu0 %v11932_v23  ;;  %4084 = vmatpush1.bf16.msra.mxu1 %v11935_v24  ;;  %v12030_v23 = vld [vmem:[%s13823_s6 + $0xc04] ss:$16 sps:$4 sm:$0xff]   ;;  %v12033_v24 = vld [vmem:[%s13823_s6 + $0xc0c] ss:$16 sps:$4 sm:$0xff]  }
 0x217   : > { %3757 = vmatprep.subr.bf16.mxu0 %v11940_v25  ;;  %4085 = vmatprep.subr.bf16.mxu1 %v11943_v26  ;;  %v450_v25 = vpack.c.bf16 %v434_v22, %v434_v22  ;;  %v437_v26 = vld [vmem:[#allocation4 + $0x68] sm:$0xff]  ;;  %v12120_v22 = vld [vmem:[%s13823_s6 + $0xde4] ss:$16 sps:$4 sm:$0xff]  }
 0x218   : > { %3787 = vmatprep.mubr.bf16.mxu0 %v451_v27  ;;  %4115 = vmatprep.mubr.bf16.mxu1 %v451_v27  ;;  %v12028_v27 = vld [vmem:[%s13823_s6 + $0xc00] ss:$16 sps:$4 sm:$0xff]  }
 0x21a   : > { %3758 = vmatpush1.bf16.msra.mxu0 %v11938_v28  ;;  %4086 = vmatpush1.bf16.msra.mxu1 %v11941_v29  ;;  %v12031_v28 = vld [vmem:[%s13823_s6 + $0xc08] ss:$16 sps:$4 sm:$0xff]   ;;  %v12036_v29 = vld [vmem:[%s13823_s6 + $0xc24] ss:$16 sps:$4 sm:$0xff]  }
 0x21b   : > { %3759 = vmatprep.subr.bf16.mxu0 %v11946_v30  ;;  %4087 = vmatprep.subr.bf16.mxu1 %v11949_v31  ;;  %v12039_v30 = vld [vmem:[%s13823_s6 + $0xc2c] ss:$16 sps:$4 sm:$0xff]   ;;  %v453_v31 = vpack.c.bf16 %v437_v26, %v437_v26  ;;  %v436_v26 = vld [vmem:[#allocation4 + $0x60] sm:$0xff] }
 0x21e   : > { %3760 = vmatpush1.bf16.msra.mxu0 %v11944_v32  ;;  %4088 = vmatpush1.bf16.msra.mxu1 %v11947_v33  ;;  %v12034_v32 = vld [vmem:[%s13823_s6 + $0xc20] ss:$16 sps:$4 sm:$0xff]   ;;  %v12037_v33 = vld [vmem:[%s13823_s6 + $0xc28] ss:$16 sps:$4 sm:$0xff]  }
 0x21f   : > { %3761 = vmatprep.subr.bf16.mxu0 %v11952_v34  ;;  %4089 = vmatprep.subr.bf16.mxu1 %v11955_v35  ;;  %v12042_v34 = vld [vmem:[%s13823_s6 + $0xc44] ss:$16 sps:$4 sm:$0xff]   ;;  %v12045_v35 = vld [vmem:[%s13823_s6 + $0xc4c] ss:$16 sps:$4 sm:$0xff]  }
 0x222   : > { %3762 = vmatpush1.bf16.msra.mxu0 %v11950_v36  ;;  %4090 = vmatpush1.bf16.msra.mxu1 %v11953_v37  ;;  %v12040_v36 = vld [vmem:[%s13823_s6 + $0xc40] ss:$16 sps:$4 sm:$0xff]   ;;  %v12043_v37 = vld [vmem:[%s13823_s6 + $0xc48] ss:$16 sps:$4 sm:$0xff]  }
 0x223   : > { %3763 = vmatprep.subr.bf16.mxu0 %v11958_v38  ;;  %4091 = vmatprep.subr.bf16.mxu1 %v11961_v39  ;;  %v12048_v38 = vld [vmem:[%s13823_s6 + $0xc64] ss:$16 sps:$4 sm:$0xff]   ;;  %v12051_v39 = vld [vmem:[%s13823_s6 + $0xc6c] ss:$16 sps:$4 sm:$0xff]  }
 0x226   : > { %3764 = vmatpush1.bf16.msra.mxu0 %v11956_v40  ;;  %4092 = vmatpush1.bf16.msra.mxu1 %v11959_v41  ;;  %v12046_v40 = vld [vmem:[%s13823_s6 + $0xc60] ss:$16 sps:$4 sm:$0xff]   ;;  %v12049_v41 = vld [vmem:[%s13823_s6 + $0xc68] ss:$16 sps:$4 sm:$0xff]  }
 0x227   : > { %3765 = vmatprep.subr.bf16.mxu0 %v11964_v42  ;;  %4093 = vmatprep.subr.bf16.mxu1 %v11967_v43  ;;  %v12054_v42 = vld [vmem:[%s13823_s6 + $0xc84] ss:$16 sps:$4 sm:$0xff]   ;;  %v12057_v43 = vld [vmem:[%s13823_s6 + $0xc8c] ss:$16 sps:$4 sm:$0xff]  }
 0x22a   : > { %3766 = vmatpush1.bf16.msra.mxu0 %v11962_v44  ;;  %4094 = vmatpush1.bf16.msra.mxu1 %v11965_v45  ;;  %v12052_v44 = vld [vmem:[%s13823_s6 + $0xc80] ss:$16 sps:$4 sm:$0xff]   ;;  %v12055_v45 = vld [vmem:[%s13823_s6 + $0xc88] ss:$16 sps:$4 sm:$0xff]  }
 0x22b   : > { %3767 = vmatprep.subr.bf16.mxu0 %v11970_v46  ;;  %4095 = vmatprep.subr.bf16.mxu1 %v11973_v47  ;;  %v12060_v46 = vld [vmem:[%s13823_s6 + $0xca4] ss:$16 sps:$4 sm:$0xff]   ;;  %v12063_v47 = vld [vmem:[%s13823_s6 + $0xcac] ss:$16 sps:$4 sm:$0xff]  }
 0x22e   : > { %3768 = vmatpush1.bf16.msra.mxu0 %v11968_v48  ;;  %4096 = vmatpush1.bf16.msra.mxu1 %v11971_v49  ;;  %v12058_v48 = vld [vmem:[%s13823_s6 + $0xca0] ss:$16 sps:$4 sm:$0xff]   ;;  %v12061_v49 = vld [vmem:[%s13823_s6 + $0xca8] ss:$16 sps:$4 sm:$0xff]  }
 0x22f   : > { %3769 = vmatprep.subr.bf16.mxu0 %v11976_v50  ;;  %4097 = vmatprep.subr.bf16.mxu1 %v11979_v51  ;;  %v12066_v50 = vld [vmem:[%s13823_s6 + $0xcc4] ss:$16 sps:$4 sm:$0xff]   ;;  %v12069_v51 = vld [vmem:[%s13823_s6 + $0xccc] ss:$16 sps:$4 sm:$0xff]  }
 0x232   : > { %3770 = vmatpush1.bf16.msra.mxu0 %v11974_v52  ;;  %4098 = vmatpush1.bf16.msra.mxu1 %v11977_v53  ;;  %v12064_v52 = vld [vmem:[%s13823_s6 + $0xcc0] ss:$16 sps:$4 sm:$0xff]   ;;  %v12067_v53 = vld [vmem:[%s13823_s6 + $0xcc8] ss:$16 sps:$4 sm:$0xff]  }
 0x233   : > { %3771 = vmatprep.subr.bf16.mxu0 %v11982_v54  ;;  %4099 = vmatprep.subr.bf16.mxu1 %v11985_v55  ;;  %v12072_v54 = vld [vmem:[%s13823_s6 + $0xce4] ss:$16 sps:$4 sm:$0xff]   ;;  %v12075_v55 = vld [vmem:[%s13823_s6 + $0xcec] ss:$16 sps:$4 sm:$0xff]  }
 0x236   : > { %3772 = vmatpush1.bf16.msra.mxu0 %v11980_v56  ;;  %4100 = vmatpush1.bf16.msra.mxu1 %v11983_v57  ;;  %v12070_v56 = vld [vmem:[%s13823_s6 + $0xce0] ss:$16 sps:$4 sm:$0xff]   ;;  %v12073_v57 = vld [vmem:[%s13823_s6 + $0xce8] ss:$16 sps:$4 sm:$0xff]  }
 0x237   : > { %3773 = vmatprep.subr.bf16.mxu0 %v11988_v58  ;;  %4101 = vmatprep.subr.bf16.mxu1 %v11991_v59  ;;  %v12078_v58 = vld [vmem:[%s13823_s6 + $0xd04] ss:$16 sps:$4 sm:$0xff]   ;;  %v12081_v59 = vld [vmem:[%s13823_s6 + $0xd0c] ss:$16 sps:$4 sm:$0xff]  }
 0x23a   : > { %3774 = vmatpush1.bf16.msra.mxu0 %v11986_v60  ;;  %4102 = vmatpush1.bf16.msra.mxu1 %v11989_v61  ;;  %v12076_v60 = vld [vmem:[%s13823_s6 + $0xd00] ss:$16 sps:$4 sm:$0xff]   ;;  %v12079_v61 = vld [vmem:[%s13823_s6 + $0xd08] ss:$16 sps:$4 sm:$0xff]  }
 0x23b   : > { %3775 = vmatprep.subr.bf16.mxu0 %v11994_v62  ;;  %4103 = vmatprep.subr.bf16.mxu1 %v11997_v63  ;;  %v12084_v62 = vld [vmem:[%s13823_s6 + $0xd24] ss:$16 sps:$4 sm:$0xff]   ;;  %v12087_v63 = vld [vmem:[%s13823_s6 + $0xd2c] ss:$16 sps:$4 sm:$0xff]  }
 0x23e   : > { %3776 = vmatpush1.bf16.msra.mxu0 %v11992_v0  ;;  %4104 = vmatpush1.bf16.msra.mxu1 %v11995_v1  ;;  %v12082_v0 = vld [vmem:[%s13823_s6 + $0xd20] ss:$16 sps:$4 sm:$0xff]   ;;  %v12085_v1 = vld [vmem:[%s13823_s6 + $0xd28] ss:$16 sps:$4 sm:$0xff]  }
 0x23f   : > { %3777 = vmatprep.subr.bf16.mxu0 %v12000_v2  ;;  %4105 = vmatprep.subr.bf16.mxu1 %v12003_v3  ;;  %v12090_v2 = vld [vmem:[%s13823_s6 + $0xd44] ss:$16 sps:$4 sm:$0xff]   ;;  %v12093_v3 = vld [vmem:[%s13823_s6 + $0xd4c] ss:$16 sps:$4 sm:$0xff]  }
 0x242   : > { %3778 = vmatpush1.bf16.msra.mxu0 %v11998_v4  ;;  %4106 = vmatpush1.bf16.msra.mxu1 %v12001_v5  ;;  %v12088_v4 = vld [vmem:[%s13823_s6 + $0xd40] ss:$16 sps:$4 sm:$0xff]   ;;  %v12091_v5 = vld [vmem:[%s13823_s6 + $0xd48] ss:$16 sps:$4 sm:$0xff]  }
 0x243   : > { %3779 = vmatprep.subr.bf16.mxu0 %v12006_v6  ;;  %4107 = vmatprep.subr.bf16.mxu1 %v12009_v7  ;;  %v12096_v6 = vld [vmem:[%s13823_s6 + $0xd64] ss:$16 sps:$4 sm:$0xff]   ;;  %v12099_v7 = vld [vmem:[%s13823_s6 + $0xd6c] ss:$16 sps:$4 sm:$0xff]  }
 0x246   : > { %3780 = vmatpush1.bf16.msra.mxu0 %v12004_v8  ;;  %4108 = vmatpush1.bf16.msra.mxu1 %v12007_v9  ;;  %v12094_v8 = vld [vmem:[%s13823_s6 + $0xd60] ss:$16 sps:$4 sm:$0xff]   ;;  %v12097_v9 = vld [vmem:[%s13823_s6 + $0xd68] ss:$16 sps:$4 sm:$0xff]  }
 0x247   : > { %3781 = vmatprep.subr.bf16.mxu0 %v12012_v10  ;;  %4109 = vmatprep.subr.bf16.mxu1 %v12015_v11  ;;  %v12102_v10 = vld [vmem:[%s13823_s6 + $0xd84] ss:$16 sps:$4 sm:$0xff]   ;;  %v12105_v11 = vld [vmem:[%s13823_s6 + $0xd8c] ss:$16 sps:$4 sm:$0xff]  }
 0x24a   : > { %3782 = vmatpush1.bf16.msra.mxu0 %v12010_v12  ;;  %4110 = vmatpush1.bf16.msra.mxu1 %v12013_v13  ;;  %v12100_v12 = vld [vmem:[%s13823_s6 + $0xd80] ss:$16 sps:$4 sm:$0xff]   ;;  %v12103_v13 = vld [vmem:[%s13823_s6 + $0xd88] ss:$16 sps:$4 sm:$0xff]  }
 0x24b   : > { %3783 = vmatprep.subr.bf16.mxu0 %v12018_v14  ;;  %4111 = vmatprep.subr.bf16.mxu1 %v12021_v15  ;;  %v12108_v14 = vld [vmem:[%s13823_s6 + $0xda4] ss:$16 sps:$4 sm:$0xff]   ;;  %v12111_v15 = vld [vmem:[%s13823_s6 + $0xdac] ss:$16 sps:$4 sm:$0xff]  }
 0x24e   : > { %3784 = vmatpush1.bf16.msra.mxu0 %v12016_v16  ;;  %4112 = vmatpush1.bf16.msra.mxu1 %v12019_v17  ;;  %v12106_v16 = vld [vmem:[%s13823_s6 + $0xda0] ss:$16 sps:$4 sm:$0xff]   ;;  %v12109_v17 = vld [vmem:[%s13823_s6 + $0xda8] ss:$16 sps:$4 sm:$0xff]  }
 0x24f   : > { %3785 = vmatprep.subr.bf16.mxu0 %v12024_v18  ;;  %4113 = vmatprep.subr.bf16.mxu1 %v12027_v19  ;;  %v12114_v18 = vld [vmem:[%s13823_s6 + $0xdc4] ss:$16 sps:$4 sm:$0xff]   ;;  %v12117_v19 = vld [vmem:[%s13823_s6 + $0xdcc] ss:$16 sps:$4 sm:$0xff]  }
 0x252   : > { %3786 = vmatpush1.bf16.msra.mxu0 %v12022_v20  ;;  %4114 = vmatpush1.bf16.msra.mxu1 %v12025_v21  ;;  %v12112_v20 = vld [vmem:[%s13823_s6 + $0xdc0] ss:$16 sps:$4 sm:$0xff]   ;;  %v12115_v21 = vld [vmem:[%s13823_s6 + $0xdc8] ss:$16 sps:$4 sm:$0xff]  }
 0x253   : > { %3796 = vmatprep.subr.bf16.mxu0 %v12030_v23  ;;  %4124 = vmatprep.subr.bf16.mxu1 %v12033_v24  ;;  %v12123_v23 = vld [vmem:[%s13823_s6 + $0xdec] ss:$16 sps:$4 sm:$0xff]   ;;  %v12118_v24 = vld [vmem:[%s13823_s6 + $0xde0] ss:$16 sps:$4 sm:$0xff]  }
 0x255   : > { %3788 = vmatmul.mubr.bf16.vlgmr.msra.gmra.mrb[0].mxu0 %v450_v25  ;;  %4116 = vmatmul.mubr.bf16.vlgmr.msra.gmra.mrb[0].mxu1 %v450_v25  ;;  %v12121_v25 = vld [vmem:[%s13823_s6 + $0xde8] ss:$16 sps:$4 sm:$0xff]  }
 0x256   : > { %3797 = vmatpush1.bf16.msra.mxu0 %v12028_v27  ;;  %4125 = vmatpush1.bf16.msra.mxu1 %v12031_v28  ;;  %v12126_v27 = vld [vmem:[%s13823_s6 + $0xe04] ss:$16 sps:$4 sm:$0xff]   ;;  %v12129_v28 = vld [vmem:[%s13823_s6 + $0xe0c] ss:$16 sps:$4 sm:$0xff]  }
 0x257   : > { %3798 = vmatprep.subr.bf16.mxu0 %v12036_v29  ;;  %4126 = vmatprep.subr.bf16.mxu1 %v12039_v30  ;;  %v452_v29 = vpack.c.bf16 %v436_v26, %v436_v26  ;;  %v439_v30 = vld [vmem:[#allocation4 + $0x78] sm:$0xff]  ;;  %v12216_v26 = vld [vmem:[%s13823_s6 + $0xfe4] ss:$16 sps:$4 sm:$0xff]  }
 0x258   : > { %3828 = vmatprep.mubr.bf16.mxu0 %v453_v31  ;;  %4156 = vmatprep.mubr.bf16.mxu1 %v453_v31  ;;  %v12124_v31 = vld [vmem:[%s13823_s6 + $0xe00] ss:$16 sps:$4 sm:$0xff]  }
 0x25a   : > { %3799 = vmatpush1.bf16.msra.mxu0 %v12034_v32  ;;  %4127 = vmatpush1.bf16.msra.mxu1 %v12037_v33  ;;  %v12127_v32 = vld [vmem:[%s13823_s6 + $0xe08] ss:$16 sps:$4 sm:$0xff]   ;;  %v12132_v33 = vld [vmem:[%s13823_s6 + $0xe24] ss:$16 sps:$4 sm:$0xff]  }
 0x25b   : > { %3800 = vmatprep.subr.bf16.mxu0 %v12042_v34  ;;  %4128 = vmatprep.subr.bf16.mxu1 %v12045_v35  ;;  %v12135_v34 = vld [vmem:[%s13823_s6 + $0xe2c] ss:$16 sps:$4 sm:$0xff]   ;;  %v455_v35 = vpack.c.bf16 %v439_v30, %v439_v30  ;;  %v438_v30 = vld [vmem:[#allocation4 + $0x70] sm:$0xff] }
 0x25e   : > { %3801 = vmatpush1.bf16.msra.mxu0 %v12040_v36  ;;  %4129 = vmatpush1.bf16.msra.mxu1 %v12043_v37  ;;  %v12130_v36 = vld [vmem:[%s13823_s6 + $0xe20] ss:$16 sps:$4 sm:$0xff]   ;;  %v12133_v37 = vld [vmem:[%s13823_s6 + $0xe28] ss:$16 sps:$4 sm:$0xff]  }
 0x25f   : > { %3802 = vmatprep.subr.bf16.mxu0 %v12048_v38  ;;  %4130 = vmatprep.subr.bf16.mxu1 %v12051_v39  ;;  %v12138_v38 = vld [vmem:[%s13823_s6 + $0xe44] ss:$16 sps:$4 sm:$0xff]   ;;  %v12141_v39 = vld [vmem:[%s13823_s6 + $0xe4c] ss:$16 sps:$4 sm:$0xff]  }
 0x262   : > { %3803 = vmatpush1.bf16.msra.mxu0 %v12046_v40  ;;  %4131 = vmatpush1.bf16.msra.mxu1 %v12049_v41  ;;  %v12136_v40 = vld [vmem:[%s13823_s6 + $0xe40] ss:$16 sps:$4 sm:$0xff]   ;;  %v12139_v41 = vld [vmem:[%s13823_s6 + $0xe48] ss:$16 sps:$4 sm:$0xff]  }
 0x263   : > { %3804 = vmatprep.subr.bf16.mxu0 %v12054_v42  ;;  %4132 = vmatprep.subr.bf16.mxu1 %v12057_v43  ;;  %v12144_v42 = vld [vmem:[%s13823_s6 + $0xe64] ss:$16 sps:$4 sm:$0xff]   ;;  %v12147_v43 = vld [vmem:[%s13823_s6 + $0xe6c] ss:$16 sps:$4 sm:$0xff]  }
 0x266   : > { %3805 = vmatpush1.bf16.msra.mxu0 %v12052_v44  ;;  %4133 = vmatpush1.bf16.msra.mxu1 %v12055_v45  ;;  %v12142_v44 = vld [vmem:[%s13823_s6 + $0xe60] ss:$16 sps:$4 sm:$0xff]   ;;  %v12145_v45 = vld [vmem:[%s13823_s6 + $0xe68] ss:$16 sps:$4 sm:$0xff]  }
 0x267   : > { %3806 = vmatprep.subr.bf16.mxu0 %v12060_v46  ;;  %4134 = vmatprep.subr.bf16.mxu1 %v12063_v47  ;;  %v12150_v46 = vld [vmem:[%s13823_s6 + $0xe84] ss:$16 sps:$4 sm:$0xff]   ;;  %v12153_v47 = vld [vmem:[%s13823_s6 + $0xe8c] ss:$16 sps:$4 sm:$0xff]  }
 0x26a   : > { %3807 = vmatpush1.bf16.msra.mxu0 %v12058_v48  ;;  %4135 = vmatpush1.bf16.msra.mxu1 %v12061_v49  ;;  %v12148_v48 = vld [vmem:[%s13823_s6 + $0xe80] ss:$16 sps:$4 sm:$0xff]   ;;  %v12151_v49 = vld [vmem:[%s13823_s6 + $0xe88] ss:$16 sps:$4 sm:$0xff]  }
 0x26b   : > { %3808 = vmatprep.subr.bf16.mxu0 %v12066_v50  ;;  %4136 = vmatprep.subr.bf16.mxu1 %v12069_v51  ;;  %v12156_v50 = vld [vmem:[%s13823_s6 + $0xea4] ss:$16 sps:$4 sm:$0xff]   ;;  %v12159_v51 = vld [vmem:[%s13823_s6 + $0xeac] ss:$16 sps:$4 sm:$0xff]  }
 0x26e   : > { %3809 = vmatpush1.bf16.msra.mxu0 %v12064_v52  ;;  %4137 = vmatpush1.bf16.msra.mxu1 %v12067_v53  ;;  %v12154_v52 = vld [vmem:[%s13823_s6 + $0xea0] ss:$16 sps:$4 sm:$0xff]   ;;  %v12157_v53 = vld [vmem:[%s13823_s6 + $0xea8] ss:$16 sps:$4 sm:$0xff]  }
 0x26f   : > { %3810 = vmatprep.subr.bf16.mxu0 %v12072_v54  ;;  %4138 = vmatprep.subr.bf16.mxu1 %v12075_v55  ;;  %v12162_v54 = vld [vmem:[%s13823_s6 + $0xec4] ss:$16 sps:$4 sm:$0xff]   ;;  %v12165_v55 = vld [vmem:[%s13823_s6 + $0xecc] ss:$16 sps:$4 sm:$0xff]  }
 0x272   : > { %3811 = vmatpush1.bf16.msra.mxu0 %v12070_v56  ;;  %4139 = vmatpush1.bf16.msra.mxu1 %v12073_v57  ;;  %v12160_v56 = vld [vmem:[%s13823_s6 + $0xec0] ss:$16 sps:$4 sm:$0xff]   ;;  %v12163_v57 = vld [vmem:[%s13823_s6 + $0xec8] ss:$16 sps:$4 sm:$0xff]  }
 0x273   : > { %3812 = vmatprep.subr.bf16.mxu0 %v12078_v58  ;;  %4140 = vmatprep.subr.bf16.mxu1 %v12081_v59  ;;  %v12168_v58 = vld [vmem:[%s13823_s6 + $0xee4] ss:$16 sps:$4 sm:$0xff]   ;;  %v12171_v59 = vld [vmem:[%s13823_s6 + $0xeec] ss:$16 sps:$4 sm:$0xff]  }
 0x276   : > { %3813 = vmatpush1.bf16.msra.mxu0 %v12076_v60  ;;  %4141 = vmatpush1.bf16.msra.mxu1 %v12079_v61  ;;  %v12166_v60 = vld [vmem:[%s13823_s6 + $0xee0] ss:$16 sps:$4 sm:$0xff]   ;;  %v12169_v61 = vld [vmem:[%s13823_s6 + $0xee8] ss:$16 sps:$4 sm:$0xff]  }
 0x277   : > { %3814 = vmatprep.subr.bf16.mxu0 %v12084_v62  ;;  %4142 = vmatprep.subr.bf16.mxu1 %v12087_v63  ;;  %v12174_v62 = vld [vmem:[%s13823_s6 + $0xf04] ss:$16 sps:$4 sm:$0xff]   ;;  %v12177_v63 = vld [vmem:[%s13823_s6 + $0xf0c] ss:$16 sps:$4 sm:$0xff]  }
 0x27a   : > { %3815 = vmatpush1.bf16.msra.mxu0 %v12082_v0  ;;  %4143 = vmatpush1.bf16.msra.mxu1 %v12085_v1  ;;  %v12172_v0 = vld [vmem:[%s13823_s6 + $0xf00] ss:$16 sps:$4 sm:$0xff]   ;;  %v12175_v1 = vld [vmem:[%s13823_s6 + $0xf08] ss:$16 sps:$4 sm:$0xff]  }
 0x27b   : > { %3816 = vmatprep.subr.bf16.mxu0 %v12090_v2  ;;  %4144 = vmatprep.subr.bf16.mxu1 %v12093_v3  ;;  %v12180_v2 = vld [vmem:[%s13823_s6 + $0xf24] ss:$16 sps:$4 sm:$0xff]   ;;  %v12183_v3 = vld [vmem:[%s13823_s6 + $0xf2c] ss:$16 sps:$4 sm:$0xff]  }
 0x27e   : > { %3817 = vmatpush1.bf16.msra.mxu0 %v12088_v4  ;;  %4145 = vmatpush1.bf16.msra.mxu1 %v12091_v5  ;;  %v12178_v4 = vld [vmem:[%s13823_s6 + $0xf20] ss:$16 sps:$4 sm:$0xff]   ;;  %v12181_v5 = vld [vmem:[%s13823_s6 + $0xf28] ss:$16 sps:$4 sm:$0xff]  }
 0x27f   : > { %3818 = vmatprep.subr.bf16.mxu0 %v12096_v6  ;;  %4146 = vmatprep.subr.bf16.mxu1 %v12099_v7  ;;  %v12186_v6 = vld [vmem:[%s13823_s6 + $0xf44] ss:$16 sps:$4 sm:$0xff]   ;;  %v12189_v7 = vld [vmem:[%s13823_s6 + $0xf4c] ss:$16 sps:$4 sm:$0xff]  }
 0x282   : > { %3819 = vmatpush1.bf16.msra.mxu0 %v12094_v8  ;;  %4147 = vmatpush1.bf16.msra.mxu1 %v12097_v9  ;;  %v12184_v8 = vld [vmem:[%s13823_s6 + $0xf40] ss:$16 sps:$4 sm:$0xff]   ;;  %v12187_v9 = vld [vmem:[%s13823_s6 + $0xf48] ss:$16 sps:$4 sm:$0xff]  }
 0x283   : > { %3820 = vmatprep.subr.bf16.mxu0 %v12102_v10  ;;  %4148 = vmatprep.subr.bf16.mxu1 %v12105_v11  ;;  %v12192_v10 = vld [vmem:[%s13823_s6 + $0xf64] ss:$16 sps:$4 sm:$0xff]   ;;  %v12195_v11 = vld [vmem:[%s13823_s6 + $0xf6c] ss:$16 sps:$4 sm:$0xff]  }
 0x286   : > { %3821 = vmatpush1.bf16.msra.mxu0 %v12100_v12  ;;  %4149 = vmatpush1.bf16.msra.mxu1 %v12103_v13  ;;  %v12190_v12 = vld [vmem:[%s13823_s6 + $0xf60] ss:$16 sps:$4 sm:$0xff]   ;;  %v12193_v13 = vld [vmem:[%s13823_s6 + $0xf68] ss:$16 sps:$4 sm:$0xff]  }
 0x287   : > { %3822 = vmatprep.subr.bf16.mxu0 %v12108_v14  ;;  %4150 = vmatprep.subr.bf16.mxu1 %v12111_v15  ;;  %v12198_v14 = vld [vmem:[%s13823_s6 + $0xf84] ss:$16 sps:$4 sm:$0xff]   ;;  %v12201_v15 = vld [vmem:[%s13823_s6 + $0xf8c] ss:$16 sps:$4 sm:$0xff]  }
 0x28a   : > { %3823 = vmatpush1.bf16.msra.mxu0 %v12106_v16  ;;  %4151 = vmatpush1.bf16.msra.mxu1 %v12109_v17  ;;  %v12196_v16 = vld [vmem:[%s13823_s6 + $0xf80] ss:$16 sps:$4 sm:$0xff]   ;;  %v12199_v17 = vld [vmem:[%s13823_s6 + $0xf88] ss:$16 sps:$4 sm:$0xff]  }
 0x28b   : > { %3824 = vmatprep.subr.bf16.mxu0 %v12114_v18  ;;  %4152 = vmatprep.subr.bf16.mxu1 %v12117_v19  ;;  %v12204_v18 = vld [vmem:[%s13823_s6 + $0xfa4] ss:$16 sps:$4 sm:$0xff]   ;;  %v12207_v19 = vld [vmem:[%s13823_s6 + $0xfac] ss:$16 sps:$4 sm:$0xff]  }
 0x28e   : > { %3825 = vmatpush1.bf16.msra.mxu0 %v12112_v20  ;;  %4153 = vmatpush1.bf16.msra.mxu1 %v12115_v21  ;;  %v12202_v20 = vld [vmem:[%s13823_s6 + $0xfa0] ss:$16 sps:$4 sm:$0xff]   ;;  %v12205_v21 = vld [vmem:[%s13823_s6 + $0xfa8] ss:$16 sps:$4 sm:$0xff]  }
 0x28f   : > { %3826 = vmatprep.subr.bf16.mxu0 %v12120_v22  ;;  %4154 = vmatprep.subr.bf16.mxu1 %v12123_v23  ;;  %v12210_v22 = vld [vmem:[%s13823_s6 + $0xfc4] ss:$16 sps:$4 sm:$0xff]   ;;  %v12213_v23 = vld [vmem:[%s13823_s6 + $0xfcc] ss:$16 sps:$4 sm:$0xff]  }
 0x292   : > { %3827 = vmatpush1.bf16.msra.mxu0 %v12118_v24  ;;  %4155 = vmatpush1.bf16.msra.mxu1 %v12121_v25  ;;  %v12208_v24 = vld [vmem:[%s13823_s6 + $0xfc0] ss:$16 sps:$4 sm:$0xff]   ;;  %v12211_v25 = vld [vmem:[%s13823_s6 + $0xfc8] ss:$16 sps:$4 sm:$0xff]  }
 0x293   : > { %3837 = vmatprep.subr.bf16.mxu0 %v12126_v27  ;;  %4165 = vmatprep.subr.bf16.mxu1 %v12129_v28  ;;  %v12219_v27 = vld [vmem:[%s13823_s6 + $0xfec] ss:$16 sps:$4 sm:$0xff]   ;;  %v12214_v28 = vld [vmem:[%s13823_s6 + $0xfe0] ss:$16 sps:$4 sm:$0xff]  }
 0x295   : > { %3829 = vmatmul.mubr.bf16.vlgmr.msra.gmra.mrb[0].mxu0 %v452_v29  ;;  %4157 = vmatmul.mubr.bf16.vlgmr.msra.gmra.mrb[0].mxu1 %v452_v29  ;;  %v12217_v29 = vld [vmem:[%s13823_s6 + $0xfe8] ss:$16 sps:$4 sm:$0xff]  }
 0x296   : > { %3838 = vmatpush1.bf16.msra.mxu0 %v12124_v31  ;;  %4166 = vmatpush1.bf16.msra.mxu1 %v12127_v32  ;;  %v454_v31 = vpack.c.bf16 %v438_v30, %v438_v30  ;;  %v970_v32 = vlaneseq }
 0x297   : > { %3839 = vmatprep.subr.bf16.mxu0 %v12132_v33  ;;  %4167 = vmatprep.subr.bf16.mxu1 %v12135_v34 }
 0x298   : > { %3869 = vmatprep.mubr.bf16.mxu0 %v455_v35  ;;  %4197 = vmatprep.mubr.bf16.mxu1 %v455_v35  ;;  %v971_v33 = vshrl.u32 %v970_v32, 7 }
 0x29a   : > { %3840 = vmatpush1.bf16.msra.mxu0 %v12130_v36  ;;  %4168 = vmatpush1.bf16.msra.mxu1 %v12133_v37  ;;  %v972_v34 = vsub.s32 0, %v971_v33  ;;  %v980_v35 = vsub.s32 2, %v971_v33  ;;  %v968_v36 = vld [vmem:[%s357_s7] sm:$0xf]  ;;  %v976_v37 = vsub.s32 1, %v971_v33 }
 0x29b   : > { %3841 = vmatprep.subr.bf16.mxu0 %v12138_v38  ;;  %4169 = vmatprep.subr.bf16.mxu1 %v12141_v39  ;;  %v984_v38 = vsub.s32 3, %v971_v33 }
 0x29c   : > { %v973_v39 = vrot.slane %v968_v36, %v972_v34 }
 0x29e   : > { %3842 = vmatpush1.bf16.msra.mxu0 %v12136_v40  ;;  %4170 = vmatpush1.bf16.msra.mxu1 %v12139_v41  ;;  %v981_v40 = vrot.slane %v968_v36, %v980_v35  ;;  %v977_v41 = vrot.slane %v968_v36, %v976_v37 }
 0x29f   : > { %3843 = vmatprep.subr.bf16.mxu0 %v12144_v42  ;;  %4171 = vmatprep.subr.bf16.mxu1 %v12147_v43  ;;  %v985_v42 = vrot.slane %v968_v36, %v984_v38 }
 0x2a2   : > { %3844 = vmatpush1.bf16.msra.mxu0 %v12142_v44  ;;  %4172 = vmatpush1.bf16.msra.mxu1 %v12145_v45 }
 0x2a3   : > { %3845 = vmatprep.subr.bf16.mxu0 %v12150_v46  ;;  %4173 = vmatprep.subr.bf16.mxu1 %v12153_v47 }
 0x2a6   : > { %3846 = vmatpush1.bf16.msra.mxu0 %v12148_v48  ;;  %4174 = vmatpush1.bf16.msra.mxu1 %v12151_v49 }
 0x2a7   : > { %3847 = vmatprep.subr.bf16.mxu0 %v12156_v50  ;;  %4175 = vmatprep.subr.bf16.mxu1 %v12159_v51 }
 0x2aa   : > { %3848 = vmatpush1.bf16.msra.mxu0 %v12154_v52  ;;  %4176 = vmatpush1.bf16.msra.mxu1 %v12157_v53 }
 0x2ab   : > { %3849 = vmatprep.subr.bf16.mxu0 %v12162_v54  ;;  %4177 = vmatprep.subr.bf16.mxu1 %v12165_v55 }
 0x2ae   : > { %3850 = vmatpush1.bf16.msra.mxu0 %v12160_v56  ;;  %4178 = vmatpush1.bf16.msra.mxu1 %v12163_v57 }
 0x2af   : > { %3851 = vmatprep.subr.bf16.mxu0 %v12168_v58  ;;  %4179 = vmatprep.subr.bf16.mxu1 %v12171_v59 }
 0x2b2   : > { %3852 = vmatpush1.bf16.msra.mxu0 %v12166_v60  ;;  %4180 = vmatpush1.bf16.msra.mxu1 %v12169_v61 }
 0x2b3   : > { %3853 = vmatprep.subr.bf16.mxu0 %v12174_v62  ;;  %4181 = vmatprep.subr.bf16.mxu1 %v12177_v63 }
 0x2b6   : > { %3854 = vmatpush1.bf16.msra.mxu0 %v12172_v0  ;;  %4182 = vmatpush1.bf16.msra.mxu1 %v12175_v1 }
 0x2b7   : > { %3855 = vmatprep.subr.bf16.mxu0 %v12180_v2  ;;  %4183 = vmatprep.subr.bf16.mxu1 %v12183_v3 }
 0x2ba   : > { %3856 = vmatpush1.bf16.msra.mxu0 %v12178_v4  ;;  %4184 = vmatpush1.bf16.msra.mxu1 %v12181_v5 }
 0x2bb   : > { %3857 = vmatprep.subr.bf16.mxu0 %v12186_v6  ;;  %4185 = vmatprep.subr.bf16.mxu1 %v12189_v7 }
 0x2be   : > { %3858 = vmatpush1.bf16.msra.mxu0 %v12184_v8  ;;  %4186 = vmatpush1.bf16.msra.mxu1 %v12187_v9 }
 0x2bf   : > { %3859 = vmatprep.subr.bf16.mxu0 %v12192_v10  ;;  %4187 = vmatprep.subr.bf16.mxu1 %v12195_v11 }
 0x2c2   : > { %3860 = vmatpush1.bf16.msra.mxu0 %v12190_v12  ;;  %4188 = vmatpush1.bf16.msra.mxu1 %v12193_v13 }
 0x2c3   : > { %3861 = vmatprep.subr.bf16.mxu0 %v12198_v14  ;;  %4189 = vmatprep.subr.bf16.mxu1 %v12201_v15 }
 0x2c6   : > { %3862 = vmatpush1.bf16.msra.mxu0 %v12196_v16  ;;  %4190 = vmatpush1.bf16.msra.mxu1 %v12199_v17 }
 0x2c7   : > { %3863 = vmatprep.subr.bf16.mxu0 %v12204_v18  ;;  %4191 = vmatprep.subr.bf16.mxu1 %v12207_v19 }
 0x2ca   : > { %3864 = vmatpush1.bf16.msra.mxu0 %v12202_v20  ;;  %4192 = vmatpush1.bf16.msra.mxu1 %v12205_v21 }
 0x2cb   : > { %3865 = vmatprep.subr.bf16.mxu0 %v12210_v22  ;;  %4193 = vmatprep.subr.bf16.mxu1 %v12213_v23 }
 0x2ce   : > { %3866 = vmatpush1.bf16.msra.mxu0 %v12208_v24  ;;  %4194 = vmatpush1.bf16.msra.mxu1 %v12211_v25 }
 0x2cf   : > { %3867 = vmatprep.subr.bf16.mxu0 %v12216_v26  ;;  %4195 = vmatprep.subr.bf16.mxu1 %v12219_v27 }
 0x2d2   : > { %3868 = vmatpush1.bf16.msra.mxu0 %v12214_v28  ;;  %4196 = vmatpush1.bf16.msra.mxu1 %v12217_v29 }
 0x2d5   : > { %3870 = vmatmul.mubr.bf16.vlgmr.msra.gmra.mrb[0].mxu0 %v454_v31  ;;  %4198 = vmatmul.mubr.bf16.vlgmr.msra.gmra.mrb[0].mxu1 %v454_v31 }
 0x3a8   : > { %v3871_v43 = vpop.f32.mrb[0].mxu0  ;;  %v4199_v44 = vpop.f32.mrb[0].mxu1 }
 0x3a9   : > { %v11186_v45 = vadd.f32 %v3871_v43, %v973_v39  ;;  %v11188_v46 = vadd.f32 %v4199_v44, %v981_v40  ;;  %v3873_v47 = vpop.f32.mrb[1].mxu0  ;;  %v4201_v48 = vpop.f32.mrb[1].mxu1 }
 0x3aa   : > { %v11187_v49 = vadd.f32 %v3873_v47, %v977_v41  ;;  %v11189_v50 = vadd.f32 %v4201_v48, %v985_v42  ;;  %v3875_v51 = vpop.f32.mrb[2].mxu0  ;;  %v4203_v52 = vpop.f32.mrb[2].mxu1 }
 0x3ab   : > { %4206 = vst [vmem:[%s13840_s15] sm:$0xff] %v11186_v45  ;;  %v4210_v53 = vmax.f32 %v11186_v45, 0.0  ;;  %4208 = vst [vmem:[%s13840_s15 + $0x10] sm:$0xff] %v11188_v46  ;;  %v4212_v54 = vmax.f32 %v11188_v46, 0.0  ;;  %v3876_v55 = vpop.f32.mrb[3].mxu0  ;;  %v4204_v56 = vpop.f32.mrb[3].mxu1 }
 0x3ac   : > { %4207 = vst [vmem:[%s13840_s15 + $0x8] sm:$0xff] %v11187_v49  ;;  %v4211_v57 = vmax.f32 %v11187_v49, 0.0  ;;  %4209 = vst [vmem:[%s13840_s15 + $0x18] sm:$0xff] %v11189_v50  ;;  %v4213_v58 = vmax.f32 %v11189_v50, 0.0 }
 0x3ae   : > { %v11000_v59 = vpack.c.bf16 %v4211_v57, %v4210_v53  ;;  %v11001_v60 = vpack.c.bf16 %v4213_v58, %v4212_v54 }
 0x3b0   : > { %4233 = vst [vmem:[%s4232_s16] sm:$0xff] %v11000_v59  ;;  %4234 = vst [vmem:[%s4232_s16 + $0x8] sm:$0xff] %v11001_v60 }
 0x3b1 PF: > { %p4236_p4 = scmp.lt.s32.totalorder %s13579_s11, 8 }
 0x3b3   : > { %p4237_p6 = pnand %p9782_p1, %p4236_p4 }
 0x3b4   : > { %v12220_v61 = vld [vmem:[%s13823_s6 + $0x4] ss:$16 sps:$4 sm:$0xff] (!%p4237_p6)   ;;  %v12222_v62 = vld [vmem:[%s13823_s6 + $0xc] ss:$16 sps:$4 sm:$0xff] (!%p4237_p6)   ;;  %v12224_v63 = vld [vmem:[%s13823_s6] ss:$16 sps:$4 sm:$0xff] (!%p4237_p6)  }
 0x3b5   : > { %4240 = sbr.rel (%p4237_p6) target bundleno = 1681 (0x691), region = 68  ;;  %5026 = vmatprep.subr.bf16.mxu0 (!%p4237_p6), %v12220_v61  ;;  %v12225_v0 = vld [vmem:[%s13823_s6 + $0x8] ss:$16 sps:$4 sm:$0xff] (!%p4237_p6)   ;;  %5108 = vmatprep.subr.bf16.mxu1 (!%p4237_p6), %v12222_v62  ;;  %v12226_v1 = vld [vmem:[%s13823_s6 + $0x24] ss:$16 sps:$4 sm:$0xff] (!%p4237_p6)   ;;  %s10827_s18 = sadd.s32 (!%p4237_p6), 4294967292, %s13579_s11 }
 0x3b6   : > { %5027 = vmatpush1.bf16.msra.mxu0 (!%p4237_p6), %v12224_v63  ;;  %5109 = vmatpush1.bf16.msra.mxu1 (!%p4237_p6), %v12225_v0  ;;  %v12228_v2 = vld [vmem:[%s13823_s6 + $0x2c] ss:$16 sps:$4 sm:$0xff] (!%p4237_p6)   ;;  %v12230_v3 = vld [vmem:[%s13823_s6 + $0x20] ss:$16 sps:$4 sm:$0xff] (!%p4237_p6)   ;;  %v12231_v4 = vld [vmem:[%s13823_s6 + $0x28] ss:$16 sps:$4 sm:$0xff] (!%p4237_p6)  }
 0x3b7   : > { %5028 = vmatprep.subr.bf16.mxu0 (!%p4237_p6), %v12226_v1  ;;  %5110 = vmatprep.subr.bf16.mxu1 (!%p4237_p6), %v12228_v2  ;;  %v12232_v5 = vld [vmem:[%s13823_s6 + $0x44] ss:$16 sps:$4 sm:$0xff] (!%p4237_p6)   ;;  %v12234_v6 = vld [vmem:[%s13823_s6 + $0x4c] ss:$16 sps:$4 sm:$0xff] (!%p4237_p6)   ;;  %v12236_v7 = vld [vmem:[%s13823_s6 + $0x40] ss:$16 sps:$4 sm:$0xff] (!%p4237_p6)  }
 0x3b8   : > { %v12237_v8 = vld [vmem:[%s13823_s6 + $0x48] ss:$16 sps:$4 sm:$0xff] (!%p4237_p6)   ;;  %v12238_v9 = vld [vmem:[%s13823_s6 + $0x64] ss:$16 sps:$4 sm:$0xff] (!%p4237_p6)   ;;  %v12240_v10 = vld [vmem:[%s13823_s6 + $0x6c] ss:$16 sps:$4 sm:$0xff] (!%p4237_p6)  }
 0x3b9   : > { %v12242_v11 = vld [vmem:[%s13823_s6 + $0x60] ss:$16 sps:$4 sm:$0xff] (!%p4237_p6)   ;;  %v12243_v12 = vld [vmem:[%s13823_s6 + $0x68] ss:$16 sps:$4 sm:$0xff] (!%p4237_p6)   ;;  %v12244_v13 = vld [vmem:[%s13823_s6 + $0x84] ss:$16 sps:$4 sm:$0xff] (!%p4237_p6)  }
 0x3ba   : > { %5029 = vmatpush1.bf16.msra.mxu0 (!%p4237_p6), %v12230_v3  ;;  %5111 = vmatpush1.bf16.msra.mxu1 (!%p4237_p6), %v12231_v4  ;;  %v12246_v14 = vld [vmem:[%s13823_s6 + $0x8c] ss:$16 sps:$4 sm:$0xff] (!%p4237_p6)   ;;  %v12248_v15 = vld [vmem:[%s13823_s6 + $0x80] ss:$16 sps:$4 sm:$0xff] (!%p4237_p6)   ;;  %v12249_v16 = vld [vmem:[%s13823_s6 + $0x88] ss:$16 sps:$4 sm:$0xff] (!%p4237_p6)  }
 0x3bb   : > { %5030 = vmatprep.subr.bf16.mxu0 (!%p4237_p6), %v12232_v5  ;;  %5112 = vmatprep.subr.bf16.mxu1 (!%p4237_p6), %v12234_v6  ;;  %v12250_v17 = vld [vmem:[%s13823_s6 + $0xa4] ss:$16 sps:$4 sm:$0xff] (!%p4237_p6)   ;;  %v12252_v18 = vld [vmem:[%s13823_s6 + $0xac] ss:$16 sps:$4 sm:$0xff] (!%p4237_p6)   ;;  %v12254_v19 = vld [vmem:[%s13823_s6 + $0xa0] ss:$16 sps:$4 sm:$0xff] (!%p4237_p6)  }
 0x3bc   : > { %v12255_v20 = vld [vmem:[%s13823_s6 + $0xa8] ss:$16 sps:$4 sm:$0xff]   ;;  %v12256_v21 = vld [vmem:[%s13823_s6 + $0xc4] ss:$16 sps:$4 sm:$0xff]   ;;  %v12258_v22 = vld [vmem:[%s13823_s6 + $0xcc] ss:$16 sps:$4 sm:$0xff]  }
 0x3bd   : > { %v12260_v23 = vld [vmem:[%s13823_s6 + $0xc0] ss:$16 sps:$4 sm:$0xff]   ;;  %v12261_v24 = vld [vmem:[%s13823_s6 + $0xc8] ss:$16 sps:$4 sm:$0xff]   ;;  %v12262_v25 = vld [vmem:[%s13823_s6 + $0xe4] ss:$16 sps:$4 sm:$0xff]  }
 0x3be   : > { %5031 = vmatpush1.bf16.msra.mxu0 %v12236_v7  ;;  %5113 = vmatpush1.bf16.msra.mxu1 %v12237_v8  ;;  %v12264_v26 = vld [vmem:[%s13823_s6 + $0xec] ss:$16 sps:$4 sm:$0xff]   ;;  %v12266_v27 = vld [vmem:[%s13823_s6 + $0xe0] ss:$16 sps:$4 sm:$0xff]   ;;  %v12267_v28 = vld [vmem:[%s13823_s6 + $0xe8] ss:$16 sps:$4 sm:$0xff]  }
 0x3bf   : > { %5032 = vmatprep.subr.bf16.mxu0 %v12238_v9  ;;  %5114 = vmatprep.subr.bf16.mxu1 %v12240_v10  ;;  %v12268_v29 = vld [vmem:[%s13823_s6 + $0x104] ss:$16 sps:$4 sm:$0xff]   ;;  %v12270_v30 = vld [vmem:[%s13823_s6 + $0x10c] ss:$16 sps:$4 sm:$0xff]   ;;  %v12272_v31 = vld [vmem:[%s13823_s6 + $0x100] ss:$16 sps:$4 sm:$0xff]  }
 0x3c0   : > { %v12273_v32 = vld [vmem:[%s13823_s6 + $0x108] ss:$16 sps:$4 sm:$0xff]   ;;  %v12274_v33 = vld [vmem:[%s13823_s6 + $0x124] ss:$16 sps:$4 sm:$0xff]   ;;  %v12276_v34 = vld [vmem:[%s13823_s6 + $0x12c] ss:$16 sps:$4 sm:$0xff]  }
 0x3c1   : > { %v12278_v35 = vld [vmem:[%s13823_s6 + $0x120] ss:$16 sps:$4 sm:$0xff]   ;;  %v12279_v36 = vld [vmem:[%s13823_s6 + $0x128] ss:$16 sps:$4 sm:$0xff]   ;;  %v12280_v37 = vld [vmem:[%s13823_s6 + $0x144] ss:$16 sps:$4 sm:$0xff]  }
 0x3c2   : > { %5033 = vmatpush1.bf16.msra.mxu0 %v12242_v11  ;;  %5115 = vmatpush1.bf16.msra.mxu1 %v12243_v12  ;;  %v12282_v38 = vld [vmem:[%s13823_s6 + $0x14c] ss:$16 sps:$4 sm:$0xff]   ;;  %v12284_v39 = vld [vmem:[%s13823_s6 + $0x140] ss:$16 sps:$4 sm:$0xff]   ;;  %v12285_v40 = vld [vmem:[%s13823_s6 + $0x148] ss:$16 sps:$4 sm:$0xff]  }
 0x3c3   : > { %5034 = vmatprep.subr.bf16.mxu0 %v12244_v13  ;;  %5116 = vmatprep.subr.bf16.mxu1 %v12246_v14  ;;  %v12286_v41 = vld [vmem:[%s13823_s6 + $0x164] ss:$16 sps:$4 sm:$0xff]   ;;  %v12288_v42 = vld [vmem:[%s13823_s6 + $0x16c] ss:$16 sps:$4 sm:$0xff]   ;;  %v12290_v44 = vld [vmem:[%s13823_s6 + $0x160] ss:$16 sps:$4 sm:$0xff]  }
 0x3c4   : > { %v4242_v43 = vld [vmem:[#allocation2] sm:$0xff]  ;;  %v12291_v46 = vld [vmem:[%s13823_s6 + $0x168] ss:$16 sps:$4 sm:$0xff]   ;;  %v12294_v48 = vld [vmem:[%s13823_s6 + $0x18c] ss:$16 sps:$4 sm:$0xff]   ;;  %s11005_s29 = sshll.u32 %s10827_s18, 4 }
 0x3c5   : > { %v10300_v45 = vcombine.high %v4242_v43, %v4242_v43  ;;  %v12292_v47 = vld [vmem:[%s13823_s6 + $0x184] ss:$16 sps:$4 sm:$0xff]   ;;  %v12296_v49 = vld [vmem:[%s13823_s6 + $0x180] ss:$16 sps:$4 sm:$0xff]   ;;  %v12297_v50 = vld [vmem:[%s13823_s6 + $0x188] ss:$16 sps:$4 sm:$0xff]   ;;  %v10299_v1 = vcombine.low %v4242_v43, %v4242_v43 }
 0x3c6   : > { %5035 = vmatpush1.bf16.msra.mxu0 %v12248_v15  ;;  %5117 = vmatpush1.bf16.msra.mxu1 %v12249_v16  ;;  %v12298_v51 = vld [vmem:[%s13823_s6 + $0x1a4] ss:$16 sps:$4 sm:$0xff]   ;;  %v12300_v52 = vld [vmem:[%s13823_s6 + $0x1ac] ss:$16 sps:$4 sm:$0xff]   ;;  %v12302_v53 = vld [vmem:[%s13823_s6 + $0x1a0] ss:$16 sps:$4 sm:$0xff]  }
 0x3c7   : > { %5036 = vmatprep.subr.bf16.mxu0 %v12250_v17  ;;  %5118 = vmatprep.subr.bf16.mxu1 %v12252_v18  ;;  %v12303_v54 = vld [vmem:[%s13823_s6 + $0x1a8] ss:$16 sps:$4 sm:$0xff]   ;;  %v12304_v55 = vld [vmem:[%s13823_s6 + $0x1c4] ss:$16 sps:$4 sm:$0xff]   ;;  %v12306_v56 = vld [vmem:[%s13823_s6 + $0x1cc] ss:$16 sps:$4 sm:$0xff]  }
 0x3c8   : > { %5058 = vmatprep.mubr.bf16.mxu0 %v10300_v45  ;;  %5140 = vmatprep.mubr.bf16.mxu1 %v10300_v45  ;;  %v12308_v57 = vld [vmem:[%s13823_s6 + $0x1c0] ss:$16 sps:$4 sm:$0xff]   ;;  %v12309_v58 = vld [vmem:[%s13823_s6 + $0x1c8] ss:$16 sps:$4 sm:$0xff]   ;;  %v12310_v59 = vld [vmem:[%s13823_s6 + $0x1e4] ss:$16 sps:$4 sm:$0xff]  }
 0x3c9   : > { %v12312_v60 = vld [vmem:[%s13823_s6 + $0x1ec] ss:$16 sps:$4 sm:$0xff]   ;;  %v12314_v61 = vld [vmem:[%s13823_s6 + $0x1e0] ss:$16 sps:$4 sm:$0xff]   ;;  %v12315_v62 = vld [vmem:[%s13823_s6 + $0x1e8] ss:$16 sps:$4 sm:$0xff]  }
 0x3ca   : > { %5037 = vmatpush1.bf16.msra.mxu0 %v12254_v19  ;;  %5119 = vmatpush1.bf16.msra.mxu1 %v12255_v20  ;;  %v12320_v63 = vld [vmem:[%s13823_s6 + $0x204] ss:$16 sps:$4 sm:$0xff]   ;;  %v12323_v0 = vld [vmem:[%s13823_s6 + $0x20c] ss:$16 sps:$4 sm:$0xff]   ;;  %v12318_v2 = vld [vmem:[%s13823_s6 + $0x200] ss:$16 sps:$4 sm:$0xff]  }
 0x3cb   : > { %5038 = vmatprep.subr.bf16.mxu0 %v12256_v21  ;;  %5120 = vmatprep.subr.bf16.mxu1 %v12258_v22  ;;  %v12321_v3 = vld [vmem:[%s13823_s6 + $0x208] ss:$16 sps:$4 sm:$0xff]   ;;  %v12326_v4 = vld [vmem:[%s13823_s6 + $0x224] ss:$16 sps:$4 sm:$0xff]   ;;  %v12329_v5 = vld [vmem:[%s13823_s6 + $0x22c] ss:$16 sps:$4 sm:$0xff]  }
 0x3cc   : > { %v12324_v6 = vld [vmem:[%s13823_s6 + $0x220] ss:$16 sps:$4 sm:$0xff]   ;;  %v12327_v7 = vld [vmem:[%s13823_s6 + $0x228] ss:$16 sps:$4 sm:$0xff]   ;;  %v12332_v8 = vld [vmem:[%s13823_s6 + $0x244] ss:$16 sps:$4 sm:$0xff]  }
 0x3cd   : > { %v12335_v9 = vld [vmem:[%s13823_s6 + $0x24c] ss:$16 sps:$4 sm:$0xff]   ;;  %v12330_v10 = vld [vmem:[%s13823_s6 + $0x240] ss:$16 sps:$4 sm:$0xff]   ;;  %v12333_v11 = vld [vmem:[%s13823_s6 + $0x248] ss:$16 sps:$4 sm:$0xff]  }
 0x3ce   : > { %5039 = vmatpush1.bf16.msra.mxu0 %v12260_v23  ;;  %5121 = vmatpush1.bf16.msra.mxu1 %v12261_v24  ;;  %v12338_v12 = vld [vmem:[%s13823_s6 + $0x264] ss:$16 sps:$4 sm:$0xff]   ;;  %v12341_v13 = vld [vmem:[%s13823_s6 + $0x26c] ss:$16 sps:$4 sm:$0xff]   ;;  %v12336_v14 = vld [vmem:[%s13823_s6 + $0x260] ss:$16 sps:$4 sm:$0xff]  }
 0x3cf   : > { %5040 = vmatprep.subr.bf16.mxu0 %v12262_v25  ;;  %5122 = vmatprep.subr.bf16.mxu1 %v12264_v26  ;;  %v12339_v15 = vld [vmem:[%s13823_s6 + $0x268] ss:$16 sps:$4 sm:$0xff]   ;;  %v12344_v16 = vld [vmem:[%s13823_s6 + $0x284] ss:$16 sps:$4 sm:$0xff]   ;;  %v12347_v17 = vld [vmem:[%s13823_s6 + $0x28c] ss:$16 sps:$4 sm:$0xff]  }
 0x3d0   : > { %v12342_v18 = vld [vmem:[%s13823_s6 + $0x280] ss:$16 sps:$4 sm:$0xff]   ;;  %v12345_v19 = vld [vmem:[%s13823_s6 + $0x288] ss:$16 sps:$4 sm:$0xff]   ;;  %v12350_v20 = vld [vmem:[%s13823_s6 + $0x2a4] ss:$16 sps:$4 sm:$0xff]  }
 0x3d1   : > { %v12353_v21 = vld [vmem:[%s13823_s6 + $0x2ac] ss:$16 sps:$4 sm:$0xff]   ;;  %v12348_v22 = vld [vmem:[%s13823_s6 + $0x2a0] ss:$16 sps:$4 sm:$0xff]   ;;  %v12351_v23 = vld [vmem:[%s13823_s6 + $0x2a8] ss:$16 sps:$4 sm:$0xff]  }
 0x3d2   : > { %5041 = vmatpush1.bf16.msra.mxu0 %v12266_v27  ;;  %5123 = vmatpush1.bf16.msra.mxu1 %v12267_v28  ;;  %v12356_v24 = vld [vmem:[%s13823_s6 + $0x2c4] ss:$16 sps:$4 sm:$0xff]   ;;  %v12359_v25 = vld [vmem:[%s13823_s6 + $0x2cc] ss:$16 sps:$4 sm:$0xff]   ;;  %v12354_v28 = vld [vmem:[%s13823_s6 + $0x2c0] ss:$16 sps:$4 sm:$0xff]  }
 0x3d3   : > { %5042 = vmatprep.subr.bf16.mxu0 %v12268_v29  ;;  %5124 = vmatprep.subr.bf16.mxu1 %v12270_v30  ;;  %v14459_v26 = vld [vmem:[#allocation2 + $0x8] sm:$0xff]  ;;  %v12362_v30 = vld [vmem:[%s13823_s6 + $0x2e4] ss:$16 sps:$4 sm:$0xff]   ;;  %s8101_s26 = scalar_lea.vmem [#allocation3], %s11005_s29 }
 0x3d4   : > { %v10302_v27 = vcombine.high %v14459_v26, %v14459_v26  ;;  %v12357_v29 = vld [vmem:[%s13823_s6 + $0x2c8] ss:$16 sps:$4 sm:$0xff]   ;;  %v12383_v43 = vld [vmem:[%s13823_s6 + $0x34c] ss:$16 sps:$4 sm:$0xff]  }
 0x3d5   : > { %v12381_v45 = vld [vmem:[%s13823_s6 + $0x348] ss:$16 sps:$4 sm:$0xff]  }
 0x3d6   : > { %5043 = vmatpush1.bf16.msra.mxu0 %v12272_v31  ;;  %5125 = vmatpush1.bf16.msra.mxu1 %v12273_v32  ;;  %v12365_v31 = vld [vmem:[%s13823_s6 + $0x2ec] ss:$16 sps:$4 sm:$0xff]   ;;  %v12360_v32 = vld [vmem:[%s13823_s6 + $0x2e0] ss:$16 sps:$4 sm:$0xff]  }
 0x3d7   : > { %5044 = vmatprep.subr.bf16.mxu0 %v12274_v33  ;;  %5126 = vmatprep.subr.bf16.mxu1 %v12276_v34  ;;  %v12363_v33 = vld [vmem:[%s13823_s6 + $0x2e8] ss:$16 sps:$4 sm:$0xff]   ;;  %v12368_v34 = vld [vmem:[%s13823_s6 + $0x304] ss:$16 sps:$4 sm:$0xff]  }
 0x3da   : > { %5045 = vmatpush1.bf16.msra.mxu0 %v12278_v35  ;;  %5127 = vmatpush1.bf16.msra.mxu1 %v12279_v36  ;;  %v12371_v35 = vld [vmem:[%s13823_s6 + $0x30c] ss:$16 sps:$4 sm:$0xff]   ;;  %v12366_v36 = vld [vmem:[%s13823_s6 + $0x300] ss:$16 sps:$4 sm:$0xff]  }
 0x3db   : > { %5046 = vmatprep.subr.bf16.mxu0 %v12280_v37  ;;  %5128 = vmatprep.subr.bf16.mxu1 %v12282_v38  ;;  %v12369_v37 = vld [vmem:[%s13823_s6 + $0x308] ss:$16 sps:$4 sm:$0xff]   ;;  %v12374_v38 = vld [vmem:[%s13823_s6 + $0x324] ss:$16 sps:$4 sm:$0xff]  }
 0x3de   : > { %5047 = vmatpush1.bf16.msra.mxu0 %v12284_v39  ;;  %5129 = vmatpush1.bf16.msra.mxu1 %v12285_v40  ;;  %v12377_v39 = vld [vmem:[%s13823_s6 + $0x32c] ss:$16 sps:$4 sm:$0xff]   ;;  %v12372_v40 = vld [vmem:[%s13823_s6 + $0x320] ss:$16 sps:$4 sm:$0xff]  }
 0x3df   : > { %5048 = vmatprep.subr.bf16.mxu0 %v12286_v41  ;;  %5130 = vmatprep.subr.bf16.mxu1 %v12288_v42  ;;  %v12375_v41 = vld [vmem:[%s13823_s6 + $0x328] ss:$16 sps:$4 sm:$0xff]   ;;  %v12380_v42 = vld [vmem:[%s13823_s6 + $0x344] ss:$16 sps:$4 sm:$0xff]  }
 0x3e2   : > { %5049 = vmatpush1.bf16.msra.mxu0 %v12290_v44  ;;  %5131 = vmatpush1.bf16.msra.mxu1 %v12291_v46  ;;  %v12378_v44 = vld [vmem:[%s13823_s6 + $0x340] ss:$16 sps:$4 sm:$0xff]   ;;  %v12386_v46 = vld [vmem:[%s13823_s6 + $0x364] ss:$16 sps:$4 sm:$0xff]  }
 0x3e3   : > { %5050 = vmatprep.subr.bf16.mxu0 %v12292_v47  ;;  %5132 = vmatprep.subr.bf16.mxu1 %v12294_v48  ;;  %v12389_v47 = vld [vmem:[%s13823_s6 + $0x36c] ss:$16 sps:$4 sm:$0xff]   ;;  %v12384_v48 = vld [vmem:[%s13823_s6 + $0x360] ss:$16 sps:$4 sm:$0xff]  }
 0x3e6   : > { %5051 = vmatpush1.bf16.msra.mxu0 %v12296_v49  ;;  %5133 = vmatpush1.bf16.msra.mxu1 %v12297_v50  ;;  %v12387_v49 = vld [vmem:[%s13823_s6 + $0x368] ss:$16 sps:$4 sm:$0xff]   ;;  %v12392_v50 = vld [vmem:[%s13823_s6 + $0x384] ss:$16 sps:$4 sm:$0xff]  }
 0x3e7   : > { %5052 = vmatprep.subr.bf16.mxu0 %v12298_v51  ;;  %5134 = vmatprep.subr.bf16.mxu1 %v12300_v52  ;;  %v12395_v51 = vld [vmem:[%s13823_s6 + $0x38c] ss:$16 sps:$4 sm:$0xff]   ;;  %v12390_v52 = vld [vmem:[%s13823_s6 + $0x380] ss:$16 sps:$4 sm:$0xff]  }
 0x3ea   : > { %5053 = vmatpush1.bf16.msra.mxu0 %v12302_v53  ;;  %5135 = vmatpush1.bf16.msra.mxu1 %v12303_v54  ;;  %v12393_v53 = vld [vmem:[%s13823_s6 + $0x388] ss:$16 sps:$4 sm:$0xff]   ;;  %v12398_v54 = vld [vmem:[%s13823_s6 + $0x3a4] ss:$16 sps:$4 sm:$0xff]  }
 0x3eb   : > { %5054 = vmatprep.subr.bf16.mxu0 %v12304_v55  ;;  %5136 = vmatprep.subr.bf16.mxu1 %v12306_v56  ;;  %v12401_v55 = vld [vmem:[%s13823_s6 + $0x3ac] ss:$16 sps:$4 sm:$0xff]   ;;  %v12396_v56 = vld [vmem:[%s13823_s6 + $0x3a0] ss:$16 sps:$4 sm:$0xff]  }
 0x3ee   : > { %5055 = vmatpush1.bf16.msra.mxu0 %v12308_v57  ;;  %5137 = vmatpush1.bf16.msra.mxu1 %v12309_v58  ;;  %v12399_v57 = vld [vmem:[%s13823_s6 + $0x3a8] ss:$16 sps:$4 sm:$0xff]   ;;  %v12404_v58 = vld [vmem:[%s13823_s6 + $0x3c4] ss:$16 sps:$4 sm:$0xff]  }
 0x3ef   : > { %5056 = vmatprep.subr.bf16.mxu0 %v12310_v59  ;;  %5138 = vmatprep.subr.bf16.mxu1 %v12312_v60  ;;  %v12407_v59 = vld [vmem:[%s13823_s6 + $0x3cc] ss:$16 sps:$4 sm:$0xff]   ;;  %v12402_v60 = vld [vmem:[%s13823_s6 + $0x3c0] ss:$16 sps:$4 sm:$0xff]  }
 0x3f2   : > { %5057 = vmatpush1.bf16.msra.mxu0 %v12314_v61  ;;  %5139 = vmatpush1.bf16.msra.mxu1 %v12315_v62  ;;  %v12405_v61 = vld [vmem:[%s13823_s6 + $0x3c8] ss:$16 sps:$4 sm:$0xff]   ;;  %v12410_v62 = vld [vmem:[%s13823_s6 + $0x3e4] ss:$16 sps:$4 sm:$0xff]  }
 0x3f3   : > { %5067 = vmatprep.subr.bf16.mxu0 %v12320_v63  ;;  %5149 = vmatprep.subr.bf16.mxu1 %v12323_v0  ;;  %v12413_v63 = vld [vmem:[%s13823_s6 + $0x3ec] ss:$16 sps:$4 sm:$0xff]   ;;  %v12408_v0 = vld [vmem:[%s13823_s6 + $0x3e0] ss:$16 sps:$4 sm:$0xff]  }
 0x3f5   : > { %5059 = vmatmul.mubr.bf16.vlgmr.msra.gmra.mrb[0].mxu0 %v10299_v1  ;;  %5141 = vmatmul.mubr.bf16.vlgmr.msra.gmra.mrb[0].mxu1 %v10299_v1  ;;  %v12411_v1 = vld [vmem:[%s13823_s6 + $0x3e8] ss:$16 sps:$4 sm:$0xff]  }
 0x3f6   : > { %5068 = vmatpush1.bf16.msra.mxu0 %v12318_v2  ;;  %5150 = vmatpush1.bf16.msra.mxu1 %v12321_v3  ;;  %v12418_v2 = vld [vmem:[%s13823_s6 + $0x404] ss:$16 sps:$4 sm:$0xff]   ;;  %v12421_v3 = vld [vmem:[%s13823_s6 + $0x40c] ss:$16 sps:$4 sm:$0xff]  }
 0x3f7   : > { %5069 = vmatprep.subr.bf16.mxu0 %v12326_v4  ;;  %5151 = vmatprep.subr.bf16.mxu1 %v12329_v5  ;;  %v10301_v4 = vcombine.low %v14459_v26, %v14459_v26  ;;  %v12416_v5 = vld [vmem:[%s13823_s6 + $0x400] ss:$16 sps:$4 sm:$0xff]   ;;  %v12451_v26 = vld [vmem:[%s13823_s6 + $0x4ac] ss:$16 sps:$4 sm:$0xff]  }
 0x3f8   : > { %5099 = vmatprep.mubr.bf16.mxu0 %v10302_v27  ;;  %5181 = vmatprep.mubr.bf16.mxu1 %v10302_v27  ;;  %v12446_v27 = vld [vmem:[%s13823_s6 + $0x4a0] ss:$16 sps:$4 sm:$0xff]  }
 0x3fa   : > { %5070 = vmatpush1.bf16.msra.mxu0 %v12324_v6  ;;  %5152 = vmatpush1.bf16.msra.mxu1 %v12327_v7  ;;  %v12419_v6 = vld [vmem:[%s13823_s6 + $0x408] ss:$16 sps:$4 sm:$0xff]   ;;  %v12424_v7 = vld [vmem:[%s13823_s6 + $0x424] ss:$16 sps:$4 sm:$0xff]  }
 0x3fb   : > { %5071 = vmatprep.subr.bf16.mxu0 %v12332_v8  ;;  %5153 = vmatprep.subr.bf16.mxu1 %v12335_v9  ;;  %v14508_v8 = vld [vmem:[#allocation2 + $0x10] sm:$0xff]  ;;  %v12427_v9 = vld [vmem:[%s13823_s6 + $0x42c] ss:$16 sps:$4 sm:$0xff]  }
 0x3fe   : > { %5072 = vmatpush1.bf16.msra.mxu0 %v12330_v10  ;;  %5154 = vmatpush1.bf16.msra.mxu1 %v12333_v11  ;;  %v10432_v10 = vcombine.high %v14508_v8, %v14508_v8  ;;  %v12422_v11 = vld [vmem:[%s13823_s6 + $0x420] ss:$16 sps:$4 sm:$0xff]  }
 0x3ff   : > { %5073 = vmatprep.subr.bf16.mxu0 %v12338_v12  ;;  %5155 = vmatprep.subr.bf16.mxu1 %v12341_v13  ;;  %v12425_v12 = vld [vmem:[%s13823_s6 + $0x428] ss:$16 sps:$4 sm:$0xff]   ;;  %v12430_v13 = vld [vmem:[%s13823_s6 + $0x444] ss:$16 sps:$4 sm:$0xff]  }
 0x402   : > { %5074 = vmatpush1.bf16.msra.mxu0 %v12336_v14  ;;  %5156 = vmatpush1.bf16.msra.mxu1 %v12339_v15  ;;  %v12433_v14 = vld [vmem:[%s13823_s6 + $0x44c] ss:$16 sps:$4 sm:$0xff]   ;;  %v12428_v15 = vld [vmem:[%s13823_s6 + $0x440] ss:$16 sps:$4 sm:$0xff]  }
 0x403   : > { %5075 = vmatprep.subr.bf16.mxu0 %v12344_v16  ;;  %5157 = vmatprep.subr.bf16.mxu1 %v12347_v17  ;;  %v12431_v16 = vld [vmem:[%s13823_s6 + $0x448] ss:$16 sps:$4 sm:$0xff]   ;;  %v12436_v17 = vld [vmem:[%s13823_s6 + $0x464] ss:$16 sps:$4 sm:$0xff]  }
 0x406   : > { %5076 = vmatpush1.bf16.msra.mxu0 %v12342_v18  ;;  %5158 = vmatpush1.bf16.msra.mxu1 %v12345_v19  ;;  %v12439_v18 = vld [vmem:[%s13823_s6 + $0x46c] ss:$16 sps:$4 sm:$0xff]   ;;  %v12434_v19 = vld [vmem:[%s13823_s6 + $0x460] ss:$16 sps:$4 sm:$0xff]  }
 0x407   : > { %5077 = vmatprep.subr.bf16.mxu0 %v12350_v20  ;;  %5159 = vmatprep.subr.bf16.mxu1 %v12353_v21  ;;  %v12437_v20 = vld [vmem:[%s13823_s6 + $0x468] ss:$16 sps:$4 sm:$0xff]   ;;  %v12442_v21 = vld [vmem:[%s13823_s6 + $0x484] ss:$16 sps:$4 sm:$0xff]  }
 0x40a   : > { %5078 = vmatpush1.bf16.msra.mxu0 %v12348_v22  ;;  %5160 = vmatpush1.bf16.msra.mxu1 %v12351_v23  ;;  %v12445_v22 = vld [vmem:[%s13823_s6 + $0x48c] ss:$16 sps:$4 sm:$0xff]   ;;  %v12440_v23 = vld [vmem:[%s13823_s6 + $0x480] ss:$16 sps:$4 sm:$0xff]  }
 0x40b   : > { %5079 = vmatprep.subr.bf16.mxu0 %v12356_v24  ;;  %5161 = vmatprep.subr.bf16.mxu1 %v12359_v25  ;;  %v12443_v24 = vld [vmem:[%s13823_s6 + $0x488] ss:$16 sps:$4 sm:$0xff]   ;;  %v12448_v25 = vld [vmem:[%s13823_s6 + $0x4a4] ss:$16 sps:$4 sm:$0xff]  }
 0x40e   : > { %5080 = vmatpush1.bf16.msra.mxu0 %v12354_v28  ;;  %5162 = vmatpush1.bf16.msra.mxu1 %v12357_v29  ;;  %v12449_v28 = vld [vmem:[%s13823_s6 + $0x4a8] ss:$16 sps:$4 sm:$0xff]   ;;  %v12454_v29 = vld [vmem:[%s13823_s6 + $0x4c4] ss:$16 sps:$4 sm:$0xff]  }
 0x40f   : > { %5081 = vmatprep.subr.bf16.mxu0 %v12362_v30  ;;  %5163 = vmatprep.subr.bf16.mxu1 %v12365_v31  ;;  %v12457_v30 = vld [vmem:[%s13823_s6 + $0x4cc] ss:$16 sps:$4 sm:$0xff]   ;;  %v12452_v31 = vld [vmem:[%s13823_s6 + $0x4c0] ss:$16 sps:$4 sm:$0xff]  }
 0x412   : > { %5082 = vmatpush1.bf16.msra.mxu0 %v12360_v32  ;;  %5164 = vmatpush1.bf16.msra.mxu1 %v12363_v33  ;;  %v12455_v32 = vld [vmem:[%s13823_s6 + $0x4c8] ss:$16 sps:$4 sm:$0xff]   ;;  %v12460_v33 = vld [vmem:[%s13823_s6 + $0x4e4] ss:$16 sps:$4 sm:$0xff]  }
 0x413   : > { %5083 = vmatprep.subr.bf16.mxu0 %v12368_v34  ;;  %5165 = vmatprep.subr.bf16.mxu1 %v12371_v35  ;;  %v12463_v34 = vld [vmem:[%s13823_s6 + $0x4ec] ss:$16 sps:$4 sm:$0xff]   ;;  %v12458_v35 = vld [vmem:[%s13823_s6 + $0x4e0] ss:$16 sps:$4 sm:$0xff]  }
 0x416   : > { %5084 = vmatpush1.bf16.msra.mxu0 %v12366_v36  ;;  %5166 = vmatpush1.bf16.msra.mxu1 %v12369_v37  ;;  %v12461_v36 = vld [vmem:[%s13823_s6 + $0x4e8] ss:$16 sps:$4 sm:$0xff]   ;;  %v12466_v37 = vld [vmem:[%s13823_s6 + $0x504] ss:$16 sps:$4 sm:$0xff]  }
 0x417   : > { %5085 = vmatprep.subr.bf16.mxu0 %v12374_v38  ;;  %5167 = vmatprep.subr.bf16.mxu1 %v12377_v39  ;;  %v12469_v38 = vld [vmem:[%s13823_s6 + $0x50c] ss:$16 sps:$4 sm:$0xff]   ;;  %v12464_v39 = vld [vmem:[%s13823_s6 + $0x500] ss:$16 sps:$4 sm:$0xff]  }
 0x41a   : > { %5086 = vmatpush1.bf16.msra.mxu0 %v12372_v40  ;;  %5168 = vmatpush1.bf16.msra.mxu1 %v12375_v41  ;;  %v12467_v40 = vld [vmem:[%s13823_s6 + $0x508] ss:$16 sps:$4 sm:$0xff]   ;;  %v12472_v41 = vld [vmem:[%s13823_s6 + $0x524] ss:$16 sps:$4 sm:$0xff]  }
 0x41b   : > { %5087 = vmatprep.subr.bf16.mxu0 %v12380_v42  ;;  %5169 = vmatprep.subr.bf16.mxu1 %v12383_v43  ;;  %v12475_v42 = vld [vmem:[%s13823_s6 + $0x52c] ss:$16 sps:$4 sm:$0xff]   ;;  %v12470_v43 = vld [vmem:[%s13823_s6 + $0x520] ss:$16 sps:$4 sm:$0xff]  }
 0x41e   : > { %5088 = vmatpush1.bf16.msra.mxu0 %v12378_v44  ;;  %5170 = vmatpush1.bf16.msra.mxu1 %v12381_v45  ;;  %v12473_v44 = vld [vmem:[%s13823_s6 + $0x528] ss:$16 sps:$4 sm:$0xff]   ;;  %v12478_v45 = vld [vmem:[%s13823_s6 + $0x544] ss:$16 sps:$4 sm:$0xff]  }
 0x41f   : > { %5089 = vmatprep.subr.bf16.mxu0 %v12386_v46  ;;  %5171 = vmatprep.subr.bf16.mxu1 %v12389_v47  ;;  %v12481_v46 = vld [vmem:[%s13823_s6 + $0x54c] ss:$16 sps:$4 sm:$0xff]   ;;  %v12476_v47 = vld [vmem:[%s13823_s6 + $0x540] ss:$16 sps:$4 sm:$0xff]  }
 0x422   : > { %5090 = vmatpush1.bf16.msra.mxu0 %v12384_v48  ;;  %5172 = vmatpush1.bf16.msra.mxu1 %v12387_v49  ;;  %v12479_v48 = vld [vmem:[%s13823_s6 + $0x548] ss:$16 sps:$4 sm:$0xff]   ;;  %v12484_v49 = vld [vmem:[%s13823_s6 + $0x564] ss:$16 sps:$4 sm:$0xff]  }
 0x423   : > { %5091 = vmatprep.subr.bf16.mxu0 %v12392_v50  ;;  %5173 = vmatprep.subr.bf16.mxu1 %v12395_v51  ;;  %v12487_v50 = vld [vmem:[%s13823_s6 + $0x56c] ss:$16 sps:$4 sm:$0xff]   ;;  %v12482_v51 = vld [vmem:[%s13823_s6 + $0x560] ss:$16 sps:$4 sm:$0xff]  }
 0x426   : > { %5092 = vmatpush1.bf16.msra.mxu0 %v12390_v52  ;;  %5174 = vmatpush1.bf16.msra.mxu1 %v12393_v53  ;;  %v12485_v52 = vld [vmem:[%s13823_s6 + $0x568] ss:$16 sps:$4 sm:$0xff]   ;;  %v12490_v53 = vld [vmem:[%s13823_s6 + $0x584] ss:$16 sps:$4 sm:$0xff]  }
 0x427   : > { %5093 = vmatprep.subr.bf16.mxu0 %v12398_v54  ;;  %5175 = vmatprep.subr.bf16.mxu1 %v12401_v55  ;;  %v12493_v54 = vld [vmem:[%s13823_s6 + $0x58c] ss:$16 sps:$4 sm:$0xff]   ;;  %v12488_v55 = vld [vmem:[%s13823_s6 + $0x580] ss:$16 sps:$4 sm:$0xff]  }
 0x42a   : > { %5094 = vmatpush1.bf16.msra.mxu0 %v12396_v56  ;;  %5176 = vmatpush1.bf16.msra.mxu1 %v12399_v57  ;;  %v12491_v56 = vld [vmem:[%s13823_s6 + $0x588] ss:$16 sps:$4 sm:$0xff]   ;;  %v12496_v57 = vld [vmem:[%s13823_s6 + $0x5a4] ss:$16 sps:$4 sm:$0xff]  }
 0x42b   : > { %5095 = vmatprep.subr.bf16.mxu0 %v12404_v58  ;;  %5177 = vmatprep.subr.bf16.mxu1 %v12407_v59  ;;  %v12499_v58 = vld [vmem:[%s13823_s6 + $0x5ac] ss:$16 sps:$4 sm:$0xff]   ;;  %v12494_v59 = vld [vmem:[%s13823_s6 + $0x5a0] ss:$16 sps:$4 sm:$0xff]  }
 0x42e   : > { %5096 = vmatpush1.bf16.msra.mxu0 %v12402_v60  ;;  %5178 = vmatpush1.bf16.msra.mxu1 %v12405_v61  ;;  %v12497_v60 = vld [vmem:[%s13823_s6 + $0x5a8] ss:$16 sps:$4 sm:$0xff]   ;;  %v12502_v61 = vld [vmem:[%s13823_s6 + $0x5c4] ss:$16 sps:$4 sm:$0xff]  }
 0x42f   : > { %5097 = vmatprep.subr.bf16.mxu0 %v12410_v62  ;;  %5179 = vmatprep.subr.bf16.mxu1 %v12413_v63  ;;  %v12505_v62 = vld [vmem:[%s13823_s6 + $0x5cc] ss:$16 sps:$4 sm:$0xff]   ;;  %v12500_v63 = vld [vmem:[%s13823_s6 + $0x5c0] ss:$16 sps:$4 sm:$0xff]  }
 0x432   : > { %5098 = vmatpush1.bf16.msra.mxu0 %v12408_v0  ;;  %5180 = vmatpush1.bf16.msra.mxu1 %v12411_v1  ;;  %v12503_v0 = vld [vmem:[%s13823_s6 + $0x5c8] ss:$16 sps:$4 sm:$0xff]   ;;  %v12508_v1 = vld [vmem:[%s13823_s6 + $0x5e4] ss:$16 sps:$4 sm:$0xff]  }
 0x433   : > { %6000 = vmatprep.subr.bf16.mxu0 %v12418_v2  ;;  %6082 = vmatprep.subr.bf16.mxu1 %v12421_v3  ;;  %v12511_v2 = vld [vmem:[%s13823_s6 + $0x5ec] ss:$16 sps:$4 sm:$0xff]   ;;  %v12506_v3 = vld [vmem:[%s13823_s6 + $0x5e0] ss:$16 sps:$4 sm:$0xff]  }
 0x435   : > { %5100 = vmatmul.mubr.bf16.vlgmr.msra.gmra.mrb[0].mxu0 %v10301_v4  ;;  %5182 = vmatmul.mubr.bf16.vlgmr.msra.gmra.mrb[0].mxu1 %v10301_v4  ;;  %v12509_v4 = vld [vmem:[%s13823_s6 + $0x5e8] ss:$16 sps:$4 sm:$0xff]  }
 0x436   : > { %6001 = vmatpush1.bf16.msra.mxu0 %v12416_v5  ;;  %6083 = vmatpush1.bf16.msra.mxu1 %v12419_v6  ;;  %v12516_v5 = vld [vmem:[%s13823_s6 + $0x604] ss:$16 sps:$4 sm:$0xff]   ;;  %v12519_v6 = vld [vmem:[%s13823_s6 + $0x60c] ss:$16 sps:$4 sm:$0xff]  }
 0x437   : > { %6002 = vmatprep.subr.bf16.mxu0 %v12424_v7  ;;  %6084 = vmatprep.subr.bf16.mxu1 %v12427_v9  ;;  %v12514_v7 = vld [vmem:[%s13823_s6 + $0x600] ss:$16 sps:$4 sm:$0xff]   ;;  %v10431_v9 = vcombine.low %v14508_v8, %v14508_v8 }
 0x438   : > { %6032 = vmatprep.mubr.bf16.mxu0 %v10432_v10  ;;  %6114 = vmatprep.mubr.bf16.mxu1 %v10432_v10  ;;  %v12517_v10 = vld [vmem:[%s13823_s6 + $0x608] ss:$16 sps:$4 sm:$0xff]   ;;  %v12520_v8 = vld [vmem:[%s13823_s6 + $0x620] ss:$16 sps:$4 sm:$0xff]  }
 0x43a   : > { %6003 = vmatpush1.bf16.msra.mxu0 %v12422_v11  ;;  %6085 = vmatpush1.bf16.msra.mxu1 %v12425_v12  ;;  %v14577_v11 = vld [vmem:[#allocation2 + $0x18] sm:$0xff]  ;;  %v12522_v12 = vld [vmem:[%s13823_s6 + $0x624] ss:$16 sps:$4 sm:$0xff]  }
 0x43b   : > { %6004 = vmatprep.subr.bf16.mxu0 %v12430_v13  ;;  %6086 = vmatprep.subr.bf16.mxu1 %v12433_v14  ;;  %v12525_v13 = vld [vmem:[%s13823_s6 + $0x62c] ss:$16 sps:$4 sm:$0xff]   ;;  %v10434_v14 = vcombine.high %v14577_v11, %v14577_v11 }
 0x43e   : > { %6005 = vmatpush1.bf16.msra.mxu0 %v12428_v15  ;;  %6087 = vmatpush1.bf16.msra.mxu1 %v12431_v16  ;;  %v12523_v15 = vld [vmem:[%s13823_s6 + $0x628] ss:$16 sps:$4 sm:$0xff]   ;;  %v12528_v16 = vld [vmem:[%s13823_s6 + $0x644] ss:$16 sps:$4 sm:$0xff]  }
 0x43f   : > { %6006 = vmatprep.subr.bf16.mxu0 %v12436_v17  ;;  %6088 = vmatprep.subr.bf16.mxu1 %v12439_v18  ;;  %v12531_v17 = vld [vmem:[%s13823_s6 + $0x64c] ss:$16 sps:$4 sm:$0xff]   ;;  %v12526_v18 = vld [vmem:[%s13823_s6 + $0x640] ss:$16 sps:$4 sm:$0xff]  }
 0x442   : > { %6007 = vmatpush1.bf16.msra.mxu0 %v12434_v19  ;;  %6089 = vmatpush1.bf16.msra.mxu1 %v12437_v20  ;;  %v12529_v19 = vld [vmem:[%s13823_s6 + $0x648] ss:$16 sps:$4 sm:$0xff]   ;;  %v12534_v20 = vld [vmem:[%s13823_s6 + $0x664] ss:$16 sps:$4 sm:$0xff]  }
 0x443   : > { %6008 = vmatprep.subr.bf16.mxu0 %v12442_v21  ;;  %6090 = vmatprep.subr.bf16.mxu1 %v12445_v22  ;;  %v12537_v21 = vld [vmem:[%s13823_s6 + $0x66c] ss:$16 sps:$4 sm:$0xff]   ;;  %v12532_v22 = vld [vmem:[%s13823_s6 + $0x660] ss:$16 sps:$4 sm:$0xff]  }
 0x446   : > { %6009 = vmatpush1.bf16.msra.mxu0 %v12440_v23  ;;  %6091 = vmatpush1.bf16.msra.mxu1 %v12443_v24  ;;  %v12535_v23 = vld [vmem:[%s13823_s6 + $0x668] ss:$16 sps:$4 sm:$0xff]   ;;  %v12540_v24 = vld [vmem:[%s13823_s6 + $0x684] ss:$16 sps:$4 sm:$0xff]  }
 0x447   : > { %6010 = vmatprep.subr.bf16.mxu0 %v12448_v25  ;;  %6092 = vmatprep.subr.bf16.mxu1 %v12451_v26  ;;  %v12543_v25 = vld [vmem:[%s13823_s6 + $0x68c] ss:$16 sps:$4 sm:$0xff]   ;;  %v12538_v26 = vld [vmem:[%s13823_s6 + $0x680] ss:$16 sps:$4 sm:$0xff]  }
 0x44a   : > { %6011 = vmatpush1.bf16.msra.mxu0 %v12446_v27  ;;  %6093 = vmatpush1.bf16.msra.mxu1 %v12449_v28  ;;  %v12541_v27 = vld [vmem:[%s13823_s6 + $0x688] ss:$16 sps:$4 sm:$0xff]   ;;  %v12546_v28 = vld [vmem:[%s13823_s6 + $0x6a4] ss:$16 sps:$4 sm:$0xff]  }
 0x44b   : > { %6012 = vmatprep.subr.bf16.mxu0 %v12454_v29  ;;  %6094 = vmatprep.subr.bf16.mxu1 %v12457_v30  ;;  %v12549_v29 = vld [vmem:[%s13823_s6 + $0x6ac] ss:$16 sps:$4 sm:$0xff]   ;;  %v12544_v30 = vld [vmem:[%s13823_s6 + $0x6a0] ss:$16 sps:$4 sm:$0xff]  }
 0x44e   : > { %6013 = vmatpush1.bf16.msra.mxu0 %v12452_v31  ;;  %6095 = vmatpush1.bf16.msra.mxu1 %v12455_v32  ;;  %v12547_v31 = vld [vmem:[%s13823_s6 + $0x6a8] ss:$16 sps:$4 sm:$0xff]   ;;  %v12552_v32 = vld [vmem:[%s13823_s6 + $0x6c4] ss:$16 sps:$4 sm:$0xff]  }
 0x44f   : > { %6014 = vmatprep.subr.bf16.mxu0 %v12460_v33  ;;  %6096 = vmatprep.subr.bf16.mxu1 %v12463_v34  ;;  %v12555_v33 = vld [vmem:[%s13823_s6 + $0x6cc] ss:$16 sps:$4 sm:$0xff]   ;;  %v12550_v34 = vld [vmem:[%s13823_s6 + $0x6c0] ss:$16 sps:$4 sm:$0xff]  }
 0x452   : > { %6015 = vmatpush1.bf16.msra.mxu0 %v12458_v35  ;;  %6097 = vmatpush1.bf16.msra.mxu1 %v12461_v36  ;;  %v12553_v35 = vld [vmem:[%s13823_s6 + $0x6c8] ss:$16 sps:$4 sm:$0xff]   ;;  %v12558_v36 = vld [vmem:[%s13823_s6 + $0x6e4] ss:$16 sps:$4 sm:$0xff]  }
 0x453   : > { %6016 = vmatprep.subr.bf16.mxu0 %v12466_v37  ;;  %6098 = vmatprep.subr.bf16.mxu1 %v12469_v38  ;;  %v12561_v37 = vld [vmem:[%s13823_s6 + $0x6ec] ss:$16 sps:$4 sm:$0xff]   ;;  %v12556_v38 = vld [vmem:[%s13823_s6 + $0x6e0] ss:$16 sps:$4 sm:$0xff]  }
 0x456   : > { %6017 = vmatpush1.bf16.msra.mxu0 %v12464_v39  ;;  %6099 = vmatpush1.bf16.msra.mxu1 %v12467_v40  ;;  %v12559_v39 = vld [vmem:[%s13823_s6 + $0x6e8] ss:$16 sps:$4 sm:$0xff]   ;;  %v12564_v40 = vld [vmem:[%s13823_s6 + $0x704] ss:$16 sps:$4 sm:$0xff]  }
 0x457   : > { %6018 = vmatprep.subr.bf16.mxu0 %v12472_v41  ;;  %6100 = vmatprep.subr.bf16.mxu1 %v12475_v42  ;;  %v12567_v41 = vld [vmem:[%s13823_s6 + $0x70c] ss:$16 sps:$4 sm:$0xff]   ;;  %v12562_v42 = vld [vmem:[%s13823_s6 + $0x700] ss:$16 sps:$4 sm:$0xff]  }
 0x45a   : > { %6019 = vmatpush1.bf16.msra.mxu0 %v12470_v43  ;;  %6101 = vmatpush1.bf16.msra.mxu1 %v12473_v44  ;;  %v12565_v43 = vld [vmem:[%s13823_s6 + $0x708] ss:$16 sps:$4 sm:$0xff]   ;;  %v12570_v44 = vld [vmem:[%s13823_s6 + $0x724] ss:$16 sps:$4 sm:$0xff]  }
 0x45b   : > { %6020 = vmatprep.subr.bf16.mxu0 %v12478_v45  ;;  %6102 = vmatprep.subr.bf16.mxu1 %v12481_v46  ;;  %v12573_v45 = vld [vmem:[%s13823_s6 + $0x72c] ss:$16 sps:$4 sm:$0xff]   ;;  %v12568_v46 = vld [vmem:[%s13823_s6 + $0x720] ss:$16 sps:$4 sm:$0xff]  }
 0x45e   : > { %6021 = vmatpush1.bf16.msra.mxu0 %v12476_v47  ;;  %6103 = vmatpush1.bf16.msra.mxu1 %v12479_v48  ;;  %v12571_v47 = vld [vmem:[%s13823_s6 + $0x728] ss:$16 sps:$4 sm:$0xff]   ;;  %v12576_v48 = vld [vmem:[%s13823_s6 + $0x744] ss:$16 sps:$4 sm:$0xff]  }
 0x45f   : > { %6022 = vmatprep.subr.bf16.mxu0 %v12484_v49  ;;  %6104 = vmatprep.subr.bf16.mxu1 %v12487_v50  ;;  %v12579_v49 = vld [vmem:[%s13823_s6 + $0x74c] ss:$16 sps:$4 sm:$0xff]   ;;  %v12574_v50 = vld [vmem:[%s13823_s6 + $0x740] ss:$16 sps:$4 sm:$0xff]  }
 0x462   : > { %6023 = vmatpush1.bf16.msra.mxu0 %v12482_v51  ;;  %6105 = vmatpush1.bf16.msra.mxu1 %v12485_v52  ;;  %v12577_v51 = vld [vmem:[%s13823_s6 + $0x748] ss:$16 sps:$4 sm:$0xff]   ;;  %v12582_v52 = vld [vmem:[%s13823_s6 + $0x764] ss:$16 sps:$4 sm:$0xff]  }
 0x463   : > { %6024 = vmatprep.subr.bf16.mxu0 %v12490_v53  ;;  %6106 = vmatprep.subr.bf16.mxu1 %v12493_v54  ;;  %v12585_v53 = vld [vmem:[%s13823_s6 + $0x76c] ss:$16 sps:$4 sm:$0xff]   ;;  %v12580_v54 = vld [vmem:[%s13823_s6 + $0x760] ss:$16 sps:$4 sm:$0xff]  }
 0x466   : > { %6025 = vmatpush1.bf16.msra.mxu0 %v12488_v55  ;;  %6107 = vmatpush1.bf16.msra.mxu1 %v12491_v56  ;;  %v12583_v55 = vld [vmem:[%s13823_s6 + $0x768] ss:$16 sps:$4 sm:$0xff]   ;;  %v12588_v56 = vld [vmem:[%s13823_s6 + $0x784] ss:$16 sps:$4 sm:$0xff]  }
 0x467   : > { %6026 = vmatprep.subr.bf16.mxu0 %v12496_v57  ;;  %6108 = vmatprep.subr.bf16.mxu1 %v12499_v58  ;;  %v12591_v57 = vld [vmem:[%s13823_s6 + $0x78c] ss:$16 sps:$4 sm:$0xff]   ;;  %v12586_v58 = vld [vmem:[%s13823_s6 + $0x780] ss:$16 sps:$4 sm:$0xff]  }
 0x46a   : > { %6027 = vmatpush1.bf16.msra.mxu0 %v12494_v59  ;;  %6109 = vmatpush1.bf16.msra.mxu1 %v12497_v60  ;;  %v12589_v59 = vld [vmem:[%s13823_s6 + $0x788] ss:$16 sps:$4 sm:$0xff]   ;;  %v12594_v60 = vld [vmem:[%s13823_s6 + $0x7a4] ss:$16 sps:$4 sm:$0xff]  }
 0x46b   : > { %6028 = vmatprep.subr.bf16.mxu0 %v12502_v61  ;;  %6110 = vmatprep.subr.bf16.mxu1 %v12505_v62  ;;  %v12597_v61 = vld [vmem:[%s13823_s6 + $0x7ac] ss:$16 sps:$4 sm:$0xff]   ;;  %v12592_v62 = vld [vmem:[%s13823_s6 + $0x7a0] ss:$16 sps:$4 sm:$0xff]  }
 0x46e   : > { %6029 = vmatpush1.bf16.msra.mxu0 %v12500_v63  ;;  %6111 = vmatpush1.bf16.msra.mxu1 %v12503_v0  ;;  %v12595_v63 = vld [vmem:[%s13823_s6 + $0x7a8] ss:$16 sps:$4 sm:$0xff]   ;;  %v12600_v0 = vld [vmem:[%s13823_s6 + $0x7c4] ss:$16 sps:$4 sm:$0xff]  }
 0x46f   : > { %6030 = vmatprep.subr.bf16.mxu0 %v12508_v1  ;;  %6112 = vmatprep.subr.bf16.mxu1 %v12511_v2  ;;  %v12603_v1 = vld [vmem:[%s13823_s6 + $0x7cc] ss:$16 sps:$4 sm:$0xff]   ;;  %v12598_v2 = vld [vmem:[%s13823_s6 + $0x7c0] ss:$16 sps:$4 sm:$0xff]  }
 0x472   : > { %6031 = vmatpush1.bf16.msra.mxu0 %v12506_v3  ;;  %6113 = vmatpush1.bf16.msra.mxu1 %v12509_v4  ;;  %v12601_v3 = vld [vmem:[%s13823_s6 + $0x7c8] ss:$16 sps:$4 sm:$0xff]   ;;  %v12606_v4 = vld [vmem:[%s13823_s6 + $0x7e4] ss:$16 sps:$4 sm:$0xff]  }
 0x473   : > { %6041 = vmatprep.subr.bf16.mxu0 %v12516_v5  ;;  %6123 = vmatprep.subr.bf16.mxu1 %v12519_v6  ;;  %v12609_v5 = vld [vmem:[%s13823_s6 + $0x7ec] ss:$16 sps:$4 sm:$0xff]   ;;  %v12604_v6 = vld [vmem:[%s13823_s6 + $0x7e0] ss:$16 sps:$4 sm:$0xff]  }
 0x475   : > { %6033 = vmatmul.mubr.bf16.vlgmr.msra.gmra.mrb[0].mxu0 %v10431_v9  ;;  %6115 = vmatmul.mubr.bf16.vlgmr.msra.gmra.mrb[0].mxu1 %v10431_v9  ;;  %v12614_v9 = vld [vmem:[%s13823_s6 + $0x804] ss:$16 sps:$4 sm:$0xff]  }
 0x476   : > { %6042 = vmatpush1.bf16.msra.mxu0 %v12514_v7  ;;  %6124 = vmatpush1.bf16.msra.mxu1 %v12517_v10  ;;  %v12607_v7 = vld [vmem:[%s13823_s6 + $0x7e8] ss:$16 sps:$4 sm:$0xff]   ;;  %v12617_v10 = vld [vmem:[%s13823_s6 + $0x80c] ss:$16 sps:$4 sm:$0xff]  }
 0x477   : > { %6043 = vmatprep.subr.bf16.mxu0 %v12522_v12  ;;  %6125 = vmatprep.subr.bf16.mxu1 %v12525_v13  ;;  %v12612_v12 = vld [vmem:[%s13823_s6 + $0x800] ss:$16 sps:$4 sm:$0xff]   ;;  %v10433_v13 = vcombine.low %v14577_v11, %v14577_v11 }
 0x478   : > { %6073 = vmatprep.mubr.bf16.mxu0 %v10434_v14  ;;  %6155 = vmatprep.mubr.bf16.mxu1 %v10434_v14  ;;  %v14646_v14 = vld [vmem:[#allocation2 + $0x20] sm:$0xff] }
 0x479   : > { %v12618_v11 = vld [vmem:[%s13823_s6 + $0x820] ss:$16 sps:$4 sm:$0xff]  }
 0x47a   : > { %6044 = vmatpush1.bf16.msra.mxu0 %v12520_v8  ;;  %6126 = vmatpush1.bf16.msra.mxu1 %v12523_v15  ;;  %v12615_v8 = vld [vmem:[%s13823_s6 + $0x808] ss:$16 sps:$4 sm:$0xff]   ;;  %v12620_v15 = vld [vmem:[%s13823_s6 + $0x824] ss:$16 sps:$4 sm:$0xff]  }
 0x47b   : > { %6045 = vmatprep.subr.bf16.mxu0 %v12528_v16  ;;  %6127 = vmatprep.subr.bf16.mxu1 %v12531_v17  ;;  %v12623_v16 = vld [vmem:[%s13823_s6 + $0x82c] ss:$16 sps:$4 sm:$0xff]   ;;  %v10564_v17 = vcombine.high %v14646_v14, %v14646_v14 }
 0x47e   : > { %6046 = vmatpush1.bf16.msra.mxu0 %v12526_v18  ;;  %6128 = vmatpush1.bf16.msra.mxu1 %v12529_v19  ;;  %v12621_v18 = vld [vmem:[%s13823_s6 + $0x828] ss:$16 sps:$4 sm:$0xff]   ;;  %v12626_v19 = vld [vmem:[%s13823_s6 + $0x844] ss:$16 sps:$4 sm:$0xff]  }
 0x47f   : > { %6047 = vmatprep.subr.bf16.mxu0 %v12534_v20  ;;  %6129 = vmatprep.subr.bf16.mxu1 %v12537_v21  ;;  %v12629_v20 = vld [vmem:[%s13823_s6 + $0x84c] ss:$16 sps:$4 sm:$0xff]   ;;  %v12624_v21 = vld [vmem:[%s13823_s6 + $0x840] ss:$16 sps:$4 sm:$0xff]  }
 0x482   : > { %6048 = vmatpush1.bf16.msra.mxu0 %v12532_v22  ;;  %6130 = vmatpush1.bf16.msra.mxu1 %v12535_v23  ;;  %v12627_v22 = vld [vmem:[%s13823_s6 + $0x848] ss:$16 sps:$4 sm:$0xff]   ;;  %v12632_v23 = vld [vmem:[%s13823_s6 + $0x864] ss:$16 sps:$4 sm:$0xff]  }
 0x483   : > { %6049 = vmatprep.subr.bf16.mxu0 %v12540_v24  ;;  %6131 = vmatprep.subr.bf16.mxu1 %v12543_v25  ;;  %v12635_v24 = vld [vmem:[%s13823_s6 + $0x86c] ss:$16 sps:$4 sm:$0xff]   ;;  %v12630_v25 = vld [vmem:[%s13823_s6 + $0x860] ss:$16 sps:$4 sm:$0xff]  }
 0x486   : > { %6050 = vmatpush1.bf16.msra.mxu0 %v12538_v26  ;;  %6132 = vmatpush1.bf16.msra.mxu1 %v12541_v27  ;;  %v12633_v26 = vld [vmem:[%s13823_s6 + $0x868] ss:$16 sps:$4 sm:$0xff]   ;;  %v12638_v27 = vld [vmem:[%s13823_s6 + $0x884] ss:$16 sps:$4 sm:$0xff]  }
 0x487   : > { %6051 = vmatprep.subr.bf16.mxu0 %v12546_v28  ;;  %6133 = vmatprep.subr.bf16.mxu1 %v12549_v29  ;;  %v12641_v28 = vld [vmem:[%s13823_s6 + $0x88c] ss:$16 sps:$4 sm:$0xff]   ;;  %v12636_v29 = vld [vmem:[%s13823_s6 + $0x880] ss:$16 sps:$4 sm:$0xff]  }
 0x48a   : > { %6052 = vmatpush1.bf16.msra.mxu0 %v12544_v30  ;;  %6134 = vmatpush1.bf16.msra.mxu1 %v12547_v31  ;;  %v12639_v30 = vld [vmem:[%s13823_s6 + $0x888] ss:$16 sps:$4 sm:$0xff]   ;;  %v12644_v31 = vld [vmem:[%s13823_s6 + $0x8a4] ss:$16 sps:$4 sm:$0xff]  }
 0x48b   : > { %6053 = vmatprep.subr.bf16.mxu0 %v12552_v32  ;;  %6135 = vmatprep.subr.bf16.mxu1 %v12555_v33  ;;  %v12647_v32 = vld [vmem:[%s13823_s6 + $0x8ac] ss:$16 sps:$4 sm:$0xff]   ;;  %v12642_v33 = vld [vmem:[%s13823_s6 + $0x8a0] ss:$16 sps:$4 sm:$0xff]  }
 0x48e   : > { %6054 = vmatpush1.bf16.msra.mxu0 %v12550_v34  ;;  %6136 = vmatpush1.bf16.msra.mxu1 %v12553_v35  ;;  %v12645_v34 = vld [vmem:[%s13823_s6 + $0x8a8] ss:$16 sps:$4 sm:$0xff]   ;;  %v12650_v35 = vld [vmem:[%s13823_s6 + $0x8c4] ss:$16 sps:$4 sm:$0xff]  }
 0x48f   : > { %6055 = vmatprep.subr.bf16.mxu0 %v12558_v36  ;;  %6137 = vmatprep.subr.bf16.mxu1 %v12561_v37  ;;  %v12653_v36 = vld [vmem:[%s13823_s6 + $0x8cc] ss:$16 sps:$4 sm:$0xff]   ;;  %v12648_v37 = vld [vmem:[%s13823_s6 + $0x8c0] ss:$16 sps:$4 sm:$0xff]  }
 0x492   : > { %6056 = vmatpush1.bf16.msra.mxu0 %v12556_v38  ;;  %6138 = vmatpush1.bf16.msra.mxu1 %v12559_v39  ;;  %v12651_v38 = vld [vmem:[%s13823_s6 + $0x8c8] ss:$16 sps:$4 sm:$0xff]   ;;  %v12656_v39 = vld [vmem:[%s13823_s6 + $0x8e4] ss:$16 sps:$4 sm:$0xff]  }
 0x493   : > { %6057 = vmatprep.subr.bf16.mxu0 %v12564_v40  ;;  %6139 = vmatprep.subr.bf16.mxu1 %v12567_v41  ;;  %v12659_v40 = vld [vmem:[%s13823_s6 + $0x8ec] ss:$16 sps:$4 sm:$0xff]   ;;  %v12654_v41 = vld [vmem:[%s13823_s6 + $0x8e0] ss:$16 sps:$4 sm:$0xff]  }
 0x496   : > { %6058 = vmatpush1.bf16.msra.mxu0 %v12562_v42  ;;  %6140 = vmatpush1.bf16.msra.mxu1 %v12565_v43  ;;  %v12657_v42 = vld [vmem:[%s13823_s6 + $0x8e8] ss:$16 sps:$4 sm:$0xff]   ;;  %v12662_v43 = vld [vmem:[%s13823_s6 + $0x904] ss:$16 sps:$4 sm:$0xff]  }
 0x497   : > { %6059 = vmatprep.subr.bf16.mxu0 %v12570_v44  ;;  %6141 = vmatprep.subr.bf16.mxu1 %v12573_v45  ;;  %v12665_v44 = vld [vmem:[%s13823_s6 + $0x90c] ss:$16 sps:$4 sm:$0xff]   ;;  %v12660_v45 = vld [vmem:[%s13823_s6 + $0x900] ss:$16 sps:$4 sm:$0xff]  }
 0x49a   : > { %6060 = vmatpush1.bf16.msra.mxu0 %v12568_v46  ;;  %6142 = vmatpush1.bf16.msra.mxu1 %v12571_v47  ;;  %v12663_v46 = vld [vmem:[%s13823_s6 + $0x908] ss:$16 sps:$4 sm:$0xff]   ;;  %v12668_v47 = vld [vmem:[%s13823_s6 + $0x924] ss:$16 sps:$4 sm:$0xff]  }
 0x49b   : > { %6061 = vmatprep.subr.bf16.mxu0 %v12576_v48  ;;  %6143 = vmatprep.subr.bf16.mxu1 %v12579_v49  ;;  %v12671_v48 = vld [vmem:[%s13823_s6 + $0x92c] ss:$16 sps:$4 sm:$0xff]   ;;  %v12666_v49 = vld [vmem:[%s13823_s6 + $0x920] ss:$16 sps:$4 sm:$0xff]  }
 0x49e   : > { %6062 = vmatpush1.bf16.msra.mxu0 %v12574_v50  ;;  %6144 = vmatpush1.bf16.msra.mxu1 %v12577_v51  ;;  %v12669_v50 = vld [vmem:[%s13823_s6 + $0x928] ss:$16 sps:$4 sm:$0xff]   ;;  %v12674_v51 = vld [vmem:[%s13823_s6 + $0x944] ss:$16 sps:$4 sm:$0xff]  }
 0x49f   : > { %6063 = vmatprep.subr.bf16.mxu0 %v12582_v52  ;;  %6145 = vmatprep.subr.bf16.mxu1 %v12585_v53  ;;  %v12677_v52 = vld [vmem:[%s13823_s6 + $0x94c] ss:$16 sps:$4 sm:$0xff]   ;;  %v12672_v53 = vld [vmem:[%s13823_s6 + $0x940] ss:$16 sps:$4 sm:$0xff]  }
 0x4a2   : > { %6064 = vmatpush1.bf16.msra.mxu0 %v12580_v54  ;;  %6146 = vmatpush1.bf16.msra.mxu1 %v12583_v55  ;;  %v12675_v54 = vld [vmem:[%s13823_s6 + $0x948] ss:$16 sps:$4 sm:$0xff]   ;;  %v12680_v55 = vld [vmem:[%s13823_s6 + $0x964] ss:$16 sps:$4 sm:$0xff]  }
 0x4a3   : > { %6065 = vmatprep.subr.bf16.mxu0 %v12588_v56  ;;  %6147 = vmatprep.subr.bf16.mxu1 %v12591_v57  ;;  %v12683_v56 = vld [vmem:[%s13823_s6 + $0x96c] ss:$16 sps:$4 sm:$0xff]   ;;  %v12678_v57 = vld [vmem:[%s13823_s6 + $0x960] ss:$16 sps:$4 sm:$0xff]  }
 0x4a6   : > { %6066 = vmatpush1.bf16.msra.mxu0 %v12586_v58  ;;  %6148 = vmatpush1.bf16.msra.mxu1 %v12589_v59  ;;  %v12681_v58 = vld [vmem:[%s13823_s6 + $0x968] ss:$16 sps:$4 sm:$0xff]   ;;  %v12686_v59 = vld [vmem:[%s13823_s6 + $0x984] ss:$16 sps:$4 sm:$0xff]  }
 0x4a7   : > { %6067 = vmatprep.subr.bf16.mxu0 %v12594_v60  ;;  %6149 = vmatprep.subr.bf16.mxu1 %v12597_v61  ;;  %v12689_v60 = vld [vmem:[%s13823_s6 + $0x98c] ss:$16 sps:$4 sm:$0xff]   ;;  %v12684_v61 = vld [vmem:[%s13823_s6 + $0x980] ss:$16 sps:$4 sm:$0xff]  }
 0x4aa   : > { %6068 = vmatpush1.bf16.msra.mxu0 %v12592_v62  ;;  %6150 = vmatpush1.bf16.msra.mxu1 %v12595_v63  ;;  %v12687_v62 = vld [vmem:[%s13823_s6 + $0x988] ss:$16 sps:$4 sm:$0xff]   ;;  %v12692_v63 = vld [vmem:[%s13823_s6 + $0x9a4] ss:$16 sps:$4 sm:$0xff]  }
 0x4ab   : > { %6069 = vmatprep.subr.bf16.mxu0 %v12600_v0  ;;  %6151 = vmatprep.subr.bf16.mxu1 %v12603_v1  ;;  %v12695_v0 = vld [vmem:[%s13823_s6 + $0x9ac] ss:$16 sps:$4 sm:$0xff]   ;;  %v12690_v1 = vld [vmem:[%s13823_s6 + $0x9a0] ss:$16 sps:$4 sm:$0xff]  }
 0x4ae   : > { %6070 = vmatpush1.bf16.msra.mxu0 %v12598_v2  ;;  %6152 = vmatpush1.bf16.msra.mxu1 %v12601_v3  ;;  %v12693_v2 = vld [vmem:[%s13823_s6 + $0x9a8] ss:$16 sps:$4 sm:$0xff]   ;;  %v12698_v3 = vld [vmem:[%s13823_s6 + $0x9c4] ss:$16 sps:$4 sm:$0xff]  }
 0x4af   : > { %6071 = vmatprep.subr.bf16.mxu0 %v12606_v4  ;;  %6153 = vmatprep.subr.bf16.mxu1 %v12609_v5  ;;  %v12701_v4 = vld [vmem:[%s13823_s6 + $0x9cc] ss:$16 sps:$4 sm:$0xff]   ;;  %v12696_v5 = vld [vmem:[%s13823_s6 + $0x9c0] ss:$16 sps:$4 sm:$0xff]  }
 0x4b2   : > { %6072 = vmatpush1.bf16.msra.mxu0 %v12604_v6  ;;  %6154 = vmatpush1.bf16.msra.mxu1 %v12607_v7  ;;  %v12699_v6 = vld [vmem:[%s13823_s6 + $0x9c8] ss:$16 sps:$4 sm:$0xff]   ;;  %v12704_v7 = vld [vmem:[%s13823_s6 + $0x9e4] ss:$16 sps:$4 sm:$0xff]  }
 0x4b3   : > { %6953 = vmatprep.subr.bf16.mxu0 %v12614_v9  ;;  %7035 = vmatprep.subr.bf16.mxu1 %v12617_v10  ;;  %v12707_v9 = vld [vmem:[%s13823_s6 + $0x9ec] ss:$16 sps:$4 sm:$0xff]   ;;  %v12702_v10 = vld [vmem:[%s13823_s6 + $0x9e0] ss:$16 sps:$4 sm:$0xff]  }
 0x4b5   : > { %6074 = vmatmul.mubr.bf16.vlgmr.msra.gmra.mrb[0].mxu0 %v10433_v13  ;;  %6156 = vmatmul.mubr.bf16.vlgmr.msra.gmra.mrb[0].mxu1 %v10433_v13  ;;  %v12712_v13 = vld [vmem:[%s13823_s6 + $0xa04] ss:$16 sps:$4 sm:$0xff]  }
 0x4b6   : > { %6954 = vmatpush1.bf16.msra.mxu0 %v12612_v12  ;;  %7036 = vmatpush1.bf16.msra.mxu1 %v12615_v8  ;;  %v12705_v12 = vld [vmem:[%s13823_s6 + $0x9e8] ss:$16 sps:$4 sm:$0xff]   ;;  %v12715_v8 = vld [vmem:[%s13823_s6 + $0xa0c] ss:$16 sps:$4 sm:$0xff]  }
 0x4b7   : > { %6955 = vmatprep.subr.bf16.mxu0 %v12620_v15  ;;  %7037 = vmatprep.subr.bf16.mxu1 %v12623_v16  ;;  %v14713_v15 = vld [vmem:[#allocation2 + $0x28] sm:$0xff]  ;;  %v10563_v16 = vcombine.low %v14646_v14, %v14646_v14  ;;  %v12716_v14 = vld [vmem:[%s13823_s6 + $0xa20] ss:$16 sps:$4 sm:$0xff]  }
 0x4b8   : > { %6985 = vmatprep.mubr.bf16.mxu0 %v10564_v17  ;;  %7067 = vmatprep.mubr.bf16.mxu1 %v10564_v17  ;;  %v12710_v17 = vld [vmem:[%s13823_s6 + $0xa00] ss:$16 sps:$4 sm:$0xff]  }
 0x4ba   : > { %6956 = vmatpush1.bf16.msra.mxu0 %v12618_v11  ;;  %7038 = vmatpush1.bf16.msra.mxu1 %v12621_v18  ;;  %v12713_v11 = vld [vmem:[%s13823_s6 + $0xa08] ss:$16 sps:$4 sm:$0xff]   ;;  %v12718_v18 = vld [vmem:[%s13823_s6 + $0xa24] ss:$16 sps:$4 sm:$0xff]  }
 0x4bb   : > { %6957 = vmatprep.subr.bf16.mxu0 %v12626_v19  ;;  %7039 = vmatprep.subr.bf16.mxu1 %v12629_v20  ;;  %v12721_v19 = vld [vmem:[%s13823_s6 + $0xa2c] ss:$16 sps:$4 sm:$0xff]   ;;  %v10566_v20 = vcombine.high %v14713_v15, %v14713_v15 }
 0x4be   : > { %6958 = vmatpush1.bf16.msra.mxu0 %v12624_v21  ;;  %7040 = vmatpush1.bf16.msra.mxu1 %v12627_v22  ;;  %v12719_v21 = vld [vmem:[%s13823_s6 + $0xa28] ss:$16 sps:$4 sm:$0xff]   ;;  %v12724_v22 = vld [vmem:[%s13823_s6 + $0xa44] ss:$16 sps:$4 sm:$0xff]  }
 0x4bf   : > { %6959 = vmatprep.subr.bf16.mxu0 %v12632_v23  ;;  %7041 = vmatprep.subr.bf16.mxu1 %v12635_v24  ;;  %v12727_v23 = vld [vmem:[%s13823_s6 + $0xa4c] ss:$16 sps:$4 sm:$0xff]   ;;  %v12722_v24 = vld [vmem:[%s13823_s6 + $0xa40] ss:$16 sps:$4 sm:$0xff]  }
 0x4c2   : > { %6960 = vmatpush1.bf16.msra.mxu0 %v12630_v25  ;;  %7042 = vmatpush1.bf16.msra.mxu1 %v12633_v26  ;;  %v12725_v25 = vld [vmem:[%s13823_s6 + $0xa48] ss:$16 sps:$4 sm:$0xff]   ;;  %v12730_v26 = vld [vmem:[%s13823_s6 + $0xa64] ss:$16 sps:$4 sm:$0xff]  }
 0x4c3   : > { %6961 = vmatprep.subr.bf16.mxu0 %v12638_v27  ;;  %7043 = vmatprep.subr.bf16.mxu1 %v12641_v28  ;;  %v12733_v27 = vld [vmem:[%s13823_s6 + $0xa6c] ss:$16 sps:$4 sm:$0xff]   ;;  %v12728_v28 = vld [vmem:[%s13823_s6 + $0xa60] ss:$16 sps:$4 sm:$0xff]  }
 0x4c6   : > { %6962 = vmatpush1.bf16.msra.mxu0 %v12636_v29  ;;  %7044 = vmatpush1.bf16.msra.mxu1 %v12639_v30  ;;  %v12731_v29 = vld [vmem:[%s13823_s6 + $0xa68] ss:$16 sps:$4 sm:$0xff]   ;;  %v12736_v30 = vld [vmem:[%s13823_s6 + $0xa84] ss:$16 sps:$4 sm:$0xff]  }
 0x4c7   : > { %6963 = vmatprep.subr.bf16.mxu0 %v12644_v31  ;;  %7045 = vmatprep.subr.bf16.mxu1 %v12647_v32  ;;  %v12739_v31 = vld [vmem:[%s13823_s6 + $0xa8c] ss:$16 sps:$4 sm:$0xff]   ;;  %v12734_v32 = vld [vmem:[%s13823_s6 + $0xa80] ss:$16 sps:$4 sm:$0xff]  }
 0x4ca   : > { %6964 = vmatpush1.bf16.msra.mxu0 %v12642_v33  ;;  %7046 = vmatpush1.bf16.msra.mxu1 %v12645_v34  ;;  %v12737_v33 = vld [vmem:[%s13823_s6 + $0xa88] ss:$16 sps:$4 sm:$0xff]   ;;  %v12742_v34 = vld [vmem:[%s13823_s6 + $0xaa4] ss:$16 sps:$4 sm:$0xff]  }
 0x4cb   : > { %6965 = vmatprep.subr.bf16.mxu0 %v12650_v35  ;;  %7047 = vmatprep.subr.bf16.mxu1 %v12653_v36  ;;  %v12745_v35 = vld [vmem:[%s13823_s6 + $0xaac] ss:$16 sps:$4 sm:$0xff]   ;;  %v12740_v36 = vld [vmem:[%s13823_s6 + $0xaa0] ss:$16 sps:$4 sm:$0xff]  }
 0x4ce   : > { %6966 = vmatpush1.bf16.msra.mxu0 %v12648_v37  ;;  %7048 = vmatpush1.bf16.msra.mxu1 %v12651_v38  ;;  %v12743_v37 = vld [vmem:[%s13823_s6 + $0xaa8] ss:$16 sps:$4 sm:$0xff]   ;;  %v12748_v38 = vld [vmem:[%s13823_s6 + $0xac4] ss:$16 sps:$4 sm:$0xff]  }
 0x4cf   : > { %6967 = vmatprep.subr.bf16.mxu0 %v12656_v39  ;;  %7049 = vmatprep.subr.bf16.mxu1 %v12659_v40  ;;  %v12751_v39 = vld [vmem:[%s13823_s6 + $0xacc] ss:$16 sps:$4 sm:$0xff]   ;;  %v12746_v40 = vld [vmem:[%s13823_s6 + $0xac0] ss:$16 sps:$4 sm:$0xff]  }
 0x4d2   : > { %6968 = vmatpush1.bf16.msra.mxu0 %v12654_v41  ;;  %7050 = vmatpush1.bf16.msra.mxu1 %v12657_v42  ;;  %v12749_v41 = vld [vmem:[%s13823_s6 + $0xac8] ss:$16 sps:$4 sm:$0xff]   ;;  %v12754_v42 = vld [vmem:[%s13823_s6 + $0xae4] ss:$16 sps:$4 sm:$0xff]  }
 0x4d3   : > { %6969 = vmatprep.subr.bf16.mxu0 %v12662_v43  ;;  %7051 = vmatprep.subr.bf16.mxu1 %v12665_v44  ;;  %v12757_v43 = vld [vmem:[%s13823_s6 + $0xaec] ss:$16 sps:$4 sm:$0xff]   ;;  %v12752_v44 = vld [vmem:[%s13823_s6 + $0xae0] ss:$16 sps:$4 sm:$0xff]  }
 0x4d6   : > { %6970 = vmatpush1.bf16.msra.mxu0 %v12660_v45  ;;  %7052 = vmatpush1.bf16.msra.mxu1 %v12663_v46  ;;  %v12755_v45 = vld [vmem:[%s13823_s6 + $0xae8] ss:$16 sps:$4 sm:$0xff]   ;;  %v12760_v46 = vld [vmem:[%s13823_s6 + $0xb04] ss:$16 sps:$4 sm:$0xff]  }
 0x4d7   : > { %6971 = vmatprep.subr.bf16.mxu0 %v12668_v47  ;;  %7053 = vmatprep.subr.bf16.mxu1 %v12671_v48  ;;  %v12763_v47 = vld [vmem:[%s13823_s6 + $0xb0c] ss:$16 sps:$4 sm:$0xff]   ;;  %v12758_v48 = vld [vmem:[%s13823_s6 + $0xb00] ss:$16 sps:$4 sm:$0xff]  }
 0x4da   : > { %6972 = vmatpush1.bf16.msra.mxu0 %v12666_v49  ;;  %7054 = vmatpush1.bf16.msra.mxu1 %v12669_v50  ;;  %v12761_v49 = vld [vmem:[%s13823_s6 + $0xb08] ss:$16 sps:$4 sm:$0xff]   ;;  %v12766_v50 = vld [vmem:[%s13823_s6 + $0xb24] ss:$16 sps:$4 sm:$0xff]  }
 0x4db   : > { %6973 = vmatprep.subr.bf16.mxu0 %v12674_v51  ;;  %7055 = vmatprep.subr.bf16.mxu1 %v12677_v52  ;;  %v12769_v51 = vld [vmem:[%s13823_s6 + $0xb2c] ss:$16 sps:$4 sm:$0xff]   ;;  %v12764_v52 = vld [vmem:[%s13823_s6 + $0xb20] ss:$16 sps:$4 sm:$0xff]  }
 0x4de   : > { %6974 = vmatpush1.bf16.msra.mxu0 %v12672_v53  ;;  %7056 = vmatpush1.bf16.msra.mxu1 %v12675_v54  ;;  %v12767_v53 = vld [vmem:[%s13823_s6 + $0xb28] ss:$16 sps:$4 sm:$0xff]   ;;  %v12772_v54 = vld [vmem:[%s13823_s6 + $0xb44] ss:$16 sps:$4 sm:$0xff]  }
 0x4df   : > { %6975 = vmatprep.subr.bf16.mxu0 %v12680_v55  ;;  %7057 = vmatprep.subr.bf16.mxu1 %v12683_v56  ;;  %v12775_v55 = vld [vmem:[%s13823_s6 + $0xb4c] ss:$16 sps:$4 sm:$0xff]   ;;  %v12770_v56 = vld [vmem:[%s13823_s6 + $0xb40] ss:$16 sps:$4 sm:$0xff]  }
 0x4e2   : > { %6976 = vmatpush1.bf16.msra.mxu0 %v12678_v57  ;;  %7058 = vmatpush1.bf16.msra.mxu1 %v12681_v58  ;;  %v12773_v57 = vld [vmem:[%s13823_s6 + $0xb48] ss:$16 sps:$4 sm:$0xff]   ;;  %v12778_v58 = vld [vmem:[%s13823_s6 + $0xb64] ss:$16 sps:$4 sm:$0xff]  }
 0x4e3   : > { %6977 = vmatprep.subr.bf16.mxu0 %v12686_v59  ;;  %7059 = vmatprep.subr.bf16.mxu1 %v12689_v60  ;;  %v12781_v59 = vld [vmem:[%s13823_s6 + $0xb6c] ss:$16 sps:$4 sm:$0xff]   ;;  %v12776_v60 = vld [vmem:[%s13823_s6 + $0xb60] ss:$16 sps:$4 sm:$0xff]  }
 0x4e6   : > { %6978 = vmatpush1.bf16.msra.mxu0 %v12684_v61  ;;  %7060 = vmatpush1.bf16.msra.mxu1 %v12687_v62  ;;  %v12779_v61 = vld [vmem:[%s13823_s6 + $0xb68] ss:$16 sps:$4 sm:$0xff]   ;;  %v12784_v62 = vld [vmem:[%s13823_s6 + $0xb84] ss:$16 sps:$4 sm:$0xff]  }
 0x4e7   : > { %6979 = vmatprep.subr.bf16.mxu0 %v12692_v63  ;;  %7061 = vmatprep.subr.bf16.mxu1 %v12695_v0  ;;  %v12787_v63 = vld [vmem:[%s13823_s6 + $0xb8c] ss:$16 sps:$4 sm:$0xff]   ;;  %v12782_v0 = vld [vmem:[%s13823_s6 + $0xb80] ss:$16 sps:$4 sm:$0xff]  }
 0x4ea   : > { %6980 = vmatpush1.bf16.msra.mxu0 %v12690_v1  ;;  %7062 = vmatpush1.bf16.msra.mxu1 %v12693_v2  ;;  %v12785_v1 = vld [vmem:[%s13823_s6 + $0xb88] ss:$16 sps:$4 sm:$0xff]   ;;  %v12790_v2 = vld [vmem:[%s13823_s6 + $0xba4] ss:$16 sps:$4 sm:$0xff]  }
 0x4eb   : > { %6981 = vmatprep.subr.bf16.mxu0 %v12698_v3  ;;  %7063 = vmatprep.subr.bf16.mxu1 %v12701_v4  ;;  %v12793_v3 = vld [vmem:[%s13823_s6 + $0xbac] ss:$16 sps:$4 sm:$0xff]   ;;  %v12788_v4 = vld [vmem:[%s13823_s6 + $0xba0] ss:$16 sps:$4 sm:$0xff]  }
 0x4ee   : > { %6982 = vmatpush1.bf16.msra.mxu0 %v12696_v5  ;;  %7064 = vmatpush1.bf16.msra.mxu1 %v12699_v6  ;;  %v12791_v5 = vld [vmem:[%s13823_s6 + $0xba8] ss:$16 sps:$4 sm:$0xff]   ;;  %v12796_v6 = vld [vmem:[%s13823_s6 + $0xbc4] ss:$16 sps:$4 sm:$0xff]  }
 0x4ef   : > { %6983 = vmatprep.subr.bf16.mxu0 %v12704_v7  ;;  %7065 = vmatprep.subr.bf16.mxu1 %v12707_v9  ;;  %v12799_v7 = vld [vmem:[%s13823_s6 + $0xbcc] ss:$16 sps:$4 sm:$0xff]   ;;  %v12794_v9 = vld [vmem:[%s13823_s6 + $0xbc0] ss:$16 sps:$4 sm:$0xff]  }
 0x4f2   : > { %6984 = vmatpush1.bf16.msra.mxu0 %v12702_v10  ;;  %7066 = vmatpush1.bf16.msra.mxu1 %v12705_v12  ;;  %v12797_v10 = vld [vmem:[%s13823_s6 + $0xbc8] ss:$16 sps:$4 sm:$0xff]   ;;  %v12802_v12 = vld [vmem:[%s13823_s6 + $0xbe4] ss:$16 sps:$4 sm:$0xff]  }
 0x4f3   : > { %6994 = vmatprep.subr.bf16.mxu0 %v12712_v13  ;;  %7076 = vmatprep.subr.bf16.mxu1 %v12715_v8  ;;  %v12805_v13 = vld [vmem:[%s13823_s6 + $0xbec] ss:$16 sps:$4 sm:$0xff]   ;;  %v12800_v8 = vld [vmem:[%s13823_s6 + $0xbe0] ss:$16 sps:$4 sm:$0xff]  }
 0x4f5   : > { %6986 = vmatmul.mubr.bf16.vlgmr.msra.gmra.mrb[0].mxu0 %v10563_v16  ;;  %7068 = vmatmul.mubr.bf16.vlgmr.msra.gmra.mrb[0].mxu1 %v10563_v16  ;;  %v12803_v16 = vld [vmem:[%s13823_s6 + $0xbe8] ss:$16 sps:$4 sm:$0xff]  }
 0x4f6   : > { %6995 = vmatpush1.bf16.msra.mxu0 %v12710_v17  ;;  %7077 = vmatpush1.bf16.msra.mxu1 %v12713_v11  ;;  %v12810_v17 = vld [vmem:[%s13823_s6 + $0xc04] ss:$16 sps:$4 sm:$0xff]   ;;  %v12813_v11 = vld [vmem:[%s13823_s6 + $0xc0c] ss:$16 sps:$4 sm:$0xff]  }
 0x4f7   : > { %6996 = vmatprep.subr.bf16.mxu0 %v12718_v18  ;;  %7078 = vmatprep.subr.bf16.mxu1 %v12721_v19  ;;  %v10565_v18 = vcombine.low %v14713_v15, %v14713_v15  ;;  %v14785_v19 = vld [vmem:[#allocation2 + $0x30] sm:$0xff] }
 0x4f8   : > { %7026 = vmatprep.mubr.bf16.mxu0 %v10566_v20  ;;  %7108 = vmatprep.mubr.bf16.mxu1 %v10566_v20  ;;  %v12808_v20 = vld [vmem:[%s13823_s6 + $0xc00] ss:$16 sps:$4 sm:$0xff]  }
 0x4f9   : > { %v12814_v15 = vld [vmem:[%s13823_s6 + $0xc20] ss:$16 sps:$4 sm:$0xff]  }
 0x4fa   : > { %6997 = vmatpush1.bf16.msra.mxu0 %v12716_v14  ;;  %7079 = vmatpush1.bf16.msra.mxu1 %v12719_v21  ;;  %v12811_v14 = vld [vmem:[%s13823_s6 + $0xc08] ss:$16 sps:$4 sm:$0xff]   ;;  %v12816_v21 = vld [vmem:[%s13823_s6 + $0xc24] ss:$16 sps:$4 sm:$0xff]  }
 0x4fb   : > { %6998 = vmatprep.subr.bf16.mxu0 %v12724_v22  ;;  %7080 = vmatprep.subr.bf16.mxu1 %v12727_v23  ;;  %v12819_v22 = vld [vmem:[%s13823_s6 + $0xc2c] ss:$16 sps:$4 sm:$0xff]   ;;  %v10696_v23 = vcombine.high %v14785_v19, %v14785_v19 }
 0x4fe   : > { %6999 = vmatpush1.bf16.msra.mxu0 %v12722_v24  ;;  %7081 = vmatpush1.bf16.msra.mxu1 %v12725_v25  ;;  %v12817_v24 = vld [vmem:[%s13823_s6 + $0xc28] ss:$16 sps:$4 sm:$0xff]   ;;  %v12822_v25 = vld [vmem:[%s13823_s6 + $0xc44] ss:$16 sps:$4 sm:$0xff]  }
 0x4ff   : > { %7000 = vmatprep.subr.bf16.mxu0 %v12730_v26  ;;  %7082 = vmatprep.subr.bf16.mxu1 %v12733_v27  ;;  %v12825_v26 = vld [vmem:[%s13823_s6 + $0xc4c] ss:$16 sps:$4 sm:$0xff]   ;;  %v12820_v27 = vld [vmem:[%s13823_s6 + $0xc40] ss:$16 sps:$4 sm:$0xff]  }
 0x502   : > { %7001 = vmatpush1.bf16.msra.mxu0 %v12728_v28  ;;  %7083 = vmatpush1.bf16.msra.mxu1 %v12731_v29  ;;  %v12823_v28 = vld [vmem:[%s13823_s6 + $0xc48] ss:$16 sps:$4 sm:$0xff]   ;;  %v12828_v29 = vld [vmem:[%s13823_s6 + $0xc64] ss:$16 sps:$4 sm:$0xff]  }
 0x503   : > { %7002 = vmatprep.subr.bf16.mxu0 %v12736_v30  ;;  %7084 = vmatprep.subr.bf16.mxu1 %v12739_v31  ;;  %v12831_v30 = vld [vmem:[%s13823_s6 + $0xc6c] ss:$16 sps:$4 sm:$0xff]   ;;  %v12826_v31 = vld [vmem:[%s13823_s6 + $0xc60] ss:$16 sps:$4 sm:$0xff]  }
 0x506   : > { %7003 = vmatpush1.bf16.msra.mxu0 %v12734_v32  ;;  %7085 = vmatpush1.bf16.msra.mxu1 %v12737_v33  ;;  %v12829_v32 = vld [vmem:[%s13823_s6 + $0xc68] ss:$16 sps:$4 sm:$0xff]   ;;  %v12834_v33 = vld [vmem:[%s13823_s6 + $0xc84] ss:$16 sps:$4 sm:$0xff]  }
 0x507   : > { %7004 = vmatprep.subr.bf16.mxu0 %v12742_v34  ;;  %7086 = vmatprep.subr.bf16.mxu1 %v12745_v35  ;;  %v12837_v34 = vld [vmem:[%s13823_s6 + $0xc8c] ss:$16 sps:$4 sm:$0xff]   ;;  %v12832_v35 = vld [vmem:[%s13823_s6 + $0xc80] ss:$16 sps:$4 sm:$0xff]  }
 0x50a   : > { %7005 = vmatpush1.bf16.msra.mxu0 %v12740_v36  ;;  %7087 = vmatpush1.bf16.msra.mxu1 %v12743_v37  ;;  %v12835_v36 = vld [vmem:[%s13823_s6 + $0xc88] ss:$16 sps:$4 sm:$0xff]   ;;  %v12840_v37 = vld [vmem:[%s13823_s6 + $0xca4] ss:$16 sps:$4 sm:$0xff]  }
 0x50b   : > { %7006 = vmatprep.subr.bf16.mxu0 %v12748_v38  ;;  %7088 = vmatprep.subr.bf16.mxu1 %v12751_v39  ;;  %v12843_v38 = vld [vmem:[%s13823_s6 + $0xcac] ss:$16 sps:$4 sm:$0xff]   ;;  %v12838_v39 = vld [vmem:[%s13823_s6 + $0xca0] ss:$16 sps:$4 sm:$0xff]  }
 0x50e   : > { %7007 = vmatpush1.bf16.msra.mxu0 %v12746_v40  ;;  %7089 = vmatpush1.bf16.msra.mxu1 %v12749_v41  ;;  %v12841_v40 = vld [vmem:[%s13823_s6 + $0xca8] ss:$16 sps:$4 sm:$0xff]   ;;  %v12846_v41 = vld [vmem:[%s13823_s6 + $0xcc4] ss:$16 sps:$4 sm:$0xff]  }
 0x50f   : > { %7008 = vmatprep.subr.bf16.mxu0 %v12754_v42  ;;  %7090 = vmatprep.subr.bf16.mxu1 %v12757_v43  ;;  %v12849_v42 = vld [vmem:[%s13823_s6 + $0xccc] ss:$16 sps:$4 sm:$0xff]   ;;  %v12844_v43 = vld [vmem:[%s13823_s6 + $0xcc0] ss:$16 sps:$4 sm:$0xff]  }
 0x512   : > { %7009 = vmatpush1.bf16.msra.mxu0 %v12752_v44  ;;  %7091 = vmatpush1.bf16.msra.mxu1 %v12755_v45  ;;  %v12847_v44 = vld [vmem:[%s13823_s6 + $0xcc8] ss:$16 sps:$4 sm:$0xff]   ;;  %v12852_v45 = vld [vmem:[%s13823_s6 + $0xce4] ss:$16 sps:$4 sm:$0xff]  }
 0x513   : > { %7010 = vmatprep.subr.bf16.mxu0 %v12760_v46  ;;  %7092 = vmatprep.subr.bf16.mxu1 %v12763_v47  ;;  %v12855_v46 = vld [vmem:[%s13823_s6 + $0xcec] ss:$16 sps:$4 sm:$0xff]   ;;  %v12850_v47 = vld [vmem:[%s13823_s6 + $0xce0] ss:$16 sps:$4 sm:$0xff]  }
 0x516   : > { %7011 = vmatpush1.bf16.msra.mxu0 %v12758_v48  ;;  %7093 = vmatpush1.bf16.msra.mxu1 %v12761_v49  ;;  %v12853_v48 = vld [vmem:[%s13823_s6 + $0xce8] ss:$16 sps:$4 sm:$0xff]   ;;  %v12858_v49 = vld [vmem:[%s13823_s6 + $0xd04] ss:$16 sps:$4 sm:$0xff]  }
 0x517   : > { %7012 = vmatprep.subr.bf16.mxu0 %v12766_v50  ;;  %7094 = vmatprep.subr.bf16.mxu1 %v12769_v51  ;;  %v12861_v50 = vld [vmem:[%s13823_s6 + $0xd0c] ss:$16 sps:$4 sm:$0xff]   ;;  %v12856_v51 = vld [vmem:[%s13823_s6 + $0xd00] ss:$16 sps:$4 sm:$0xff]  }
 0x51a   : > { %7013 = vmatpush1.bf16.msra.mxu0 %v12764_v52  ;;  %7095 = vmatpush1.bf16.msra.mxu1 %v12767_v53  ;;  %v12859_v52 = vld [vmem:[%s13823_s6 + $0xd08] ss:$16 sps:$4 sm:$0xff]   ;;  %v12864_v53 = vld [vmem:[%s13823_s6 + $0xd24] ss:$16 sps:$4 sm:$0xff]  }
 0x51b   : > { %7014 = vmatprep.subr.bf16.mxu0 %v12772_v54  ;;  %7096 = vmatprep.subr.bf16.mxu1 %v12775_v55  ;;  %v12867_v54 = vld [vmem:[%s13823_s6 + $0xd2c] ss:$16 sps:$4 sm:$0xff]   ;;  %v12862_v55 = vld [vmem:[%s13823_s6 + $0xd20] ss:$16 sps:$4 sm:$0xff]  }
 0x51e   : > { %7015 = vmatpush1.bf16.msra.mxu0 %v12770_v56  ;;  %7097 = vmatpush1.bf16.msra.mxu1 %v12773_v57  ;;  %v12865_v56 = vld [vmem:[%s13823_s6 + $0xd28] ss:$16 sps:$4 sm:$0xff]   ;;  %v12870_v57 = vld [vmem:[%s13823_s6 + $0xd44] ss:$16 sps:$4 sm:$0xff]  }
 0x51f   : > { %7016 = vmatprep.subr.bf16.mxu0 %v12778_v58  ;;  %7098 = vmatprep.subr.bf16.mxu1 %v12781_v59  ;;  %v12873_v58 = vld [vmem:[%s13823_s6 + $0xd4c] ss:$16 sps:$4 sm:$0xff]   ;;  %v12868_v59 = vld [vmem:[%s13823_s6 + $0xd40] ss:$16 sps:$4 sm:$0xff]  }
 0x522   : > { %7017 = vmatpush1.bf16.msra.mxu0 %v12776_v60  ;;  %7099 = vmatpush1.bf16.msra.mxu1 %v12779_v61  ;;  %v12871_v60 = vld [vmem:[%s13823_s6 + $0xd48] ss:$16 sps:$4 sm:$0xff]   ;;  %v12876_v61 = vld [vmem:[%s13823_s6 + $0xd64] ss:$16 sps:$4 sm:$0xff]  }
 0x523   : > { %7018 = vmatprep.subr.bf16.mxu0 %v12784_v62  ;;  %7100 = vmatprep.subr.bf16.mxu1 %v12787_v63  ;;  %v12879_v62 = vld [vmem:[%s13823_s6 + $0xd6c] ss:$16 sps:$4 sm:$0xff]   ;;  %v12874_v63 = vld [vmem:[%s13823_s6 + $0xd60] ss:$16 sps:$4 sm:$0xff]  }
 0x526   : > { %7019 = vmatpush1.bf16.msra.mxu0 %v12782_v0  ;;  %7101 = vmatpush1.bf16.msra.mxu1 %v12785_v1  ;;  %v12877_v0 = vld [vmem:[%s13823_s6 + $0xd68] ss:$16 sps:$4 sm:$0xff]   ;;  %v12882_v1 = vld [vmem:[%s13823_s6 + $0xd84] ss:$16 sps:$4 sm:$0xff]  }
 0x527   : > { %7020 = vmatprep.subr.bf16.mxu0 %v12790_v2  ;;  %7102 = vmatprep.subr.bf16.mxu1 %v12793_v3  ;;  %v12885_v2 = vld [vmem:[%s13823_s6 + $0xd8c] ss:$16 sps:$4 sm:$0xff]   ;;  %v12880_v3 = vld [vmem:[%s13823_s6 + $0xd80] ss:$16 sps:$4 sm:$0xff]  }
 0x52a   : > { %7021 = vmatpush1.bf16.msra.mxu0 %v12788_v4  ;;  %7103 = vmatpush1.bf16.msra.mxu1 %v12791_v5  ;;  %v12883_v4 = vld [vmem:[%s13823_s6 + $0xd88] ss:$16 sps:$4 sm:$0xff]   ;;  %v12888_v5 = vld [vmem:[%s13823_s6 + $0xda4] ss:$16 sps:$4 sm:$0xff]  }
 0x52b   : > { %7022 = vmatprep.subr.bf16.mxu0 %v12796_v6  ;;  %7104 = vmatprep.subr.bf16.mxu1 %v12799_v7  ;;  %v12891_v6 = vld [vmem:[%s13823_s6 + $0xdac] ss:$16 sps:$4 sm:$0xff]   ;;  %v12886_v7 = vld [vmem:[%s13823_s6 + $0xda0] ss:$16 sps:$4 sm:$0xff]  }
 0x52e   : > { %7023 = vmatpush1.bf16.msra.mxu0 %v12794_v9  ;;  %7105 = vmatpush1.bf16.msra.mxu1 %v12797_v10  ;;  %v12889_v9 = vld [vmem:[%s13823_s6 + $0xda8] ss:$16 sps:$4 sm:$0xff]   ;;  %v12894_v10 = vld [vmem:[%s13823_s6 + $0xdc4] ss:$16 sps:$4 sm:$0xff]  }
 0x52f   : > { %7024 = vmatprep.subr.bf16.mxu0 %v12802_v12  ;;  %7106 = vmatprep.subr.bf16.mxu1 %v12805_v13  ;;  %v12897_v12 = vld [vmem:[%s13823_s6 + $0xdcc] ss:$16 sps:$4 sm:$0xff]   ;;  %v12892_v13 = vld [vmem:[%s13823_s6 + $0xdc0] ss:$16 sps:$4 sm:$0xff]  }
 0x532   : > { %7025 = vmatpush1.bf16.msra.mxu0 %v12800_v8  ;;  %7107 = vmatpush1.bf16.msra.mxu1 %v12803_v16  ;;  %v12895_v8 = vld [vmem:[%s13823_s6 + $0xdc8] ss:$16 sps:$4 sm:$0xff]   ;;  %v12900_v16 = vld [vmem:[%s13823_s6 + $0xde4] ss:$16 sps:$4 sm:$0xff]  }
 0x533   : > { %7906 = vmatprep.subr.bf16.mxu0 %v12810_v17  ;;  %7988 = vmatprep.subr.bf16.mxu1 %v12813_v11  ;;  %v12903_v17 = vld [vmem:[%s13823_s6 + $0xdec] ss:$16 sps:$4 sm:$0xff]   ;;  %v12898_v11 = vld [vmem:[%s13823_s6 + $0xde0] ss:$16 sps:$4 sm:$0xff]  }
 0x535   : > { %7027 = vmatmul.mubr.bf16.vlgmr.msra.gmra.mrb[0].mxu0 %v10565_v18  ;;  %7109 = vmatmul.mubr.bf16.vlgmr.msra.gmra.mrb[0].mxu1 %v10565_v18  ;;  %v12901_v18 = vld [vmem:[%s13823_s6 + $0xde8] ss:$16 sps:$4 sm:$0xff]  }
 0x536   : > { %7907 = vmatpush1.bf16.msra.mxu0 %v12808_v20  ;;  %7989 = vmatpush1.bf16.msra.mxu1 %v12811_v14  ;;  %v12908_v20 = vld [vmem:[%s13823_s6 + $0xe04] ss:$16 sps:$4 sm:$0xff]   ;;  %v12911_v14 = vld [vmem:[%s13823_s6 + $0xe0c] ss:$16 sps:$4 sm:$0xff]  }
 0x537   : > { %7908 = vmatprep.subr.bf16.mxu0 %v12816_v21  ;;  %7990 = vmatprep.subr.bf16.mxu1 %v12819_v22  ;;  %v10695_v21 = vcombine.low %v14785_v19, %v14785_v19  ;;  %v14855_v22 = vld [vmem:[#allocation2 + $0x38] sm:$0xff]  ;;  %v12912_v19 = vld [vmem:[%s13823_s6 + $0xe20] ss:$16 sps:$4 sm:$0xff]  }
 0x538   : > { %7938 = vmatprep.mubr.bf16.mxu0 %v10696_v23  ;;  %8020 = vmatprep.mubr.bf16.mxu1 %v10696_v23  ;;  %v12906_v23 = vld [vmem:[%s13823_s6 + $0xe00] ss:$16 sps:$4 sm:$0xff]  }
 0x53a   : > { %7909 = vmatpush1.bf16.msra.mxu0 %v12814_v15  ;;  %7991 = vmatpush1.bf16.msra.mxu1 %v12817_v24  ;;  %v12909_v15 = vld [vmem:[%s13823_s6 + $0xe08] ss:$16 sps:$4 sm:$0xff]   ;;  %v12914_v24 = vld [vmem:[%s13823_s6 + $0xe24] ss:$16 sps:$4 sm:$0xff]  }
 0x53b   : > { %7910 = vmatprep.subr.bf16.mxu0 %v12822_v25  ;;  %7992 = vmatprep.subr.bf16.mxu1 %v12825_v26  ;;  %v12917_v25 = vld [vmem:[%s13823_s6 + $0xe2c] ss:$16 sps:$4 sm:$0xff]   ;;  %v10698_v26 = vcombine.high %v14855_v22, %v14855_v22 }
 0x53e   : > { %7911 = vmatpush1.bf16.msra.mxu0 %v12820_v27  ;;  %7993 = vmatpush1.bf16.msra.mxu1 %v12823_v28  ;;  %v12915_v27 = vld [vmem:[%s13823_s6 + $0xe28] ss:$16 sps:$4 sm:$0xff]   ;;  %v12920_v28 = vld [vmem:[%s13823_s6 + $0xe44] ss:$16 sps:$4 sm:$0xff]  }
 0x53f   : > { %7912 = vmatprep.subr.bf16.mxu0 %v12828_v29  ;;  %7994 = vmatprep.subr.bf16.mxu1 %v12831_v30  ;;  %v12923_v29 = vld [vmem:[%s13823_s6 + $0xe4c] ss:$16 sps:$4 sm:$0xff]   ;;  %v12918_v30 = vld [vmem:[%s13823_s6 + $0xe40] ss:$16 sps:$4 sm:$0xff]  }
 0x542   : > { %7913 = vmatpush1.bf16.msra.mxu0 %v12826_v31  ;;  %7995 = vmatpush1.bf16.msra.mxu1 %v12829_v32  ;;  %v12921_v31 = vld [vmem:[%s13823_s6 + $0xe48] ss:$16 sps:$4 sm:$0xff]   ;;  %v12926_v32 = vld [vmem:[%s13823_s6 + $0xe64] ss:$16 sps:$4 sm:$0xff]  }
 0x543   : > { %7914 = vmatprep.subr.bf16.mxu0 %v12834_v33  ;;  %7996 = vmatprep.subr.bf16.mxu1 %v12837_v34  ;;  %v12929_v33 = vld [vmem:[%s13823_s6 + $0xe6c] ss:$16 sps:$4 sm:$0xff]   ;;  %v12924_v34 = vld [vmem:[%s13823_s6 + $0xe60] ss:$16 sps:$4 sm:$0xff]  }
 0x546   : > { %7915 = vmatpush1.bf16.msra.mxu0 %v12832_v35  ;;  %7997 = vmatpush1.bf16.msra.mxu1 %v12835_v36  ;;  %v12927_v35 = vld [vmem:[%s13823_s6 + $0xe68] ss:$16 sps:$4 sm:$0xff]   ;;  %v12932_v36 = vld [vmem:[%s13823_s6 + $0xe84] ss:$16 sps:$4 sm:$0xff]  }
 0x547   : > { %7916 = vmatprep.subr.bf16.mxu0 %v12840_v37  ;;  %7998 = vmatprep.subr.bf16.mxu1 %v12843_v38  ;;  %v12935_v37 = vld [vmem:[%s13823_s6 + $0xe8c] ss:$16 sps:$4 sm:$0xff]   ;;  %v12930_v38 = vld [vmem:[%s13823_s6 + $0xe80] ss:$16 sps:$4 sm:$0xff]  }
 0x54a   : > { %7917 = vmatpush1.bf16.msra.mxu0 %v12838_v39  ;;  %7999 = vmatpush1.bf16.msra.mxu1 %v12841_v40  ;;  %v12933_v39 = vld [vmem:[%s13823_s6 + $0xe88] ss:$16 sps:$4 sm:$0xff]   ;;  %v12938_v40 = vld [vmem:[%s13823_s6 + $0xea4] ss:$16 sps:$4 sm:$0xff]  }
 0x54b   : > { %7918 = vmatprep.subr.bf16.mxu0 %v12846_v41  ;;  %8000 = vmatprep.subr.bf16.mxu1 %v12849_v42  ;;  %v12941_v41 = vld [vmem:[%s13823_s6 + $0xeac] ss:$16 sps:$4 sm:$0xff]   ;;  %v12936_v42 = vld [vmem:[%s13823_s6 + $0xea0] ss:$16 sps:$4 sm:$0xff]  }
 0x54e   : > { %7919 = vmatpush1.bf16.msra.mxu0 %v12844_v43  ;;  %8001 = vmatpush1.bf16.msra.mxu1 %v12847_v44  ;;  %v12939_v43 = vld [vmem:[%s13823_s6 + $0xea8] ss:$16 sps:$4 sm:$0xff]   ;;  %v12944_v44 = vld [vmem:[%s13823_s6 + $0xec4] ss:$16 sps:$4 sm:$0xff]  }
 0x54f   : > { %7920 = vmatprep.subr.bf16.mxu0 %v12852_v45  ;;  %8002 = vmatprep.subr.bf16.mxu1 %v12855_v46  ;;  %v12947_v45 = vld [vmem:[%s13823_s6 + $0xecc] ss:$16 sps:$4 sm:$0xff]   ;;  %v12942_v46 = vld [vmem:[%s13823_s6 + $0xec0] ss:$16 sps:$4 sm:$0xff]  }
 0x552   : > { %7921 = vmatpush1.bf16.msra.mxu0 %v12850_v47  ;;  %8003 = vmatpush1.bf16.msra.mxu1 %v12853_v48  ;;  %v12945_v47 = vld [vmem:[%s13823_s6 + $0xec8] ss:$16 sps:$4 sm:$0xff]   ;;  %v12950_v48 = vld [vmem:[%s13823_s6 + $0xee4] ss:$16 sps:$4 sm:$0xff]  }
 0x553   : > { %7922 = vmatprep.subr.bf16.mxu0 %v12858_v49  ;;  %8004 = vmatprep.subr.bf16.mxu1 %v12861_v50  ;;  %v12953_v49 = vld [vmem:[%s13823_s6 + $0xeec] ss:$16 sps:$4 sm:$0xff]   ;;  %v12948_v50 = vld [vmem:[%s13823_s6 + $0xee0] ss:$16 sps:$4 sm:$0xff]  }
 0x556   : > { %7923 = vmatpush1.bf16.msra.mxu0 %v12856_v51  ;;  %8005 = vmatpush1.bf16.msra.mxu1 %v12859_v52  ;;  %v12951_v51 = vld [vmem:[%s13823_s6 + $0xee8] ss:$16 sps:$4 sm:$0xff]   ;;  %v12956_v52 = vld [vmem:[%s13823_s6 + $0xf04] ss:$16 sps:$4 sm:$0xff]  }
 0x557   : > { %7924 = vmatprep.subr.bf16.mxu0 %v12864_v53  ;;  %8006 = vmatprep.subr.bf16.mxu1 %v12867_v54  ;;  %v12959_v53 = vld [vmem:[%s13823_s6 + $0xf0c] ss:$16 sps:$4 sm:$0xff]   ;;  %v12954_v54 = vld [vmem:[%s13823_s6 + $0xf00] ss:$16 sps:$4 sm:$0xff]  }
 0x55a   : > { %7925 = vmatpush1.bf16.msra.mxu0 %v12862_v55  ;;  %8007 = vmatpush1.bf16.msra.mxu1 %v12865_v56  ;;  %v12957_v55 = vld [vmem:[%s13823_s6 + $0xf08] ss:$16 sps:$4 sm:$0xff]   ;;  %v12962_v56 = vld [vmem:[%s13823_s6 + $0xf24] ss:$16 sps:$4 sm:$0xff]  }
 0x55b   : > { %7926 = vmatprep.subr.bf16.mxu0 %v12870_v57  ;;  %8008 = vmatprep.subr.bf16.mxu1 %v12873_v58  ;;  %v12965_v57 = vld [vmem:[%s13823_s6 + $0xf2c] ss:$16 sps:$4 sm:$0xff]   ;;  %v12960_v58 = vld [vmem:[%s13823_s6 + $0xf20] ss:$16 sps:$4 sm:$0xff]  }
 0x55e   : > { %7927 = vmatpush1.bf16.msra.mxu0 %v12868_v59  ;;  %8009 = vmatpush1.bf16.msra.mxu1 %v12871_v60  ;;  %v12963_v59 = vld [vmem:[%s13823_s6 + $0xf28] ss:$16 sps:$4 sm:$0xff]   ;;  %v12968_v60 = vld [vmem:[%s13823_s6 + $0xf44] ss:$16 sps:$4 sm:$0xff]  }
 0x55f   : > { %7928 = vmatprep.subr.bf16.mxu0 %v12876_v61  ;;  %8010 = vmatprep.subr.bf16.mxu1 %v12879_v62  ;;  %v12971_v61 = vld [vmem:[%s13823_s6 + $0xf4c] ss:$16 sps:$4 sm:$0xff]   ;;  %v12966_v62 = vld [vmem:[%s13823_s6 + $0xf40] ss:$16 sps:$4 sm:$0xff]  }
 0x562   : > { %7929 = vmatpush1.bf16.msra.mxu0 %v12874_v63  ;;  %8011 = vmatpush1.bf16.msra.mxu1 %v12877_v0  ;;  %v12969_v63 = vld [vmem:[%s13823_s6 + $0xf48] ss:$16 sps:$4 sm:$0xff]   ;;  %v12974_v0 = vld [vmem:[%s13823_s6 + $0xf64] ss:$16 sps:$4 sm:$0xff]  }
 0x563   : > { %7930 = vmatprep.subr.bf16.mxu0 %v12882_v1  ;;  %8012 = vmatprep.subr.bf16.mxu1 %v12885_v2  ;;  %v12977_v1 = vld [vmem:[%s13823_s6 + $0xf6c] ss:$16 sps:$4 sm:$0xff]   ;;  %v12972_v2 = vld [vmem:[%s13823_s6 + $0xf60] ss:$16 sps:$4 sm:$0xff]  }
 0x566   : > { %7931 = vmatpush1.bf16.msra.mxu0 %v12880_v3  ;;  %8013 = vmatpush1.bf16.msra.mxu1 %v12883_v4  ;;  %v12975_v3 = vld [vmem:[%s13823_s6 + $0xf68] ss:$16 sps:$4 sm:$0xff]   ;;  %v12980_v4 = vld [vmem:[%s13823_s6 + $0xf84] ss:$16 sps:$4 sm:$0xff]  }
 0x567   : > { %7932 = vmatprep.subr.bf16.mxu0 %v12888_v5  ;;  %8014 = vmatprep.subr.bf16.mxu1 %v12891_v6  ;;  %v12983_v5 = vld [vmem:[%s13823_s6 + $0xf8c] ss:$16 sps:$4 sm:$0xff]   ;;  %v12978_v6 = vld [vmem:[%s13823_s6 + $0xf80] ss:$16 sps:$4 sm:$0xff]  }
 0x56a   : > { %7933 = vmatpush1.bf16.msra.mxu0 %v12886_v7  ;;  %8015 = vmatpush1.bf16.msra.mxu1 %v12889_v9  ;;  %v12981_v7 = vld [vmem:[%s13823_s6 + $0xf88] ss:$16 sps:$4 sm:$0xff]   ;;  %v12986_v9 = vld [vmem:[%s13823_s6 + $0xfa4] ss:$16 sps:$4 sm:$0xff]  }
 0x56b   : > { %7934 = vmatprep.subr.bf16.mxu0 %v12894_v10  ;;  %8016 = vmatprep.subr.bf16.mxu1 %v12897_v12  ;;  %v12989_v10 = vld [vmem:[%s13823_s6 + $0xfac] ss:$16 sps:$4 sm:$0xff]   ;;  %v12984_v12 = vld [vmem:[%s13823_s6 + $0xfa0] ss:$16 sps:$4 sm:$0xff]  }
 0x56e   : > { %7935 = vmatpush1.bf16.msra.mxu0 %v12892_v13  ;;  %8017 = vmatpush1.bf16.msra.mxu1 %v12895_v8  ;;  %v12987_v13 = vld [vmem:[%s13823_s6 + $0xfa8] ss:$16 sps:$4 sm:$0xff]   ;;  %v12992_v8 = vld [vmem:[%s13823_s6 + $0xfc4] ss:$16 sps:$4 sm:$0xff]  }
 0x56f   : > { %7936 = vmatprep.subr.bf16.mxu0 %v12900_v16  ;;  %8018 = vmatprep.subr.bf16.mxu1 %v12903_v17  ;;  %v12995_v16 = vld [vmem:[%s13823_s6 + $0xfcc] ss:$16 sps:$4 sm:$0xff]   ;;  %v12990_v17 = vld [vmem:[%s13823_s6 + $0xfc0] ss:$16 sps:$4 sm:$0xff]  }
 0x572   : > { %7937 = vmatpush1.bf16.msra.mxu0 %v12898_v11  ;;  %8019 = vmatpush1.bf16.msra.mxu1 %v12901_v18  ;;  %v12993_v11 = vld [vmem:[%s13823_s6 + $0xfc8] ss:$16 sps:$4 sm:$0xff]   ;;  %v12998_v18 = vld [vmem:[%s13823_s6 + $0xfe4] ss:$16 sps:$4 sm:$0xff]  }
 0x573   : > { %7947 = vmatprep.subr.bf16.mxu0 %v12908_v20  ;;  %8029 = vmatprep.subr.bf16.mxu1 %v12911_v14  ;;  %v13001_v20 = vld [vmem:[%s13823_s6 + $0xfec] ss:$16 sps:$4 sm:$0xff]   ;;  %v12996_v14 = vld [vmem:[%s13823_s6 + $0xfe0] ss:$16 sps:$4 sm:$0xff]  }
 0x575   : > { %7939 = vmatmul.mubr.bf16.vlgmr.msra.gmra.mrb[0].mxu0 %v10695_v21  ;;  %8021 = vmatmul.mubr.bf16.vlgmr.msra.gmra.mrb[0].mxu1 %v10695_v21  ;;  %v12999_v21 = vld [vmem:[%s13823_s6 + $0xfe8] ss:$16 sps:$4 sm:$0xff]  }
 0x576   : > { %7948 = vmatpush1.bf16.msra.mxu0 %v12906_v23  ;;  %8030 = vmatpush1.bf16.msra.mxu1 %v12909_v15  ;;  %v10697_v23 = vcombine.low %v14855_v22, %v14855_v22  ;;  %v5191_v15 = vlaneseq }
 0x577   : > { %7949 = vmatprep.subr.bf16.mxu0 %v12914_v24  ;;  %8031 = vmatprep.subr.bf16.mxu1 %v12917_v25 }
 0x578   : > { %7979 = vmatprep.mubr.bf16.mxu0 %v10698_v26  ;;  %8061 = vmatprep.mubr.bf16.mxu1 %v10698_v26  ;;  %v5192_v24 = vshrl.u32 %v5191_v15, 7 }
 0x57a   : > { %7950 = vmatpush1.bf16.msra.mxu0 %v12912_v19  ;;  %8032 = vmatpush1.bf16.msra.mxu1 %v12915_v27  ;;  %v5193_v25 = vsub.s32 0, %v5192_v24  ;;  %v5201_v26 = vsub.s32 2, %v5192_v24  ;;  %v4241_v19 = vld [vmem:[%s357_s7] sm:$0xf]  ;;  %v5197_v27 = vsub.s32 1, %v5192_v24 }
 0x57b   : > { %7951 = vmatprep.subr.bf16.mxu0 %v12920_v28  ;;  %8033 = vmatprep.subr.bf16.mxu1 %v12923_v29  ;;  %v5205_v28 = vsub.s32 3, %v5192_v24 }
 0x57c   : > { %v5194_v29 = vrot.slane %v4241_v19, %v5193_v25 }
 0x57e   : > { %7952 = vmatpush1.bf16.msra.mxu0 %v12918_v30  ;;  %8034 = vmatpush1.bf16.msra.mxu1 %v12921_v31  ;;  %v5202_v30 = vrot.slane %v4241_v19, %v5201_v26  ;;  %v5198_v31 = vrot.slane %v4241_v19, %v5197_v27 }
 0x57f   : > { %7953 = vmatprep.subr.bf16.mxu0 %v12926_v32  ;;  %8035 = vmatprep.subr.bf16.mxu1 %v12929_v33  ;;  %v5206_v32 = vrot.slane %v4241_v19, %v5205_v28 }
 0x582   : > { %7954 = vmatpush1.bf16.msra.mxu0 %v12924_v34  ;;  %8036 = vmatpush1.bf16.msra.mxu1 %v12927_v35 }
 0x583   : > { %7955 = vmatprep.subr.bf16.mxu0 %v12932_v36  ;;  %8037 = vmatprep.subr.bf16.mxu1 %v12935_v37 }
 0x586   : > { %7956 = vmatpush1.bf16.msra.mxu0 %v12930_v38  ;;  %8038 = vmatpush1.bf16.msra.mxu1 %v12933_v39 }
 0x587   : > { %7957 = vmatprep.subr.bf16.mxu0 %v12938_v40  ;;  %8039 = vmatprep.subr.bf16.mxu1 %v12941_v41 }
 0x58a   : > { %7958 = vmatpush1.bf16.msra.mxu0 %v12936_v42  ;;  %8040 = vmatpush1.bf16.msra.mxu1 %v12939_v43 }
 0x58b   : > { %7959 = vmatprep.subr.bf16.mxu0 %v12944_v44  ;;  %8041 = vmatprep.subr.bf16.mxu1 %v12947_v45 }
 0x58e   : > { %7960 = vmatpush1.bf16.msra.mxu0 %v12942_v46  ;;  %8042 = vmatpush1.bf16.msra.mxu1 %v12945_v47 }
 0x58f   : > { %7961 = vmatprep.subr.bf16.mxu0 %v12950_v48  ;;  %8043 = vmatprep.subr.bf16.mxu1 %v12953_v49 }
 0x592   : > { %7962 = vmatpush1.bf16.msra.mxu0 %v12948_v50  ;;  %8044 = vmatpush1.bf16.msra.mxu1 %v12951_v51 }
 0x593   : > { %7963 = vmatprep.subr.bf16.mxu0 %v12956_v52  ;;  %8045 = vmatprep.subr.bf16.mxu1 %v12959_v53 }
 0x596   : > { %7964 = vmatpush1.bf16.msra.mxu0 %v12954_v54  ;;  %8046 = vmatpush1.bf16.msra.mxu1 %v12957_v55 }
 0x597   : > { %7965 = vmatprep.subr.bf16.mxu0 %v12962_v56  ;;  %8047 = vmatprep.subr.bf16.mxu1 %v12965_v57 }
 0x59a   : > { %7966 = vmatpush1.bf16.msra.mxu0 %v12960_v58  ;;  %8048 = vmatpush1.bf16.msra.mxu1 %v12963_v59 }
 0x59b   : > { %7967 = vmatprep.subr.bf16.mxu0 %v12968_v60  ;;  %8049 = vmatprep.subr.bf16.mxu1 %v12971_v61 }
 0x59e   : > { %7968 = vmatpush1.bf16.msra.mxu0 %v12966_v62  ;;  %8050 = vmatpush1.bf16.msra.mxu1 %v12969_v63 }
 0x59f   : > { %7969 = vmatprep.subr.bf16.mxu0 %v12974_v0  ;;  %8051 = vmatprep.subr.bf16.mxu1 %v12977_v1 }
 0x5a2   : > { %7970 = vmatpush1.bf16.msra.mxu0 %v12972_v2  ;;  %8052 = vmatpush1.bf16.msra.mxu1 %v12975_v3 }
 0x5a3   : > { %7971 = vmatprep.subr.bf16.mxu0 %v12980_v4  ;;  %8053 = vmatprep.subr.bf16.mxu1 %v12983_v5 }
 0x5a6   : > { %7972 = vmatpush1.bf16.msra.mxu0 %v12978_v6  ;;  %8054 = vmatpush1.bf16.msra.mxu1 %v12981_v7 }
 0x5a7   : > { %7973 = vmatprep.subr.bf16.mxu0 %v12986_v9  ;;  %8055 = vmatprep.subr.bf16.mxu1 %v12989_v10 }
 0x5aa   : > { %7974 = vmatpush1.bf16.msra.mxu0 %v12984_v12  ;;  %8056 = vmatpush1.bf16.msra.mxu1 %v12987_v13 }
 0x5ab   : > { %7975 = vmatprep.subr.bf16.mxu0 %v12992_v8  ;;  %8057 = vmatprep.subr.bf16.mxu1 %v12995_v16 }
 0x5ae   : > { %7976 = vmatpush1.bf16.msra.mxu0 %v12990_v17  ;;  %8058 = vmatpush1.bf16.msra.mxu1 %v12993_v11 }
 0x5af   : > { %7977 = vmatprep.subr.bf16.mxu0 %v12998_v18  ;;  %8059 = vmatprep.subr.bf16.mxu1 %v13001_v20 }
 0x5b2   : > { %7978 = vmatpush1.bf16.msra.mxu0 %v12996_v14  ;;  %8060 = vmatpush1.bf16.msra.mxu1 %v12999_v21 }
 0x5b5   : > { %7980 = vmatmul.mubr.bf16.vlgmr.msra.gmra.mrb[0].mxu0 %v10697_v23  ;;  %8062 = vmatmul.mubr.bf16.vlgmr.msra.gmra.mrb[0].mxu1 %v10697_v23 }
 0x688   : > { %v7981_v22 = vpop.f32.mrb[0].mxu0  ;;  %v8063_v33 = vpop.f32.mrb[0].mxu1 }
 0x689   : > { %v11246_v34 = vadd.f32 %v7981_v22, %v5194_v29  ;;  %v11248_v35 = vadd.f32 %v8063_v33, %v5202_v30  ;;  %v7983_v36 = vpop.f32.mrb[1].mxu0  ;;  %v8065_v37 = vpop.f32.mrb[1].mxu1 }
 0x68a   : > { %v11247_v38 = vadd.f32 %v7983_v36, %v5198_v31  ;;  %v11249_v39 = vadd.f32 %v8065_v37, %v5206_v32  ;;  %v7985_v40 = vpop.f32.mrb[2].mxu0  ;;  %v8067_v41 = vpop.f32.mrb[2].mxu1 }
 0x68b   : > { %8074 = vst [vmem:[%s13842_s19] sm:$0xff] %v11246_v34  ;;  %v8078_v42 = vmax.f32 %v11246_v34, 0.0  ;;  %8076 = vst [vmem:[%s13842_s19 + $0x10] sm:$0xff] %v11248_v35  ;;  %v8080_v43 = vmax.f32 %v11248_v35, 0.0  ;;  %v7986_v44 = vpop.f32.mrb[3].mxu0  ;;  %v8068_v45 = vpop.f32.mrb[3].mxu1 }
 0x68c   : > { %8075 = vst [vmem:[%s13842_s19 + $0x8] sm:$0xff] %v11247_v38  ;;  %v8079_v46 = vmax.f32 %v11247_v38, 0.0  ;;  %8077 = vst [vmem:[%s13842_s19 + $0x18] sm:$0xff] %v11249_v39  ;;  %v8081_v47 = vmax.f32 %v11249_v39, 0.0 }
 0x68e   : > { %v11003_v48 = vpack.c.bf16 %v8079_v46, %v8078_v42  ;;  %v11004_v49 = vpack.c.bf16 %v8081_v47, %v8080_v43 }
 0x690   : > { %8102 = vst [vmem:[%s8101_s26] sm:$0xff] %v11003_v48  ;;  %8103 = vst [vmem:[%s8101_s26 + $0x8] sm:$0xff] %v11004_v49 }
 0x691 PF: > { %p10832_p13 = scmp.ne.s32.totalorder %s13579_s11, 8 }
 0x692   : > { %v13004_v50 = vld [vmem:[#allocation10 + $0x40] sm:$0xff] (!%p10832_p13)   ;;  %v13008_v54 = vld [vmem:[#allocation10 + $0x48] sm:$0xff] (!%p10832_p13)   ;;  %v13012_v58 = vld [vmem:[#allocation10 + $0x50] sm:$0xff] (!%p10832_p13)  }
 0x693   : > { %8107 = sbr.rel (%p10832_p13) target bundleno = 2033 (0x7f1), region = 72  ;;  %v13005_v51 = vld [vmem:[#allocation10 + $0xc0] sm:$0xff] (!%p10832_p13)   ;;  %11010 = vmatprep.subr.bf16.mxu0 (!%p10832_p13), %v13004_v50  ;;  %v13009_v55 = vld [vmem:[#allocation10 + $0xc8] sm:$0xff] (!%p10832_p13)   ;;  %v13013_v59 = vld [vmem:[#allocation10 + $0xd0] sm:$0xff] (!%p10832_p13)  }
 0x694   : > { %v13006_v52 = vld [vmem:[#allocation10] sm:$0xff] (!%p10832_p13)   ;;  %11032 = vmatprep.subr.bf16.mxu1 (!%p10832_p13), %v13005_v51  ;;  %v13010_v56 = vld [vmem:[#allocation10 + $0x8] sm:$0xff] (!%p10832_p13)   ;;  %v13014_v60 = vld [vmem:[#allocation10 + $0x10] sm:$0xff] (!%p10832_p13)  }
 0x695   : > { %v13007_v53 = vld [vmem:[#allocation10 + $0x80] sm:$0xff] (!%p10832_p13)   ;;  %11011 = vmatpush3.bf16.msra.mxu0 (!%p10832_p13), %v13006_v52  ;;  %v13011_v57 = vld [vmem:[#allocation10 + $0x88] sm:$0xff] (!%p10832_p13)   ;;  %v13015_v61 = vld [vmem:[#allocation10 + $0x90] sm:$0xff] (!%p10832_p13)  }
 0x696   : > { %11033 = vmatpush3.bf16.msra.mxu1 (!%p10832_p13), %v13007_v53  ;;  %11012 = vmatprep.subr.bf16.mxu0 (!%p10832_p13), %v13008_v54  ;;  %v13016_v62 = vld [vmem:[#allocation10 + $0x58] sm:$0xff] (!%p10832_p13)   ;;  %v13020_v2 = vld [vmem:[#allocation10 + $0x60] sm:$0xff] (!%p10832_p13)   ;;  %v13024_v6 = vld [vmem:[#allocation10 + $0x68] sm:$0xff] (!%p10832_p13)  }
 0x697   : > { %11034 = vmatprep.subr.bf16.mxu1 (!%p10832_p13), %v13009_v55  ;;  %v13017_v63 = vld [vmem:[#allocation10 + $0xd8] sm:$0xff] (!%p10832_p13)   ;;  %v13021_v3 = vld [vmem:[#allocation10 + $0xe0] sm:$0xff] (!%p10832_p13)   ;;  %v13025_v7 = vld [vmem:[#allocation10 + $0xe8] sm:$0xff] (!%p10832_p13)  }
 0x698   : > { %v13018_v0 = vld [vmem:[#allocation10 + $0x18] sm:$0xff] (!%p10832_p13)   ;;  %v13022_v4 = vld [vmem:[#allocation10 + $0x20] sm:$0xff] (!%p10832_p13)   ;;  %v13026_v9 = vld [vmem:[#allocation10 + $0x28] sm:$0xff] (!%p10832_p13)  }
 0x699   : > { %11013 = vmatpush3.bf16.msra.mxu0 (!%p10832_p13), %v13010_v56  ;;  %v13019_v1 = vld [vmem:[#allocation10 + $0x98] sm:$0xff] (!%p10832_p13)   ;;  %v13023_v5 = vld [vmem:[#allocation10 + $0xa0] sm:$0xff] (!%p10832_p13)   ;;  %v13027_v10 = vld [vmem:[#allocation10 + $0xa8] sm:$0xff] (!%p10832_p13)  }
 0x69a   : > { %11035 = vmatpush3.bf16.msra.mxu1 %v13011_v57  ;;  %11014 = vmatprep.subr.bf16.mxu0 %v13012_v58  ;;  %v13028_v12 = vld [vmem:[#allocation10 + $0x70] sm:$0xff]   ;;  %v13032_v17 = vld [vmem:[#allocation10 + $0x78] sm:$0xff]   ;;  %v8110_v21 = vld [vmem:[#allocation3 + $0x8] sm:$0xff] }
 0x69b   : > { %11036 = vmatprep.subr.bf16.mxu1 %v13013_v59  ;;  %v13029_v13 = vld [vmem:[#allocation10 + $0xf0] sm:$0xff]   ;;  %v13033_v11 = vld [vmem:[#allocation10 + $0xf8] sm:$0xff]   ;;  %v10835_v24 = vcombine.low %v8110_v21, %v8110_v21  ;;  %v10836_v25 = vcombine.high %v8110_v21, %v8110_v21  ;;  %v13040_v26 = vld [vmem:[#allocation10 + $0x140] sm:$0xff]  }
 0x69c   : > { %v13030_v8 = vld [vmem:[#allocation10 + $0x30] sm:$0xff]   ;;  %v13034_v18 = vld [vmem:[#allocation10 + $0x38] sm:$0xff]   ;;  %v13041_v19 = vld [vmem:[#allocation10 + $0x1c0] sm:$0xff]  }
 0x69d   : > { %11015 = vmatpush3.bf16.msra.mxu0 %v13014_v60  ;;  %v13031_v16 = vld [vmem:[#allocation10 + $0xb0] sm:$0xff]   ;;  %v13035_v20 = vld [vmem:[#allocation10 + $0xb8] sm:$0xff]   ;;  %8453 = vmatprep.mubr.bf16.mxu1 %v10836_v25  ;;  %v13042_v27 = vld [vmem:[#allocation10 + $0x100] sm:$0xff]  }
 0x69e   : > { %11037 = vmatpush3.bf16.msra.mxu1 %v13015_v61  ;;  %11016 = vmatprep.subr.bf16.mxu0 %v13016_v62  ;;  %v8109_v14 = vld [vmem:[#allocation3] sm:$0xff]  ;;  %v13043_v28 = vld [vmem:[#allocation10 + $0x180] sm:$0xff]   ;;  %v13044_v29 = vld [vmem:[#allocation10 + $0x148] sm:$0xff]  }
 0x69f   : > { %11038 = vmatprep.subr.bf16.mxu1 %v13017_v63  ;;  %v10833_v23 = vcombine.low %v8109_v14, %v8109_v14  ;;  %v10834_v15 = vcombine.high %v8109_v14, %v8109_v14  ;;  %v13045_v30 = vld [vmem:[#allocation10 + $0x1c8] sm:$0xff]   ;;  %v13048_v22 = vld [vmem:[#allocation10 + $0x150] sm:$0xff]   ;;  %v13052_v36 = vld [vmem:[#allocation10 + $0x158] sm:$0xff]  }
 0x6a0   : > { %v13046_v31 = vld [vmem:[#allocation10 + $0x108] sm:$0xff]   ;;  %v13049_v33 = vld [vmem:[#allocation10 + $0x1d0] sm:$0xff]   ;;  %v13053_v37 = vld [vmem:[#allocation10 + $0x1d8] sm:$0xff]  }
 0x6a1   : > { %11017 = vmatpush3.bf16.msra.mxu0 %v13018_v0  ;;  %8413 = vmatprep.mubr.bf16.mxu0 %v10834_v15  ;;  %v13047_v32 = vld [vmem:[#allocation10 + $0x188] sm:$0xff]   ;;  %v13050_v34 = vld [vmem:[#allocation10 + $0x110] sm:$0xff]   ;;  %v13054_v38 = vld [vmem:[#allocation10 + $0x118] sm:$0xff]  }
 0x6a2   : > { %11039 = vmatpush3.bf16.msra.mxu1 %v13019_v1  ;;  %11018 = vmatprep.subr.bf16.mxu0 %v13020_v2  ;;  %v13051_v35 = vld [vmem:[#allocation10 + $0x190] sm:$0xff]   ;;  %v13055_v39 = vld [vmem:[#allocation10 + $0x198] sm:$0xff]   ;;  %v13056_v40 = vld [vmem:[#allocation10 + $0x160] sm:$0xff]  }
 0x6a3   : > { %11040 = vmatprep.subr.bf16.mxu1 %v13021_v3  ;;  %v13057_v41 = vld [vmem:[#allocation10 + $0x1e0] sm:$0xff]   ;;  %v13060_v44 = vld [vmem:[#allocation10 + $0x168] sm:$0xff]   ;;  %v13064_v48 = vld [vmem:[#allocation10 + $0x170] sm:$0xff]  }
 0x6a4   : > { %v13058_v42 = vld [vmem:[#allocation10 + $0x120] sm:$0xff]   ;;  %v13061_v45 = vld [vmem:[#allocation10 + $0x1e8] sm:$0xff]   ;;  %v13065_v49 = vld [vmem:[#allocation10 + $0x1f0] sm:$0xff]  }
 0x6a5   : > { %11019 = vmatpush3.bf16.msra.mxu0 %v13022_v4  ;;  %v13059_v43 = vld [vmem:[#allocation10 + $0x1a0] sm:$0xff]   ;;  %v13062_v46 = vld [vmem:[#allocation10 + $0x128] sm:$0xff]   ;;  %v13066_v50 = vld [vmem:[#allocation10 + $0x130] sm:$0xff]  }
 0x6a6   : > { %11041 = vmatpush3.bf16.msra.mxu1 %v13023_v5  ;;  %11020 = vmatprep.subr.bf16.mxu0 %v13024_v6  ;;  %v13063_v47 = vld [vmem:[#allocation10 + $0x1a8] sm:$0xff]   ;;  %v13067_v51 = vld [vmem:[#allocation10 + $0x1b0] sm:$0xff]   ;;  %v13068_v52 = vld [vmem:[#allocation10 + $0x178] sm:$0xff]  }
 0x6a7   : > { %11042 = vmatprep.subr.bf16.mxu1 %v13025_v7  ;;  %v13069_v53 = vld [vmem:[#allocation10 + $0x1f8] sm:$0xff]   ;;  %v8469_v56 = vld [vmem:[#allocation3 + $0x10] sm:$0xff]  ;;  %v8470_v59 = vld [vmem:[#allocation3 + $0x18] sm:$0xff] }
 0x6a8   : > { %v13070_v54 = vld [vmem:[#allocation10 + $0x138] sm:$0xff]   ;;  %v10870_v57 = vcombine.low %v8469_v56, %v8469_v56  ;;  %v10871_v58 = vcombine.high %v8469_v56, %v8469_v56  ;;  %v10872_v60 = vcombine.low %v8470_v59, %v8470_v59  ;;  %v10873_v61 = vcombine.high %v8470_v59, %v8470_v59  ;;  %v13076_v62 = vld [vmem:[#allocation10 + $0x240] sm:$0xff]   ;;  %v13080_v2 = vld [vmem:[#allocation10 + $0x248] sm:$0xff]  }
 0x6a9   : > { %11021 = vmatpush3.bf16.msra.mxu0 %v13026_v9  ;;  %v13071_v55 = vld [vmem:[#allocation10 + $0x1b8] sm:$0xff]   ;;  %v13077_v63 = vld [vmem:[#allocation10 + $0x2c0] sm:$0xff]   ;;  %v13081_v3 = vld [vmem:[#allocation10 + $0x2c8] sm:$0xff]  }
 0x6aa   : > { %11043 = vmatpush3.bf16.msra.mxu1 %v13027_v10  ;;  %11022 = vmatprep.subr.bf16.mxu0 %v13028_v12  ;;  %v13078_v0 = vld [vmem:[#allocation10 + $0x200] sm:$0xff]   ;;  %v13082_v4 = vld [vmem:[#allocation10 + $0x208] sm:$0xff]   ;;  %v13084_v6 = vld [vmem:[#allocation10 + $0x250] sm:$0xff]  }
 0x6ab   : > { %11044 = vmatprep.subr.bf16.mxu1 %v13029_v13  ;;  %v13079_v1 = vld [vmem:[#allocation10 + $0x280] sm:$0xff]   ;;  %v13083_v5 = vld [vmem:[#allocation10 + $0x288] sm:$0xff]   ;;  %v13085_v7 = vld [vmem:[#allocation10 + $0x2d0] sm:$0xff]  }
 0x6ac   : > { %v13086_v9 = vld [vmem:[#allocation10 + $0x210] sm:$0xff]   ;;  %v13088_v12 = vld [vmem:[#allocation10 + $0x258] sm:$0xff]   ;;  %v13096_v14 = vld [vmem:[#allocation10 + $0x268] sm:$0xff]  }
 0x6ad   : > { %11023 = vmatpush3.bf16.msra.mxu0 %v13030_v8  ;;  %v13087_v10 = vld [vmem:[#allocation10 + $0x290] sm:$0xff]   ;;  %v13089_v13 = vld [vmem:[#allocation10 + $0x2d8] sm:$0xff]   ;;  %v13097_v21 = vld [vmem:[#allocation10 + $0x2e8] sm:$0xff]  }
 0x6ae   : > { %11045 = vmatpush3.bf16.msra.mxu1 %v13031_v16  ;;  %11024 = vmatprep.subr.bf16.mxu0 %v13032_v17  ;;  %v13090_v8 = vld [vmem:[#allocation10 + $0x218] sm:$0xff]   ;;  %v13092_v17 = vld [vmem:[#allocation10 + $0x260] sm:$0xff]   ;;  %v13099_v15 = vld [vmem:[#allocation10 + $0x2a8] sm:$0xff]  }
 0x6af   : > { %11046 = vmatprep.subr.bf16.mxu1 %v13033_v11  ;;  %v13091_v16 = vld [vmem:[#allocation10 + $0x298] sm:$0xff]   ;;  %v13093_v11 = vld [vmem:[#allocation10 + $0x2e0] sm:$0xff]   ;;  %v13101_v25 = vld [vmem:[#allocation10 + $0x2f0] sm:$0xff]  }
 0x6b0   : > { %v13132_v56 = vld [vmem:[#allocation10 + $0x368] sm:$0xff]  }
 0x6b1   : > { %11025 = vmatpush3.bf16.msra.mxu0 %v13034_v18  ;;  %v13094_v18 = vld [vmem:[#allocation10 + $0x220] sm:$0xff]   ;;  %v13135_v59 = vld [vmem:[#allocation10 + $0x3a8] sm:$0xff]  }
 0x6b2   : > { %11047 = vmatpush3.bf16.msra.mxu1 %v13035_v20  ;;  %11054 = vmatprep.subr.bf16.mxu0 %v13040_v26  ;;  %v13095_v20 = vld [vmem:[#allocation10 + $0x2a0] sm:$0xff]   ;;  %v13102_v26 = vld [vmem:[#allocation10 + $0x230] sm:$0xff]  }
 0x6b3   : > { %11076 = vmatprep.subr.bf16.mxu1 %v13041_v19  ;;  %v13103_v19 = vld [vmem:[#allocation10 + $0x2b0] sm:$0xff]  }
 0x6b4   : > { %8414 = vmatmul.mubr.bf16.vlgmr.msra.gmra.mrb[0].mxu0 %v10833_v23  ;;  %v13098_v23 = vld [vmem:[#allocation10 + $0x228] sm:$0xff]  }
 0x6b5   : > { %8454 = vmatmul.mubr.bf16.vlgmr.msra.gmra.mrb[0].mxu1 %v10835_v24  ;;  %11055 = vmatpush3.bf16.msra.mxu0 %v13042_v27  ;;  %v13100_v24 = vld [vmem:[#allocation10 + $0x270] sm:$0xff]   ;;  %v13104_v27 = vld [vmem:[#allocation10 + $0x278] sm:$0xff]  }
 0x6b6   : > { %11077 = vmatpush3.bf16.msra.mxu1 %v13043_v28  ;;  %11056 = vmatprep.subr.bf16.mxu0 %v13044_v29  ;;  %v13105_v28 = vld [vmem:[#allocation10 + $0x2f8] sm:$0xff]  }
 0x6b7   : > { %11078 = vmatprep.subr.bf16.mxu1 %v13045_v30  ;;  %8773 = vmatprep.mubr.bf16.mxu0 %v10871_v58  ;;  %v13106_v29 = vld [vmem:[#allocation10 + $0x238] sm:$0xff]   ;;  %v13134_v58 = vld [vmem:[#allocation10 + $0x328] sm:$0xff]  }
 0x6b8   : > { %8813 = vmatprep.mubr.bf16.mxu1 %v10873_v61  ;;  %v13107_v30 = vld [vmem:[#allocation10 + $0x2b8] sm:$0xff]   ;;  %v13137_v61 = vld [vmem:[#allocation10 + $0x3f0] sm:$0xff]  }
 0x6b9   : > { %11057 = vmatpush3.bf16.msra.mxu0 %v13046_v31  ;;  %v8823_v31 = vld [vmem:[#allocation3 + $0x20] sm:$0xff] }
 0x6ba   : > { %11079 = vmatpush3.bf16.msra.mxu1 %v13047_v32  ;;  %11058 = vmatprep.subr.bf16.mxu0 %v13048_v22  ;;  %v8824_v32 = vld [vmem:[#allocation3 + $0x28] sm:$0xff]  ;;  %v10906_v22 = vcombine.low %v8823_v31, %v8823_v31 }
 0x6bb   : > { %11080 = vmatprep.subr.bf16.mxu1 %v13049_v33  ;;  %v10907_v33 = vcombine.high %v8823_v31, %v8823_v31 }
 0x6bd   : > { %11059 = vmatpush3.bf16.msra.mxu0 %v13050_v34  ;;  %v10908_v34 = vcombine.low %v8824_v32, %v8824_v32 }
 0x6be   : > { %11081 = vmatpush3.bf16.msra.mxu1 %v13051_v35  ;;  %11060 = vmatprep.subr.bf16.mxu0 %v13052_v36  ;;  %v10909_v35 = vcombine.high %v8824_v32, %v8824_v32  ;;  %v13112_v36 = vld [vmem:[#allocation10 + $0x340] sm:$0xff]  }
 0x6bf   : > { %11082 = vmatprep.subr.bf16.mxu1 %v13053_v37  ;;  %v13113_v37 = vld [vmem:[#allocation10 + $0x3c0] sm:$0xff]  }
 0x6c1   : > { %11061 = vmatpush3.bf16.msra.mxu0 %v13054_v38  ;;  %v13114_v38 = vld [vmem:[#allocation10 + $0x300] sm:$0xff]  }
 0x6c2   : > { %11083 = vmatpush3.bf16.msra.mxu1 %v13055_v39  ;;  %11062 = vmatprep.subr.bf16.mxu0 %v13056_v40  ;;  %v13115_v39 = vld [vmem:[#allocation10 + $0x380] sm:$0xff]   ;;  %v13116_v40 = vld [vmem:[#allocation10 + $0x348] sm:$0xff]  }
 0x6c3   : > { %11084 = vmatprep.subr.bf16.mxu1 %v13057_v41  ;;  %v13117_v41 = vld [vmem:[#allocation10 + $0x3c8] sm:$0xff]  }
 0x6c5   : > { %11063 = vmatpush3.bf16.msra.mxu0 %v13058_v42  ;;  %v13118_v42 = vld [vmem:[#allocation10 + $0x308] sm:$0xff]  }
 0x6c6   : > { %11085 = vmatpush3.bf16.msra.mxu1 %v13059_v43  ;;  %11064 = vmatprep.subr.bf16.mxu0 %v13060_v44  ;;  %v13119_v43 = vld [vmem:[#allocation10 + $0x388] sm:$0xff]   ;;  %v13120_v44 = vld [vmem:[#allocation10 + $0x350] sm:$0xff]  }
 0x6c7   : > { %11086 = vmatprep.subr.bf16.mxu1 %v13061_v45  ;;  %v13121_v45 = vld [vmem:[#allocation10 + $0x3d0] sm:$0xff]  }
 0x6c9   : > { %11065 = vmatpush3.bf16.msra.mxu0 %v13062_v46  ;;  %v13122_v46 = vld [vmem:[#allocation10 + $0x310] sm:$0xff]  }
 0x6ca   : > { %11087 = vmatpush3.bf16.msra.mxu1 %v13063_v47  ;;  %11066 = vmatprep.subr.bf16.mxu0 %v13064_v48  ;;  %v13123_v47 = vld [vmem:[#allocation10 + $0x390] sm:$0xff]   ;;  %v13124_v48 = vld [vmem:[#allocation10 + $0x358] sm:$0xff]  }
 0x6cb   : > { %11088 = vmatprep.subr.bf16.mxu1 %v13065_v49  ;;  %v13125_v49 = vld [vmem:[#allocation10 + $0x3d8] sm:$0xff]  }
 0x6cd   : > { %11067 = vmatpush3.bf16.msra.mxu0 %v13066_v50  ;;  %v13126_v50 = vld [vmem:[#allocation10 + $0x318] sm:$0xff]  }
 0x6ce   : > { %11089 = vmatpush3.bf16.msra.mxu1 %v13067_v51  ;;  %11068 = vmatprep.subr.bf16.mxu0 %v13068_v52  ;;  %v13127_v51 = vld [vmem:[#allocation10 + $0x398] sm:$0xff]   ;;  %v13128_v52 = vld [vmem:[#allocation10 + $0x360] sm:$0xff]  }
 0x6cf   : > { %11090 = vmatprep.subr.bf16.mxu1 %v13069_v53  ;;  %v13129_v53 = vld [vmem:[#allocation10 + $0x3e0] sm:$0xff]  }
 0x6d1   : > { %11069 = vmatpush3.bf16.msra.mxu0 %v13070_v54  ;;  %v13130_v54 = vld [vmem:[#allocation10 + $0x320] sm:$0xff]  }
 0x6d2   : > { %11091 = vmatpush3.bf16.msra.mxu1 %v13071_v55  ;;  %11098 = vmatprep.subr.bf16.mxu0 %v13076_v62  ;;  %v13131_v55 = vld [vmem:[#allocation10 + $0x3a0] sm:$0xff]   ;;  %v13138_v62 = vld [vmem:[#allocation10 + $0x330] sm:$0xff]  }
 0x6d3   : > { %11120 = vmatprep.subr.bf16.mxu1 %v13077_v63  ;;  %v13139_v63 = vld [vmem:[#allocation10 + $0x3b0] sm:$0xff]  }
 0x6d4   : > { %8774 = vmatmul.mubr.bf16.vlgmr.msra.gmra.mrb[4].mxu0 %v10870_v57  ;;  %v13133_v57 = vld [vmem:[#allocation10 + $0x3e8] sm:$0xff]  }
 0x6d5   : > { %8814 = vmatmul.mubr.bf16.vlgmr.msra.gmra.mrb[4].mxu1 %v10872_v60  ;;  %11099 = vmatpush3.bf16.msra.mxu0 %v13078_v0  ;;  %v13136_v60 = vld [vmem:[#allocation10 + $0x370] sm:$0xff]   ;;  %v13140_v0 = vld [vmem:[#allocation10 + $0x378] sm:$0xff]  }
 0x6d6   : > { %11121 = vmatpush3.bf16.msra.mxu1 %v13079_v1  ;;  %11100 = vmatprep.subr.bf16.mxu0 %v13080_v2  ;;  %v13141_v1 = vld [vmem:[#allocation10 + $0x3f8] sm:$0xff]  }
 0x6d7   : > { %11122 = vmatprep.subr.bf16.mxu1 %v13081_v3  ;;  %9127 = vmatprep.mubr.bf16.mxu0 %v10907_v33  ;;  %v13142_v2 = vld [vmem:[#allocation10 + $0x338] sm:$0xff]  }
 0x6d8   : > { %9167 = vmatprep.mubr.bf16.mxu1 %v10909_v35  ;;  %v13143_v3 = vld [vmem:[#allocation10 + $0x3b8] sm:$0xff]  }
 0x6d9   : > { %11101 = vmatpush3.bf16.msra.mxu0 %v13082_v4  ;;  %v9177_v4 = vld [vmem:[#allocation3 + $0x30] sm:$0xff] }
 0x6da   : > { %11123 = vmatpush3.bf16.msra.mxu1 %v13083_v5  ;;  %11102 = vmatprep.subr.bf16.mxu0 %v13084_v6  ;;  %v9178_v5 = vld [vmem:[#allocation3 + $0x38] sm:$0xff]  ;;  %v10942_v6 = vcombine.low %v9177_v4, %v9177_v4 }
 0x6db   : > { %11124 = vmatprep.subr.bf16.mxu1 %v13085_v7  ;;  %v10943_v7 = vcombine.high %v9177_v4, %v9177_v4 }
 0x6dd   : > { %11103 = vmatpush3.bf16.msra.mxu0 %v13086_v9  ;;  %v10944_v9 = vcombine.low %v9178_v5, %v9178_v5 }
 0x6de   : > { %11125 = vmatpush3.bf16.msra.mxu1 %v13087_v10  ;;  %11104 = vmatprep.subr.bf16.mxu0 %v13088_v12  ;;  %v10945_v10 = vcombine.high %v9178_v5, %v9178_v5 }
 0x6df   : > { %11126 = vmatprep.subr.bf16.mxu1 %v13089_v13 }
 0x6e1   : > { %11105 = vmatpush3.bf16.msra.mxu0 %v13090_v8 }
 0x6e2   : > { %11127 = vmatpush3.bf16.msra.mxu1 %v13091_v16  ;;  %11106 = vmatprep.subr.bf16.mxu0 %v13092_v17 }
 0x6e3   : > { %11128 = vmatprep.subr.bf16.mxu1 %v13093_v11 }
 0x6e5   : > { %11107 = vmatpush3.bf16.msra.mxu0 %v13094_v18 }
 0x6e6   : > { %11129 = vmatpush3.bf16.msra.mxu1 %v13095_v20  ;;  %11108 = vmatprep.subr.bf16.mxu0 %v13096_v14 }
 0x6e7   : > { %11130 = vmatprep.subr.bf16.mxu1 %v13097_v21 }
 0x6e9   : > { %11109 = vmatpush3.bf16.msra.mxu0 %v13098_v23 }
 0x6ea   : > { %11131 = vmatpush3.bf16.msra.mxu1 %v13099_v15  ;;  %11110 = vmatprep.subr.bf16.mxu0 %v13100_v24 }
 0x6eb   : > { %11132 = vmatprep.subr.bf16.mxu1 %v13101_v25  ;;  %v10869_v25 = vld [vmem:[#allocation12] ss:$0 sm:$0xff] }
 0x6ed   : > { %11111 = vmatpush3.bf16.msra.mxu0 %v13102_v26 }
 0x6ee   : > { %11133 = vmatpush3.bf16.msra.mxu1 %v13103_v19  ;;  %11112 = vmatprep.subr.bf16.mxu0 %v13104_v27 }
 0x6ef   : > { %11134 = vmatprep.subr.bf16.mxu1 %v13105_v28 }
 0x6f1   : > { %11113 = vmatpush3.bf16.msra.mxu0 %v13106_v29 }
 0x6f2   : > { %11135 = vmatpush3.bf16.msra.mxu1 %v13107_v30  ;;  %11142 = vmatprep.subr.bf16.mxu0 %v13112_v36 }
 0x6f3   : > { %11164 = vmatprep.subr.bf16.mxu1 %v13113_v37 }
 0x6f4   : > { %9128 = vmatmul.mubr.bf16.vlgmr.msra.gmra.mrb[8].mxu0 %v10906_v22 }
 0x6f5   : > { %9168 = vmatmul.mubr.bf16.vlgmr.msra.gmra.mrb[8].mxu1 %v10908_v34  ;;  %11143 = vmatpush3.bf16.msra.mxu0 %v13114_v38 }
 0x6f6   : > { %11165 = vmatpush3.bf16.msra.mxu1 %v13115_v39  ;;  %11144 = vmatprep.subr.bf16.mxu0 %v13116_v40 }
 0x6f7   : > { %11166 = vmatprep.subr.bf16.mxu1 %v13117_v41  ;;  %9481 = vmatprep.mubr.bf16.mxu0 %v10943_v7 }
 0x6f8   : > { %9521 = vmatprep.mubr.bf16.mxu1 %v10945_v10 }
 0x6f9   : > { %11145 = vmatpush3.bf16.msra.mxu0 %v13118_v42 }
 0x6fa   : > { %11167 = vmatpush3.bf16.msra.mxu1 %v13119_v43  ;;  %11146 = vmatprep.subr.bf16.mxu0 %v13120_v44 }
 0x6fb   : > { %11168 = vmatprep.subr.bf16.mxu1 %v13121_v45 }
 0x6fd   : > { %11147 = vmatpush3.bf16.msra.mxu0 %v13122_v46 }
 0x6fe   : > { %11169 = vmatpush3.bf16.msra.mxu1 %v13123_v47  ;;  %11148 = vmatprep.subr.bf16.mxu0 %v13124_v48 }
 0x6ff   : > { %11170 = vmatprep.subr.bf16.mxu1 %v13125_v49 }
 0x701   : > { %11149 = vmatpush3.bf16.msra.mxu0 %v13126_v50 }
 0x702   : > { %11171 = vmatpush3.bf16.msra.mxu1 %v13127_v51  ;;  %11150 = vmatprep.subr.bf16.mxu0 %v13128_v52 }
 0x703   : > { %11172 = vmatprep.subr.bf16.mxu1 %v13129_v53 }
 0x705   : > { %11151 = vmatpush3.bf16.msra.mxu0 %v13130_v54 }
 0x706   : > { %11173 = vmatpush3.bf16.msra.mxu1 %v13131_v55  ;;  %11152 = vmatprep.subr.bf16.mxu0 %v13132_v56 }
 0x707   : > { %11174 = vmatprep.subr.bf16.mxu1 %v13133_v57 }
 0x709   : > { %11153 = vmatpush3.bf16.msra.mxu0 %v13134_v58 }
 0x70a   : > { %11175 = vmatpush3.bf16.msra.mxu1 %v13135_v59  ;;  %11154 = vmatprep.subr.bf16.mxu0 %v13136_v60 }
 0x70b   : > { %11176 = vmatprep.subr.bf16.mxu1 %v13137_v61 }
 0x70d   : > { %11155 = vmatpush3.bf16.msra.mxu0 %v13138_v62 }
 0x70e   : > { %11177 = vmatpush3.bf16.msra.mxu1 %v13139_v63  ;;  %11156 = vmatprep.subr.bf16.mxu0 %v13140_v0 }
 0x70f   : > { %11178 = vmatprep.subr.bf16.mxu1 %v13141_v1 }
 0x711   : > { %11157 = vmatpush3.bf16.msra.mxu0 %v13142_v2 }
 0x712   : > { %11179 = vmatpush3.bf16.msra.mxu1 %v13143_v3 }
 0x714   : > { %9482 = vmatmul.mubr.bf16.vlgmr.msra.gmra.mrb[12].mxu0 %v10942_v6 }
 0x715   : > { %9522 = vmatmul.mubr.bf16.vlgmr.msra.gmra.mrb[12].mxu1 %v10944_v9 }
 0x787   : > { %v11026_v12 = vpop.f32.mrb[0].mxu0 }
 0x788   : > { %v11048_v13 = vpop.f32.mrb[0].mxu1  ;;  %v11027_v8 = vpop.f32.mrb[1].mxu0 }
 0x789   : > { %v11049_v16 = vpop.f32.mrb[1].mxu1  ;;  %v11028_v17 = vadd.f32 %v11027_v8, %v11026_v12  ;;  %v11029_v18 = vpop.f32.mrb[2].mxu0 }
 0x78a   : > { %v11050_v11 = vadd.f32 %v11049_v16, %v11048_v13  ;;  %v11051_v20 = vpop.f32.mrb[2].mxu1  ;;  %v11030_v14 = vpop.f32.mrb[3].mxu0 }
 0x78b   : > { %v11052_v21 = vpop.f32.mrb[3].mxu1 }
 0x78c   : > { %v8456_v23 = vadd.f32 %v11050_v11, %v11028_v17 }
 0x78e   : > { %v8467_v22 = vadd.f32 %v10869_v25, %v8456_v23 }
 0x7a7   : > { %v11070_v15 = vpop.f32.mrb[4].mxu0 }
 0x7a8   : > { %v11092_v24 = vpop.f32.mrb[4].mxu1  ;;  %v11071_v26 = vpop.f32.mrb[5].mxu0 }
 0x7a9   : > { %v11093_v19 = vpop.f32.mrb[5].mxu1  ;;  %v11072_v27 = vadd.f32 %v11071_v26, %v11070_v15  ;;  %v11073_v29 = vpop.f32.mrb[6].mxu0 }
 0x7aa   : > { %v11094_v28 = vadd.f32 %v11093_v19, %v11092_v24  ;;  %v11095_v30 = vpop.f32.mrb[6].mxu1  ;;  %v11074_v31 = vpop.f32.mrb[7].mxu0 }
 0x7ab   : > { %v11096_v32 = vpop.f32.mrb[7].mxu1 }
 0x7ac   : > { %v8816_v33 = vadd.f32 %v11094_v28, %v11072_v27 }
 0x7ae   : > { %v8821_v34 = vadd.f32 %v8816_v33, %v8467_v22 }
 0x7c7   : > { %v11114_v35 = vpop.f32.mrb[8].mxu0 }
 0x7c8   : > { %v11136_v36 = vpop.f32.mrb[8].mxu1  ;;  %v11115_v37 = vpop.f32.mrb[9].mxu0 }
 0x7c9   : > { %v11116_v38 = vadd.f32 %v11115_v37, %v11114_v35  ;;  %v11137_v39 = vpop.f32.mrb[9].mxu1  ;;  %v11117_v40 = vpop.f32.mrb[10].mxu0 }
 0x7ca   : > { %v11138_v41 = vadd.f32 %v11137_v39, %v11136_v36  ;;  %v11139_v42 = vpop.f32.mrb[10].mxu1  ;;  %v11118_v43 = vpop.f32.mrb[11].mxu0 }
 0x7cb   : > { %v11140_v44 = vpop.f32.mrb[11].mxu1 }
 0x7cc   : > { %v9170_v45 = vadd.f32 %v11138_v41, %v11116_v38 }
 0x7ce   : > { %v9175_v46 = vadd.f32 %v9170_v45, %v8821_v34 }
 0x7e7   : > { %v11158_v47 = vpop.f32.mrb[12].mxu0 }
 0x7e8   : > { %v11180_v48 = vpop.f32.mrb[12].mxu1  ;;  %v11159_v49 = vpop.f32.mrb[13].mxu0 }
 0x7e9   : > { %v11160_v50 = vadd.f32 %v11159_v49, %v11158_v47  ;;  %v11181_v51 = vpop.f32.mrb[13].mxu1  ;;  %v11161_v52 = vpop.f32.mrb[14].mxu0 }
 0x7ea   : > { %v11182_v53 = vadd.f32 %v11181_v51, %v11180_v48  ;;  %v11183_v54 = vpop.f32.mrb[14].mxu1  ;;  %v11162_v55 = vpop.f32.mrb[15].mxu0 }
 0x7eb   : > { %v11184_v56 = vpop.f32.mrb[15].mxu1 }
 0x7ec   : > { %v9524_v57 = vadd.f32 %v11182_v53, %v11160_v50 }
 0x7ee   : > { %v9529_v58 = vadd.f32 %v9524_v57, %v9175_v46 }
 0x7f0   : > { %9530 = vst [vmem:[#allocation16] sm:$0xff] %v9529_v58 }
 0x7f1 PF: > { %s10982_s20 = sadd.s32 4294967292, %s13579_s11  ;;  %s9572_s22 = sshll.u32 %s13842_s19, 4  ;;  %s14933_s22 = int_to_ptr.vmem [resolvable:$true] %s9572_s22 }
 0x7f2   : > { %p9561_p8 = scmp.gt.s32.totalorder %s10982_s20, 0  ;;  %p10983_p0 = scmp.lt.s32.totalorder %s10982_s20, 3 }
 0x7f3   : > { %p9544_p3 = scmp.lt.s32.totalorder %s13579_s11, 3  ;;  %s9553_s10 = sshll.u32 %s13840_s15, 4  ;;  %s9554_s10 = int_to_ptr.vmem [resolvable:$true] %s9553_s10 }
 0x7f4   : > { %s15178_s20 = smov (!%p9561_p8, %s10982_s20), 0  ;;  %s15136_s6 = sld [smem:[#allocation37_spill]] }
 0x7f5   : > { %s15180_s20 = smov (!%p10983_p0, %s15178_s20), 3  ;;  %s9537_s23 = scalar_lea.sflag [#allocation15], %s344_s17 }
 0x7f6   : > { %s14937_s1 = scalar_select %p9544_p3, %s13579_s11, 3 }
 0x7f7   : > { %s11009_s21 = sshll.u32 %s15180_s20, 9  ;;  %s13292_s27 = scalar_lea.vmem %s14933_s22, 512 }
 0x7f8   : > { %s11006_s7 = sshll.u32 %s14937_s1, 9  ;;  %p13293_p11 = scmp.ne.s32.totalorder %s14933_s22, %s13292_s27 }
 0x7f9   : > { %p15137_p10 = scmp.ne.s32.totalorder %s15110_s14, 0  ;;  %s13487_s12 = smov [#allocation14]  }
 0x7fa   : > { %s14943_s24 = scalar_lea.hbm %s15136_s6, %s11009_s21  ;;  %s13296_s19 = sshll.u32 %s13487_s12, 4  ;;  %s13297_s19 = int_to_ptr.vmem [resolvable:$false] %s13296_s19 }
 0x7fb   : > { %p13294_p7 = pnand %p13293_p11, %p15137_p10  ;;  %s13298_s5 = scalar_lea.vmem %s13297_s19, 1024 }
 0x7fc   : > { %p13299_p5 = scmp.lt.s32.totalorder %s14933_s22, %s13297_s19  ;;  %p13300_p12 = scmp.lt.s32.totalorder %s13298_s5, %s13292_s27 }
 0x7fd   : > { %p13295_p9 = pneg %p13294_p7 }
 0x7fe   : > { %p13301_p2 = por %p13300_p12, %p13299_p5 }
 0x800   : > { %p13302_p1 = pnand %p13301_p2, %p13295_p9 }
 0x802   : > { %13305 = shalt.err (!%p13302_p1)
}
 0x803   : > { %s13306_s17 = scalar_lea.hbm %s14943_s24, 512  ;;  %s13310_s29 = scalar_lea.hbm %s15136_s6, 2048 }
 0x804   : > { %p13307_p4 = scmp.ne.s32.totalorder %s14943_s24, %s13306_s17  ;;  %p13311_p8 = scmp.lt.u32.totalorder %s14943_s24, %s15136_s6 }
 0x805   : > { %p13312_p0 = scmp.lt.u32.totalorder %s13310_s29, %s13306_s17  ;;  %p13314_p11 = scmp.lt.u32.totalorder %s13306_s17, %s14943_s24 }
 0x806   : > { %p13308_p6 = pnand %p13307_p4, %p15137_p10 }
 0x807   : > { %p13313_p3 = por %p13312_p0, %p13311_p8 }
 0x808   : > { %p13309_p13 = pneg %p13308_p6 }
 0x809   : > { %p13315_p7 = por %p13314_p11, %p13313_p3 }
 0x80b   : > { %p13316_p9 = pnand %p13315_p7, %p13309_p13 }
 0x80d   : > { %13319 = shalt.err (!%p13316_p9)
}
 0x80e   : > { %s15138_s21 = sld [smem:[#allocation28_spill]]  ;;  %s15139_s27 = sld [smem:[#allocation36_spill]] }
 0x80f   : > { %11323 = dma.vmem_to_hbm [thread:$0]  (%p15137_p10), %s14933_s22, 512, %s14943_s24, %s9537_s23  }
 0x810   : > { %s9532_s5 = scalar_lea.sflag [#allocation6], %s394_s30  ;;  %s13320_s17 = scalar_lea.vmem %s9554_s10, 512 }
 0x811   : > { %p13321_p5 = scmp.ne.s32.totalorder %s9554_s10, %s13320_s17  ;;  %s13488_s14 = smov [#allocation13]  }
 0x812   : > { %s13324_s16 = sshll.u32 %s13488_s14, 4  ;;  %s13325_s16 = int_to_ptr.vmem [resolvable:$false] %s13324_s16 }
 0x813   : > { %s13326_s18 = scalar_lea.vmem %s13325_s16, 1024  ;;  %p13327_p10 = scmp.lt.s32.totalorder %s9554_s10, %s13325_s16 }
 0x814   : > { %s15140_s12 = smov %s15139_s27  ;;  %s14974_s19 = scalar_lea.hbm %s15139_s27, %s11006_s7 }
 0x815   : > { %p15141_p12 = scmp.ne.s32.totalorder %s15138_s21, 0  ;;  %p13328_p4 = scmp.lt.s32.totalorder %s13326_s18, %s13320_s17 }
 0x817   : > { %p13322_p2 = pnand %p13321_p5, %p15141_p12  ;;  %p13329_p6 = por %p13328_p4, %p13327_p10 }
 0x819   : > { %p13323_p1 = pneg %p13322_p2 }
 0x81b   : > { %p13330_p13 = pnand %p13329_p6, %p13323_p1 }
 0x81d   : > { %13333 = shalt.err (!%p13330_p13)
}
 0x81e   : > { %s13334_s30 = scalar_lea.hbm %s14974_s19, 512  ;;  %s13338_s1 = scalar_lea.hbm %s15140_s12, 2048 }
 0x81f   : > { %p13335_p8 = scmp.ne.s32.totalorder %s14974_s19, %s13334_s30  ;;  %p13339_p11 = scmp.lt.u32.totalorder %s14974_s19, %s15140_s12 }
 0x820   : > { %p13340_p7 = scmp.lt.u32.totalorder %s13338_s1, %s13334_s30  ;;  %p13342_p5 = scmp.lt.u32.totalorder %s13334_s30, %s14974_s19 }
 0x821   : > { %p13336_p0 = pnand %p13335_p8, %p15141_p12 }
 0x822   : > { %p13341_p9 = por %p13340_p7, %p13339_p11 }
 0x823   : > { %p13337_p3 = pneg %p13336_p0 }
 0x824   : > { %p13343_p2 = por %p13342_p5, %p13341_p9 }
 0x826   : > { %p13344_p1 = pnand %p13343_p2, %p13337_p3 }
 0x828   : > { %13347 = shalt.err (!%p13344_p1)
}
 0x829   : > { %11322 = dma.vmem_to_hbm [thread:$0]  (%p15141_p12), %s9554_s10, 512, %s14974_s19, %s9532_s5  }
 0x82a   : > { %s13489_s23 = smov [#allocation16]   ;;  %p15142_p4 = scmp.eq.s32.totalorder %s13579_s11, 8 }
 0x82b   : > { %s9583_s29 = sshll.u32 %s13489_s23, 4  ;;  %s9584_s29 = int_to_ptr.vmem [resolvable:$true] %s9583_s29 }
 0x82c   : > { %s13348_s26 = scalar_lea.vmem %s9584_s29, 128  ;;  %p13355_p8 = scmp.lt.s32.totalorder %s9584_s29, %s9584_s29 }
 0x82d   : > { %p13349_p10 = scmp.ne.s32.totalorder %s9584_s29, %s13348_s26  ;;  %p13356_p0 = scmp.lt.s32.totalorder %s13348_s26, %s13348_s26 }
 0x82f   : > { %p13350_p6 = pnand %p13349_p10, %p15142_p4  ;;  %p13357_p11 = por %p13356_p0, %p13355_p8 }
 0x831   : > { %p13351_p13 = pneg %p13350_p6 }
 0x833   : > { %p13358_p7 = pnand %p13357_p11, %p13351_p13 }
 0x835   : > { %13361 = shalt.err (!%p13358_p7)
}
 0x836   : > { %s15143_s3 = sld [smem:[#allocation38_spill]]  ;;  %p15144_p3 = pmov %p15142_p4 }
 0x83c   : > { %s13362_s21 = scalar_lea.hbm %s15143_s3, 128 }
 0x83d   : > { %p13363_p12 = scmp.ne.s32.totalorder %s15143_s3, %s13362_s21  ;;  %p13368_p2 = scmp.lt.u32.totalorder %s13362_s21, %s15143_s3 }
 0x83f   : > { %p13364_p9 = pnand %p13363_p12, %p15144_p3 }
 0x841   : > { %p13365_p5 = pneg %p13364_p9 }
 0x843   : > { %p13370_p1 = pnand %p13368_p2, %p13365_p5 }
 0x845   : > { %13373 = shalt.err (!%p13370_p1)
}
 0x846   : > { %p15145_p10 = pmov %p15144_p3  ;;  %p15146_p4 = pmov %p15144_p3 }
 0x848   : > { %11325 = dma.vmem_to_hbm [thread:$0]  (%p15145_p10), %s9584_s29, 128, %s15143_s3, [#allocation15]  }
 0x849   : > { %13427 = dma.done.wait (%p15146_p4), [#allocation15], 128   ;;  %p15147_p6 = pmov %p15144_p3 }
 0x84b   : > { %13429 = vsyncadd (%p15147_p6), [#allocation15], 4294967168 }
 0x84c PF: > { %s15148_s16 = sld [smem:[#allocation26_spill]]  ;;  %s15149_s18 = sld [smem:[#allocation24_spill]] }
 0x84d   : > { %s15150_s30 = sld [smem:[#allocation29_spill]] }
 0x852   : > { %p11363_p13 = scmp.ge.s32.totalorder %s15148_s16, 2  ;;  %s9599_s15 = sand.u32 1, %s15149_s18  }
 0x853   : > { %p15151_p8 = scmp.ne.s32.totalorder %s15150_s30, 0  ;;  %s9600_s22 = scalar_lea.sflag [#allocation6], %s9599_s15 }
 0x855   : > { %p11348_p0 = pnand %p11363_p13, %p15151_p8 }
 0x857   : > { %13431 = dma.done.wait (!%p11348_p0), %s9600_s22, 512  }
 0x858   : > { %13433 = vsyncadd (!%p11348_p0), %s9600_s22, 4294966784  ;;  %s15152_s1 = sadd.s32 4294967294, %s15148_s16   ;;  %s15153_s24 = sld [smem:[#allocation31_spill]] }
 0x859   : > { %s9608_s7 = sand.u32 1, %s15152_s1  }
 0x85a   : > { %s9609_s23 = scalar_lea.sflag [#allocation15], %s9608_s7 }
 0x85e   : > { %p15154_p11 = scmp.ne.s32.totalorder %s15153_s24, 0 }
 0x860   : > { %p11351_p7 = pnand %p11363_p13, %p15154_p11 }
 0x862   : > { %13435 = dma.done.wait (!%p11351_p7), %s9609_s23, 512  }
 0x863   : > { %13437 = vsyncadd (!%p11351_p7), %s9609_s23, 4294966784  ;;  %s15155_s10 = sld [smem:[#allocation27_spill]]  ;;  %s15156_s11 = sld [smem:[#allocation23_spill]] }
 0x864   : > { %s15157_s26 = sld [smem:[#allocation32_spill]]  ;;  %s15158_s29 = sld [smem:[#allocation25_spill]] }
 0x865   : > { %s15159_s20 = sld [smem:[#allocation30_spill]]  ;;  %s15160_s13 = sld [smem:[#allocation33_spill]] }
 0x866   : > { %s15161_s24 = smov %s13444_s25  ;;  %s15163_s27 = smov %s13456_s28 }
 0x867   : > { %s15166_s30 = smov %s13468_s8  ;;  %s15167_s8 = smov %s13472_s9 }
 0x869   : > { %p26_p12 = scmp.ge.s32.totalorder %s15155_s10, 11   ;;  %s15162_s25 = smov %s15156_s11 }
 0x86a   : > { %s15164_s28 = smov %s15158_s29 }
 0x86b   : > { %s15165_s29 = smov %s15159_s20  ;;  %s15168_s9 = smov %s15160_s13 }
 0x86c   :  { %28 = sbr.rel (!%p26_p12) target bundleno = 18 (0x12), region = 154 }
 0x873   :  { %9614 = vsyncpa [#allocation5], 1 }
 0x874   :  { %9616 = vsyncpa [#allocation5 + $0x1], 1 }
 0x875   :  { %9617 = vsyncpa [#allocation8], 1 }
 0x876   :  { %9619 = vsyncpa [#allocation8 + $0x1], 1 }
 0x877   :  { %9620 = vsyncpa [#allocation11], 1 }
 0x878   :  { %9621 = vsyncpa [#allocation6], 1 }
 0x879   :  { %9623 = vsyncpa [#allocation6 + $0x1], 1 }
 0x87a   :  { %9624 = vsyncpa [#allocation15], 1 }
 0x87b   :  { %9626 = vsyncpa [#allocation15 + $0x1], 1 }

</bundles_post_ra>
